<compile_context>
chip_gen: v7x
topology: tpu7x:2x2x1
jax: 0.10.0
libtpu: 0.0.40
codegen_flags: <defaults>
</compile_context>

<pallas_src>
import functools

import jax
import jax.numpy as jnp
from jax.experimental import pallas as pl
from jax.experimental.pallas import tpu as pltpu


def _attn_pool_kernel(*refs, gamma, has_mask, has_values):
    it = iter(refs)
    key_ref = next(it)
    qbias_ref = next(it)
    mask_ref = next(it) if has_mask else None
    val_ref = next(it) if has_values else None
    wk_ref = next(it)
    ws_ref = next(it)
    scores_ref = next(it)
    ctx_ref = next(it)

    BT, S, Hk = key_ref.shape
    A = wk_ref.shape[-1]

    # --- key projection: one big [BT*S, Hk] @ [Hk, A] MXU matmul, f32 accumulation ----
    key_blk = key_ref[...]
    sbt = jnp.dot(key_blk.reshape(BT * S, Hk), wk_ref[...],
                  preferred_element_type=jnp.float32).reshape(BT, S, A)

    # --- add precomputed query bias (sum_i q_i @ Wq_i), broadcast over S --------------
    sbt = sbt + qbias_ref[...][:, None, :].astype(jnp.float32)

    # --- score projection: tanh (EUP), then VPU multiply + lane reduce over A ---------
    ws = ws_ref[...].astype(jnp.float32)                           # [1, A]
    score_u = jnp.sum(jnp.tanh(sbt) * ws[None, :, :], axis=-1)     # [BT, S]

    # --- masked_fill_(mask != 1, -1e12): host provides an exact 0/1 keep stream -------
    if mask_ref is not None:
        keep = mask_ref[...].astype(jnp.float32) > 0.5
        score_u = jnp.where(keep, score_u, jnp.float32(-1e12))

    logits = score_u * jnp.float32(1.0 / gamma)

    # --- softmax over S (S on lanes -> lane-axis reductions), EUP approx reciprocal ---
    m = jnp.max(logits, axis=-1, keepdims=True)                    # [BT, 1]
    e = jnp.exp(logits - m)
    denom = jnp.sum(e, axis=-1, keepdims=True)                     # [BT, 1]
    scores = e * pl.reciprocal(denom, approx=True)                 # [BT, S]
    scores_ref[...] = scores.astype(scores_ref.dtype)

    # --- context[b,:] = sum_s scores[b,s] * values[b,s,:] -----------------------------
    # values==key reuses the key block already in VMEM (no duplicate HBM stream).
    v_blk = val_ref[...] if val_ref is not None else key_blk
    ctx = jnp.sum(scores[:, :, None] * v_blk.astype(jnp.float32), axis=1)   # [BT, Hv]
    ctx_ref[...] = ctx.astype(ctx_ref.dtype)


def _vmem_capacity_bytes():
    try:
        return int(pltpu.get_tpu_info().vmem_capacity_bytes)
    except Exception:
        return 64 << 20   # conservative (v7x-sized) fallback


def _pick_block_b(B, S, block_bytes, *, vmem_capacity, target_step_bytes=4 << 20):
    """Batch-block size BT.

    Goals:
      * BT divides B and is a multiple of 8 (sublane layout), or BT == B.
      * double-buffered footprint 2*block_bytes(BT) <= min(24 MiB, VMEM/4)
        (v7x-safe; generous on v5e/v6e's 128 MiB VMEM).
      * prefer an even grid of >= 2 steps so ("parallel",) splits across both v7x TCs.
      * per-step HBM bytes >= target_step_bytes to amortize the ~0.35 us per-step cost.
    """
    budget = min(24 << 20, vmem_capacity // 4)
    cands = [bt for bt in range(8, B + 1, 8) if B % bt == 0]
    if B not in cands:
        cands.append(B)
    fits = [bt for bt in cands if 2 * block_bytes(bt) <= budget]
    if not fits:
        fits = [min(cands, key=block_bytes)]
    split = [bt for bt in fits if (B // bt) >= 2 and (B // bt) % 2 == 0]
    pool = split if split else fits
    for bt in sorted(pool):
        if block_bytes(bt) >= target_step_bytes:
            return bt
    return max(pool)


def attention_pooling(key, queries, key_mask, values, w_key, w_queries, w_score,
                      *, gamma=1.0, block_b=None, compute_dtype=jnp.bfloat16):
    """Pallas implementation of AttentionPooling.forward.

    key:       [B, S, Hk]
    queries:   list of arrays [B, 1, Hq_i]
    key_mask:  [B, S] (1 = valid) or None
    values:    [B, S, Hv] or None (defaults to key; then no second HBM stream is sent)
    w_key:     [Hk, A]   (x @ W orientation, i.e. nn.Linear weight transposed)
    w_queries: list of [Hq_i, A]
    w_score:   [A, 1]
    returns:   (scores [B, S, 1], context [B, 1, Hv])
    """
    assert len(queries) == len(w_queries)
    B, S, Hk = key.shape
    has_values = values is not None
    has_mask = key_mask is not None
    Hv = values.shape[-1] if has_values else Hk
    A = w_key.shape[-1]

    # Hoist the M=1 query projections out of the kernel: a tiny [B, A] XLA matmul in f32.
    q_bias = jnp.zeros((B, A), jnp.float32)
    for q, wq in zip(queries, w_queries):
        q_bias = q_bias + jnp.dot(q.reshape(B, -1).astype(jnp.float32),
                                  wq.astype(jnp.float32))

    # bf16 on the HBM side for the big streams; in-kernel accumulation stays f32.
    key_c = key.astype(compute_dtype)
    vals_c = values.astype(compute_dtype) if has_values else None
    wk_c = w_key.astype(compute_dtype)
    ws_row = w_score.reshape(1, A).astype(jnp.float32)
    in_itemsize = jnp.dtype(compute_dtype).itemsize

    def block_bytes(bt):
        b = bt * S * Hk * in_itemsize                       # key
        if has_values:
            b += bt * S * Hv * in_itemsize                  # values
        if has_mask:
            b += bt * S * 4                                 # mask keep (<= f32)
        b += bt * A * 4                                     # query bias
        b += bt * S * 4 + bt * Hv * 4                       # scores + context outputs
        return b

    cap = _vmem_capacity_bytes()
    if (block_b is not None and B % block_b == 0
            and (block_b == B or block_b % 8 == 0)):
        BT = block_b
    else:
        BT = _pick_block_b(B, S, block_bytes, vmem_capacity=cap)
    grid = B // BT

    kernel = functools.partial(_attn_pool_kernel, gamma=float(gamma),
                               has_mask=has_mask, has_values=has_values)

    inputs = [key_c, q_bias]
    in_specs = [pl.BlockSpec((BT, S, Hk), lambda b: (b, 0, 0)),     # key
                pl.BlockSpec((BT, A), lambda b: (b, 0))]            # fused query bias
    if has_mask:
        # Exact `mask != 1` done on the host (matches masked_fill_ semantics for arbitrary
        # masks); kernel gets a compact 0/1 keep stream. bf16 only when the batch block
        # keeps 16-row sublane alignment, else f32.
        m_dtype = jnp.bfloat16 if (BT == B or BT % 16 == 0) else jnp.float32
        mask_keep = (key_mask.reshape(B, S) == 1).astype(m_dtype)
        inputs.append(mask_keep)
        in_specs.append(pl.BlockSpec((BT, S), lambda b: (b, 0)))    # keep-mask (lane-dense)
    if has_values:
        inputs.append(vals_c)
        in_specs.append(pl.BlockSpec((BT, S, Hv), lambda b: (b, 0, 0)))  # values
    inputs += [wk_c, ws_row]
    in_specs += [pl.BlockSpec((Hk, A), lambda b: (0, 0)),           # W_key (resident)
                 pl.BlockSpec((1, A), lambda b: (0, 0))]            # W_score row

    out_specs = [pl.BlockSpec((BT, S), lambda b: (b, 0)),           # scores (lane-dense)
                 pl.BlockSpec((BT, Hv), lambda b: (b, 0))]          # context (lane-dense)
    out_shape = (jax.ShapeDtypeStruct((B, S), jnp.float32),
                 jax.ShapeDtypeStruct((B, Hv), jnp.float32))

    # Double-buffered working set (+ small resident weights) -> scoped-VMEM limit.
    weight_bytes = Hk * A * in_itemsize + A * 4
    footprint = 2 * (block_bytes(BT) + weight_bytes)
    vmem_limit = int(min(cap // 2, max(32 << 20, 2 * footprint)))

    hbm_bytes = sum(int(x.size) * x.dtype.itemsize for x in inputs)
    hbm_bytes += B * S * 4 + B * Hv * 4
    cost = pl.CostEstimate(
        flops=int(2 * B * S * Hk * A + 2 * B * S * A + 2 * B * S * Hv + 4 * B * S),
        transcendentals=int(B * S * A + B * S),
        bytes_accessed=int(hbm_bytes))

    grid_spec = pltpu.PrefetchScalarGridSpec(
        num_scalar_prefetch=0,
        grid=(grid,),
        in_specs=in_specs,
        out_specs=out_specs)

    scores2d, ctx2d = pl.pallas_call(
        kernel,
        grid_spec=grid_spec,
        out_shape=out_shape,
        compiler_params=pltpu.CompilerParams(
            dimension_semantics=("parallel",),   # batch-block axis shards across TCs (v7x)
            vmem_limit_bytes=vmem_limit),
        cost_estimate=cost,
    )(*inputs)

    # Restore the module's output shapes.
    return scores2d.reshape(B, S, 1), ctx2d.reshape(B, 1, Hv)


def _reference(key, queries, key_mask, values, w_key, w_queries, w_score, gamma=1.0):
    if values is None:
        values = key
    sbt = key @ w_key
    for q, wq in zip(queries, w_queries):
        sbt = sbt + q @ wq
    su = jnp.tanh(sbt) @ w_score                      # [B, S, 1]
    if key_mask is not None:
        su = jnp.where(key_mask[:, :, None] != 1.0, -1e12, su)
    scores = jax.nn.softmax(su[..., 0] / gamma, axis=1)[..., None]
    ctx = jnp.einsum("bsi,bsh->bih", scores, values)
    return scores, ctx


if __name__ == "__main__":
    # Small deterministic setup.
    B, S = 16, 128
    key_size = 32
    query_sizes = (32, 24)
    attn_size = 32
    val_size = 64
    gamma = 1.0

    rng = jax.random.PRNGKey(0)
    k1, k2, k3, k4, k5, k6, k7, k8 = jax.random.split(rng, 8)

    key = jax.random.normal(k1, (B, S, key_size), jnp.float32)
    q0 = jax.random.normal(k2, (B, 1, query_sizes[0]), jnp.float32)
    q1 = jax.random.normal(k3, (B, 1, query_sizes[1]), jnp.float32)
    values = jax.random.normal(k8, (B, S, val_size), jnp.float32)

    # key_mask: 1.0 for valid positions, 0.0 for padding (varying lengths).
    lengths = (jnp.arange(B) * 37) % S + 1
    key_mask = (jnp.arange(S)[None, :] < lengths[:, None]).astype(jnp.float32)

    # nn.Linear weights (bias=False), stored in x @ W orientation: [in, out].
    w_key = 0.1 * jax.random.normal(k4, (key_size, attn_size), jnp.float32)
    w_q0 = 0.1 * jax.random.normal(k5, (query_sizes[0], attn_size), jnp.float32)
    w_q1 = 0.1 * jax.random.normal(k6, (query_sizes[1], attn_size), jnp.float32)
    w_score = 0.1 * jax.random.normal(k7, (attn_size, 1), jnp.float32)

    # Path 1: mask given, values=None (dedup path: context reuses the key HBM stream).
    scores, context = attention_pooling(
        key, [q0, q1], key_mask, None, w_key, [w_q0, w_q1], w_score, gamma=gamma)
    # Path 2: no mask, separate values stream.
    scores2, context2 = attention_pooling(
        key, [q0, q1], None, values, w_key, [w_q0, w_q1], w_score, gamma=gamma)
    jax.block_until_ready((scores, context, scores2, context2))

    # Reference uses the same bf16-rounded big operands the kernel streams from HBM, so the
    # check isolates kernel correctness from the intentional bf16 HBM-side quantization.
    key_q = key.astype(jnp.bfloat16).astype(jnp.float32)
    values_q = values.astype(jnp.bfloat16).astype(jnp.float32)
    w_key_q = w_key.astype(jnp.bfloat16).astype(jnp.float32)

    ref_s1, ref_c1 = _reference(key_q, [q0, q1], key_mask, None,
                                w_key_q, [w_q0, w_q1], w_score, gamma)
    ref_s2, ref_c2 = _reference(key_q, [q0, q1], None, values_q,
                                w_key_q, [w_q0, w_q1], w_score, gamma)

    assert scores.shape == (B, S, 1) and context.shape == (B, 1, key_size)
    assert scores2.shape == (B, S, 1) and context2.shape == (B, 1, val_size)
    # Tolerance accounts for the EUP approximate-reciprocal softmax denominator.
    tol = dict(atol=3e-3, rtol=3e-3)
    assert jnp.allclose(scores, ref_s1, **tol)
    assert jnp.allclose(context, ref_c1, **tol)
    assert jnp.allclose(scores2, ref_s2, **tol)
    assert jnp.allclose(context2, ref_c2, **tol)
    print("KERNEL_OK")
</pallas_src>

<mosaic_0001>
module attributes {stable_mosaic.version = 11 : i64} {
  func.func @_attn_pool_kernel(%arg0: i32, %arg1: memref<8x128x32xbf16, #tpu.memory_space<vmem>>, %arg2: memref<8x32xf32, #tpu.memory_space<vmem>>, %arg3: memref<8x128xf32, #tpu.memory_space<vmem>>, %arg4: memref<32x32xbf16, #tpu.memory_space<vmem>>, %arg5: memref<1x32xf32, #tpu.memory_space<vmem>>, %arg6: memref<8x128xf32, #tpu.memory_space<vmem>>, %arg7: memref<8x32xf32, #tpu.memory_space<vmem>>) attributes {dimension_semantics = [#tpu.dimension_semantics<parallel>], iteration_bounds = array<i64: 2>, scalar_prefetch = 0 : i64, scratch_operands = 0 : i64, tpu.core_type = #tpu.core_type<tc>, window_params = [{transform_indices = @transform_0, window_bounds = array<i64: 8, 128, 32>}, {transform_indices = @transform_1, window_bounds = array<i64: 8, 32>}, {transform_indices = @transform_2, window_bounds = array<i64: 8, 128>}, {pipeline_mode = #tpu.pipeline_mode<synchronous>, transform_indices = @transform_3, window_bounds = array<i64: 32, 32>}, {pipeline_mode = #tpu.pipeline_mode<synchronous>, transform_indices = @transform_4, window_bounds = array<i64: 1, 32>}, {transform_indices = @transform_5, window_bounds = array<i64: 8, 128>}, {transform_indices = @transform_6, window_bounds = array<i64: 8, 32>}]} {
    %c0 = arith.constant 0 : index
    %c0_0 = arith.constant 0 : index
    %c0_1 = arith.constant 0 : index
    %0 = vector.load %arg1[%c0, %c0_0, %c0_1] : memref<8x128x32xbf16, #tpu.memory_space<vmem>>, vector<8x128x32xbf16>
    %1 = vector.shape_cast %0 : vector<8x128x32xbf16> to vector<1024x32xbf16>
    %c0_2 = arith.constant 0 : index
    %c0_3 = arith.constant 0 : index
    %2 = vector.load %arg4[%c0_2, %c0_3] : memref<32x32xbf16, #tpu.memory_space<vmem>>, vector<32x32xbf16>
    %cst = arith.constant dense<0.000000e+00> : vector<1024x32xf32>
    %3 = tpu.matmul %1, %2, %cst {dimension_numbers = #tpu.dot_dimension_numbers<[1], [0], [0], [1], [0, 0, 1, 1], [], []>} : vector<1024x32xbf16>, vector<32x32xbf16>, vector<1024x32xf32> -> vector<1024x32xf32>
    %4 = vector.shape_cast %3 : vector<1024x32xf32> to vector<8x128x32xf32>
    %c0_4 = arith.constant 0 : index
    %c0_5 = arith.constant 0 : index
    %5 = vector.load %arg2[%c0_4, %c0_5] : memref<8x32xf32, #tpu.memory_space<vmem>>, vector<8x32xf32>
    %6 = vector.shape_cast %5 : vector<8x32xf32> to vector<8x1x32xf32>
    %7 = vector.broadcast %6 : vector<8x1x32xf32> to vector<8x128x32xf32>
    %8 = arith.addf %4, %7 : vector<8x128x32xf32>
    %c0_6 = arith.constant 0 : index
    %c0_7 = arith.constant 0 : index
    %9 = vector.load %arg5[%c0_6, %c0_7] : memref<1x32xf32, #tpu.memory_space<vmem>>, vector<1x32xf32>
    %10 = math.tanh %8 : vector<8x128x32xf32>
    %11 = vector.shape_cast %9 : vector<1x32xf32> to vector<1x1x32xf32>
    %12 = vector.broadcast %11 : vector<1x1x32xf32> to vector<8x128x32xf32>
    %13 = arith.mulf %10, %12 : vector<8x128x32xf32>
    %cst_8 = arith.constant dense<0.000000e+00> : vector<8x128xf32>
    %14 = vector.multi_reduction <add>, %13, %cst_8 [2] : vector<8x128x32xf32> to vector<8x128xf32>
    %c0_9 = arith.constant 0 : index
    %c0_10 = arith.constant 0 : index
    %15 = vector.load %arg3[%c0_9, %c0_10] : memref<8x128xf32, #tpu.memory_space<vmem>>, vector<8x128xf32>
    %cst_11 = arith.constant 5.000000e-01 : f32
    %16 = vector.broadcast %cst_11 : f32 to vector<8x128xf32>
    %17 = arith.cmpf ogt, %15, %16 : vector<8x128xf32>
    %cst_12 = arith.constant -9.99999995E+11 : f32
    %18 = vector.broadcast %cst_12 : f32 to vector<8x128xf32>
    %19 = arith.select %17, %14, %18 : vector<8x128xi1>, vector<8x128xf32>
    %cst_13 = arith.constant 1.000000e+00 : f32
    %20 = vector.broadcast %cst_13 : f32 to vector<8x128xf32>
    %21 = arith.mulf %19, %20 : vector<8x128xf32>
    %cst_14 = arith.constant dense<0xFF800000> : vector<8xf32>
    %22 = vector.multi_reduction <maximumf>, %21, %cst_14 [1] : vector<8x128xf32> to vector<8xf32>
    %23 = vector.shape_cast %22 : vector<8xf32> to vector<8x1xf32>
    %24 = vector.broadcast %23 : vector<8x1xf32> to vector<8x128xf32>
    %25 = arith.subf %21, %24 : vector<8x128xf32>
    %26 = math.exp %25 : vector<8x128xf32>
    %cst_15 = arith.constant dense<0.000000e+00> : vector<8xf32>
    %27 = vector.multi_reduction <add>, %26, %cst_15 [1] : vector<8x128xf32> to vector<8xf32>
    %28 = vector.shape_cast %27 : vector<8xf32> to vector<8x1xf32>
    %29 = tpu.reciprocal %28 {approx = true} : vector<8x1xf32> -> vector<8x1xf32>
    %30 = vector.broadcast %29 : vector<8x1xf32> to vector<8x128xf32>
    %31 = arith.mulf %26, %30 : vector<8x128xf32>
    %c0_16 = arith.constant 0 : index
    %c0_17 = arith.constant 0 : index
    %32 = vector.load %arg6[%c0_16, %c0_17] : memref<8x128xf32, #tpu.memory_space<vmem>>, vector<8x128xf32>
    tpu.vector_store %arg6[%c0_16, %c0_17], %31 {strides = array<i32>} : memref<8x128xf32, #tpu.memory_space<vmem>>, vector<8x128xf32>,
    %33 = vector.shape_cast %31 : vector<8x128xf32> to vector<8x128x1xf32>
    %34 = arith.extf %0 : vector<8x128x32xbf16> to vector<8x128x32xf32>
    %35 = vector.broadcast %33 : vector<8x128x1xf32> to vector<8x128x32xf32>
    %36 = arith.mulf %35, %34 : vector<8x128x32xf32>
    %cst_18 = arith.constant dense<0.000000e+00> : vector<8x32xf32>
    %37 = vector.multi_reduction <add>, %36, %cst_18 [1] : vector<8x128x32xf32> to vector<8x32xf32>
    %c0_19 = arith.constant 0 : index
    %c0_20 = arith.constant 0 : index
    %38 = vector.load %arg7[%c0_19, %c0_20] : memref<8x32xf32, #tpu.memory_space<vmem>>, vector<8x32xf32>
    tpu.vector_store %arg7[%c0_19, %c0_20], %37 {strides = array<i32>} : memref<8x32xf32, #tpu.memory_space<vmem>>, vector<8x32xf32>,
    return
  }
  func.func @transform_0(%arg0: i32) -> (i32, i32, i32) {
    %c0_i32 = arith.constant 0 : i32
    %c0_i32_0 = arith.constant 0 : i32
    %c0_i32_1 = arith.constant 0 : i32
    return %arg0, %c0_i32, %c0_i32_0 : i32, i32, i32
  }
  func.func @transform_1(%arg0: i32) -> (i32, i32) {
    %c0_i32 = arith.constant 0 : i32
    %c0_i32_0 = arith.constant 0 : i32
    return %arg0, %c0_i32 : i32, i32
  }
  func.func @transform_2(%arg0: i32) -> (i32, i32) {
    %c0_i32 = arith.constant 0 : i32
    %c0_i32_0 = arith.constant 0 : i32
    return %arg0, %c0_i32 : i32, i32
  }
  func.func @transform_3(%arg0: i32) -> (i32, i32) {
    %c0_i32 = arith.constant 0 : i32
    %c0_i32_0 = arith.constant 0 : i32
    %c0_i32_1 = arith.constant 0 : i32
    return %c0_i32, %c0_i32_0 : i32, i32
  }
  func.func @transform_4(%arg0: i32) -> (i32, i32) {
    %c0_i32 = arith.constant 0 : i32
    %c0_i32_0 = arith.constant 0 : i32
    %c0_i32_1 = arith.constant 0 : i32
    return %c0_i32, %c0_i32_0 : i32, i32
  }
  func.func @transform_5(%arg0: i32) -> (i32, i32) {
    %c0_i32 = arith.constant 0 : i32
    %c0_i32_0 = arith.constant 0 : i32
    return %arg0, %c0_i32 : i32, i32
  }
  func.func @transform_6(%arg0: i32) -> (i32, i32) {
    %c0_i32 = arith.constant 0 : i32
    %c0_i32_0 = arith.constant 0 : i32
    return %arg0, %c0_i32 : i32, i32
  }
}

</mosaic_0001>

<bundles_post_ra>
// kernel: tpu_custom_call.1
= control target key start
LH: loop header
LB: loop body
LE: loop exit
PB: predicated region body
PF: predicated region fallthrough
CT: control target
= control target key end

     0   :  { %12 = vsyncpa [#allocation3], 0  ;;  %s7650_s0 = inlined_call_operand.vmem [shape: bf16[16,128,32], index: 0, kind: input, shape index: {}]   ;;  %s7651_s1 = inlined_call_operand.vmem [shape: f32[16,32], index: 1, kind: input, shape index: {}]   ;;  %s7652_s2 = inlined_call_operand.vmem [shape: f32[16,128], index: 2, kind: input, shape index: {}]   ;;  %s7653_s3 = inlined_call_operand.vmem [shape: bf16[32,32], index: 3, kind: input, shape index: {}]   ;;  %s7654_s4 = inlined_call_operand.vmem [shape: f32[1,32], index: 4, kind: input, shape index: {}]   ;;  %s7655_s5 = inlined_call_operand.hbm [shape: f32[16,128], index: 5, kind: output, shape index: {0}]   ;;  %s7656_s6 = inlined_call_operand.hbm [shape: f32[16,32], index: 6, kind: output, shape index: {1}]  }
   0x1   :  { %14 = vsyncpa [#allocation3 + $0x1], 0 }
   0x2   :  { %15 = vsyncpa [#allocation5], 0 }
   0x3   :  { %17 = vsyncpa [#allocation5 + $0x1], 0  ;;  %s5428_s21 = smov 0   ;;  %s5430_s22 = smov 0  }
   0x4   :  { %s5432_s23 = smov 0   ;;  %s5434_s24 = smov 0  }
   0x5 LB: > { %s5449_s25 = sadd.s32 4294967295, %s5388_s24   ;;  %s4441_s26 = sadd.s32 4294967294, %s5388_s24   ;;  %s5388_s24 = sphi %s5434_s24, %s7897_s24   ;;  %s5384_s23 = sphi %s5432_s23, %s7896_s23   ;;  %s5380_s22 = sphi %s5430_s22, %s7895_s22   ;;  %s5376_s21 = sphi %s5428_s21, %s7894_s21  }
   0x6   : > { %s5453_s27 = sadd.s32 1, %s5388_s24   ;;  %s150_s28 = sadd.s32 1, %s5384_s23 }
   0x7   : > { %s147_s29 = ssub.s32 %s5388_s24, %s5453_s27  ;;  %p160_p0 = scmp.ne.s32.totalorder %s5384_s23, %s5380_s22 }
   0x8   : > { %p148_p1 = scmp.eq.s32.totalorder %s147_s29, 0  ;;  %p161_p2 = scmp.eq.s32.totalorder %s5449_s25, 1 }
   0x9   : > { %p166_p3 = scmp.ne.s32.totalorder %s5380_s22, %s5376_s21  ;;  %p167_p4 = scmp.eq.s32.totalorder %s4441_s26, 1 }
   0xa   : > { %s5464_s30 = scalar_select %p148_p1, %s5384_s23, %s150_s28  }
   0xb   : > { %p5466_p5 = por %p161_p2, %p160_p0  ;;  %p5470_p6 = por %p167_p4, %p166_p3 }
   0xc   : > { %p4444_p7 = scmp.ge.s32.totalorder %s5388_s24, 1  ;;  %p241_p8 = scmp.lt.s32.totalorder %s5388_s24, 3 }
   0xe   : > { %p242_p9 = pnand %p4444_p7, %p241_p8 }
  0x10   : > { %245 = sbr.rel (%p242_p9) target bundleno = 1390 (0x56e), region = 40 }
  0x17   : > { %v4837_v0 = vld [vmem:[%s7653_s3] sm:$0xff]   ;;  %s4447_s11 = sshll.u32 %s5449_s25, 3  ;;  %v4838_v1 = vld [vmem:[%s7653_s3 + $0x8] sm:$0xff]   ;;  %vm7661_vm0 = vcmask 261120   ;;  %p292_p11 = scmp.lt.s32.totalorder %s5449_s25, 1  ;;  %vm2510_vm1 = vcmask 130112  }
  0x18   : > { %p286_p10 = scmp.lt.s32.totalorder %s4447_s11, 15  ;;  %4656 = vmatprep.subr.bf16.mxu0 %v4837_v0  ;;  %4788 = vmatprep.subr.bf16.mxu1 %v4837_v0  ;;  %vm2517_vm2 = vcmask 195712   ;;  %vm2524_vm3 = vcmask 261312   ;;  %vm2531_vm4 = vcmask 326912   ;;  %vm2538_vm5 = vcmask 392512   ;;  %s4585_s26 = sshll.u32 %s5449_s25, 7 }
  0x19   : > { %4657 = vmatpush3.bf16.msra.mxu0 %v4837_v0  ;;  %4790 = vmatpush3.bf16.msra.mxu1 %v4837_v0  ;;  %s5618_s18 = scalar_select %p292_p11, %s5449_s25, 1  ;;  %vm2545_vm6 = vcmask 458112   ;;  %vm2552_vm7 = vcmask 523712   ;;  %vm2559_vm8 = vcmask 589312   ;;  %vm2566_vm9 = vcmask 654912  }
  0x1a   : > { %s7899_s11 = smov (!%p286_p10, %s4447_s11), 15  ;;  %4658 = vmatprep.subr.bf16.mxu0 %v4838_v1  ;;  %4789 = vmatprep.subr.bf16.mxu1 %v4838_v1  ;;  %vm2573_vm10 = vcmask 720512   ;;  %vm2580_vm11 = vcmask 786112   ;;  %vm2587_vm12 = vcmask 851712   ;;  %vm2594_vm13 = vcmask 917312   ;;  %s7235_s9 = scalar_lea.hbm %s7655_s5, %s4585_s26 }
  0x1b   : > { %s4589_s14 = sshll.u32 %s7899_s11, 6  ;;  %s4450_s19 = sshll.u32 %s5618_s18, 3  ;;  %vm2601_vm14 = vcmask 982912   ;;  %vm2608_vm15 = vcmask 1048512  }
  0x1c   : > { %s5486_s17 = scalar_lea.vmem %s7650_s0, %s4589_s14  ;;  %s295_s28 = scalar_lea.vmem %s7651_s1, %s4450_s19 }
  0x1d   : > { %4659 = vmatpush3.bf16.msra.mxu0 %v4838_v1  ;;  %4791 = vmatpush3.bf16.msra.mxu1 %v4838_v1  ;;  %v301_v2 = vld [vmem:[%s5486_s17] sm:$0xff]   ;;  %v303_v4 = vld [vmem:[%s5486_s17 + $0x8] sm:$0xff]   ;;  %v305_v6 = vld [vmem:[%s5486_s17 + $0x10] sm:$0xff]   ;;  %s299_s16 = scalar_lea.vmem %s7652_s2, %s4450_s19  ;;  %s7001_s18 = sand.u32 1, %s5380_s22  }
  0x1e   : > { %v365_v3 = vld [vmem:[%s5486_s17 + $0x100] sm:$0xff]   ;;  %v367_v5 = vld [vmem:[%s5486_s17 + $0x108] sm:$0xff]   ;;  %v369_v7 = vld [vmem:[%s5486_s17 + $0x110] sm:$0xff]   ;;  %4660 = vmatprep.mubr.msk.bf16.mxu0 %vm7661_vm0, %v301_v2  ;;  %v5390_v2 = vmov 1966171168   ;;  %s4445_s19 = sshll.u32 %s7001_s18, 3 }
  0x1f   : > { %4724 = vmatprep.mubr.msk.bf16.mxu1 %vm7661_vm0, %v365_v3  ;;  %v307_v8 = vld [vmem:[%s5486_s17 + $0x18] sm:$0xff]   ;;  %v309_v10 = vld [vmem:[%s5486_s17 + $0x20] sm:$0xff]   ;;  %v311_v12 = vld [vmem:[%s5486_s17 + $0x28] sm:$0xff]   ;;  %v1507_v3 = vunpack.c.l.s4 %v5390_v2  ;;  %s7010_s20 = scalar_lea.vmem [#allocation2], %s4445_s19  ;;  %s4295_s11 = scalar_lea.sflag [#allocation3], %s7001_s18 }
  0x20   : > { %4661 = vmatmul.mubr.msk.bf16.vlgmr.msra.gmra.mrb[0].mxu0 %vm7661_vm0, %v303_v4  ;;  %4725 = vmatmul.mubr.msk.bf16.vlgmr.msra.gmra.mrb[0].mxu1 %vm7661_vm0, %v367_v5  ;;  %v371_v9 = vld [vmem:[%s5486_s17 + $0x118] sm:$0xff]   ;;  %v373_v11 = vld [vmem:[%s5486_s17 + $0x120] sm:$0xff]   ;;  %v375_v13 = vld [vmem:[%s5486_s17 + $0x128] sm:$0xff]   ;;  %v7657_v4 = vlaneseq  ;;  %s4313_s10 = sshll.u32 %s7010_s20, 4  ;;  %s5391_s13 = smov [#allocation2]   ;;  %s7242_s10 = int_to_ptr.vmem [resolvable:$true] %s4313_s10 }
  0x21   : > { %4664 = vmatprep.mubr.msk.bf16.mxu0 %vm7661_vm0, %v305_v6  ;;  %4728 = vmatprep.mubr.msk.bf16.mxu1 %vm7661_vm0, %v369_v7  ;;  %v313_v14 = vld [vmem:[%s5486_s17 + $0x30] sm:$0xff]   ;;  %v315_v16 = vld [vmem:[%s5486_s17 + $0x38] sm:$0xff]   ;;  %v317_v18 = vld [vmem:[%s5486_s17 + $0x40] sm:$0xff]   ;;  %v1508_v5 = vunpack.c.0.s8 %v1507_v3  ;;  %s5294_s12 = scalar_lea.vmem %s7242_s10, 128  ;;  %s5298_s14 = sshll.u32 %s5391_s13, 4  ;;  %s5299_s14 = int_to_ptr.vmem [resolvable:$false] %s5298_s14 }
  0x22   : > { %v377_v15 = vld [vmem:[%s5486_s17 + $0x130] sm:$0xff]   ;;  %v379_v17 = vld [vmem:[%s5486_s17 + $0x138] sm:$0xff]   ;;  %v381_v19 = vld [vmem:[%s5486_s17 + $0x140] sm:$0xff]   ;;  %v5627_v6 = vshrl.u32 %v7657_v4, 7  ;;  %p5295_p12 = scmp.ne.s32.totalorder %s7242_s10, %s5294_s12  ;;  %s5300_s15 = scalar_lea.vmem %s5299_s14, 256 }
  0x23   : > { %v319_v20 = vld [vmem:[%s5486_s17 + $0x48] sm:$0xff]   ;;  %v385_v22 = vld [vmem:[%s5486_s17 + $0x150] sm:$0xff]   ;;  %v387_v24 = vld [vmem:[%s5486_s17 + $0x158] sm:$0xff]   ;;  %p5301_p1 = scmp.lt.s32.totalorder %s7242_s10, %s5299_s14  ;;  %p5302_p2 = scmp.lt.s32.totalorder %s5300_s15, %s5294_s12 }
  0x24   : > { %v383_v21 = vld [vmem:[%s5486_s17 + $0x148] sm:$0xff]   ;;  %v321_v23 = vld [vmem:[%s5486_s17 + $0x50] sm:$0xff]   ;;  %v323_v25 = vld [vmem:[%s5486_s17 + $0x58] sm:$0xff]   ;;  %7670 = vst [vmem:[#allocation8_spill] sm:$0xff] %v5627_v6  ;;  %p5296_p13 = pnand %p5295_p12, %p5466_p5 }
  0x25   : > { %v389_v26 = vld [vmem:[%s5486_s17 + $0x160] sm:$0xff]   ;;  %v391_v28 = vld [vmem:[%s5486_s17 + $0x168] sm:$0xff]   ;;  %v393_v30 = vld [vmem:[%s5486_s17 + $0x170] sm:$0xff]   ;;  %p5303_p3 = por %p5302_p2, %p5301_p1 }
  0x26   : > { %v325_v27 = vld [vmem:[%s5486_s17 + $0x60] sm:$0xff]   ;;  %v327_v29 = vld [vmem:[%s5486_s17 + $0x68] sm:$0xff]   ;;  %v329_v31 = vld [vmem:[%s5486_s17 + $0x70] sm:$0xff]   ;;  %p5297_p0 = pneg %p5296_p13 }
  0x27   : > { %v395_v32 = vld [vmem:[%s5486_s17 + $0x178] sm:$0xff]   ;;  %v397_v34 = vld [vmem:[%s5486_s17 + $0x180] sm:$0xff]   ;;  %v399_v36 = vld [vmem:[%s5486_s17 + $0x188] sm:$0xff]  }
  0x28   : > { %4665 = vmatmul.mubr.msk.bf16.gmra.mrb[4].mxu0 %vm7661_vm0, %v307_v8  ;;  %4729 = vmatmul.mubr.msk.bf16.gmra.mrb[4].mxu1 %vm7661_vm0, %v371_v9  ;;  %v331_v33 = vld [vmem:[%s5486_s17 + $0x78] sm:$0xff]   ;;  %v333_v35 = vld [vmem:[%s5486_s17 + $0x80] sm:$0xff]   ;;  %v335_v37 = vld [vmem:[%s5486_s17 + $0x88] sm:$0xff]   ;;  %v5630_v8 = vsub.s32 %v1508_v5, %v5627_v6  ;;  %p5304_p4 = pnand %p5303_p3, %p5297_p0 }
  0x29   : > { %4668 = vmatprep.mubr.msk.bf16.mxu0 %vm7661_vm0, %v309_v10  ;;  %4732 = vmatprep.mubr.msk.bf16.mxu1 %vm7661_vm0, %v373_v11  ;;  %v401_v38 = vld [vmem:[%s5486_s17 + $0x190] sm:$0xff]   ;;  %v403_v40 = vld [vmem:[%s5486_s17 + $0x198] sm:$0xff]   ;;  %v341_v42 = vld [vmem:[%s5486_s17 + $0xa0] sm:$0xff]  }
  0x2a   : > { %v337_v39 = vld [vmem:[%s5486_s17 + $0x90] sm:$0xff]   ;;  %v339_v41 = vld [vmem:[%s5486_s17 + $0x98] sm:$0xff]   ;;  %v405_v43 = vld [vmem:[%s5486_s17 + $0x1a0] sm:$0xff]  }
  0x2b   : > { %v343_v44 = vld [vmem:[%s5486_s17 + $0xa8] sm:$0xff]   ;;  %v409_v46 = vld [vmem:[%s5486_s17 + $0x1b0] sm:$0xff]   ;;  %v411_v48 = vld [vmem:[%s5486_s17 + $0x1b8] sm:$0xff]  }
  0x2c   : > { %v407_v45 = vld [vmem:[%s5486_s17 + $0x1a8] sm:$0xff]   ;;  %v345_v47 = vld [vmem:[%s5486_s17 + $0xb0] sm:$0xff]   ;;  %v347_v49 = vld [vmem:[%s5486_s17 + $0xb8] sm:$0xff]  }
  0x2d   : > { %v413_v50 = vld [vmem:[%s5486_s17 + $0x1c0] sm:$0xff]   ;;  %v415_v52 = vld [vmem:[%s5486_s17 + $0x1c8] sm:$0xff]   ;;  %v417_v54 = vld [vmem:[%s5486_s17 + $0x1d0] sm:$0xff]  }
  0x2e   : > { %v349_v51 = vld [vmem:[%s5486_s17 + $0xc0] sm:$0xff]   ;;  %v351_v53 = vld [vmem:[%s5486_s17 + $0xc8] sm:$0xff]   ;;  %v353_v55 = vld [vmem:[%s5486_s17 + $0xd0] sm:$0xff]  }
  0x2f   : > { %v419_v56 = vld [vmem:[%s5486_s17 + $0x1d8] sm:$0xff]   ;;  %v421_v58 = vld [vmem:[%s5486_s17 + $0x1e0] sm:$0xff]   ;;  %v423_v60 = vld [vmem:[%s5486_s17 + $0x1e8] sm:$0xff]  }
  0x30   : > { %4669 = vmatmul.mubr.msk.bf16.gmra.mrb[8].mxu0 %vm7661_vm0, %v311_v12  ;;  %4733 = vmatmul.mubr.msk.bf16.gmra.mrb[8].mxu1 %vm7661_vm0, %v375_v13  ;;  %v355_v57 = vld [vmem:[%s5486_s17 + $0xd8] sm:$0xff]   ;;  %v357_v59 = vld [vmem:[%s5486_s17 + $0xe0] sm:$0xff]   ;;  %v359_v61 = vld [vmem:[%s5486_s17 + $0xe8] sm:$0xff]   ;;  %v5643_v13 = vsub.s32 0, %v5627_v6 }
  0x31   : > { %4672 = vmatprep.mubr.msk.bf16.mxu0 %vm7661_vm0, %v313_v14  ;;  %4736 = vmatprep.mubr.msk.bf16.mxu1 %vm7661_vm0, %v377_v15  ;;  %v425_v62 = vld [vmem:[%s5486_s17 + $0x1f0] sm:$0xff]   ;;  %v427_v0 = vld [vmem:[%s5486_s17 + $0x1f8] sm:$0xff]   ;;  %v1503_v7 = vld [vmem:[%s295_s28] sm:$0xff] }
  0x32   : > { %v361_v63 = vld [vmem:[%s5486_s17 + $0xf0] sm:$0xff]   ;;  %v363_v1 = vld [vmem:[%s5486_s17 + $0xf8] sm:$0xff]   ;;  %v1505_v9 = vcombine.high %v1503_v7, %v1503_v7  ;;  %v5633_v10 = vrot.slane %v1503_v7, %v5630_v8  ;;  %7671 = vst [vmem:[#allocation9_spill] sm:$0xff] %v5643_v13 }
  0x34   : > { %v5636_v11 = vrot.slane %v1505_v9, %v5630_v8  ;;  %v5640_v12 = vrot.slane %v5633_v10, %v5630_v8 }
  0x36   : > { %v5647_v14 = vrot.slane %v5636_v11, %v5630_v8  ;;  %v5651_v15 = vrot.slane %v5640_v12, %v5643_v13 }
  0x38   : > { %4673 = vmatmul.mubr.msk.bf16.gmra.mrb[12].mxu0 %vm7661_vm0, %v315_v16  ;;  %4737 = vmatmul.mubr.msk.bf16.gmra.mrb[12].mxu1 %vm7661_vm0, %v379_v17  ;;  %v5655_v16 = vrot.slane %v5647_v14, %v5643_v13 }
  0x39   : > { %4676 = vmatprep.mubr.msk.bf16.mxu0 %vm7661_vm0, %v317_v18  ;;  %4740 = vmatprep.mubr.msk.bf16.mxu1 %vm7661_vm0, %v381_v19 }
  0x40   : > { %4677 = vmatmul.mubr.msk.bf16.gmra.mrb[16].mxu0 %vm7661_vm0, %v319_v20  ;;  %4741 = vmatmul.mubr.msk.bf16.gmra.mrb[16].mxu1 %vm7661_vm0, %v383_v21 }
  0x41   : > { %4744 = vmatprep.mubr.msk.bf16.mxu1 %vm7661_vm0, %v385_v22  ;;  %4680 = vmatprep.mubr.msk.bf16.mxu0 %vm7661_vm0, %v321_v23 }
  0x48   : > { %4745 = vmatmul.mubr.msk.bf16.gmra.mrb[20].mxu1 %vm7661_vm0, %v387_v24  ;;  %4681 = vmatmul.mubr.msk.bf16.gmra.mrb[20].mxu0 %vm7661_vm0, %v323_v25 }
  0x49   : > { %4748 = vmatprep.mubr.msk.bf16.mxu1 %vm7661_vm0, %v389_v26  ;;  %4684 = vmatprep.mubr.msk.bf16.mxu0 %vm7661_vm0, %v325_v27 }
  0x50   : > { %4749 = vmatmul.mubr.msk.bf16.gmra.mrb[24].mxu1 %vm7661_vm0, %v391_v28  ;;  %4685 = vmatmul.mubr.msk.bf16.gmra.mrb[24].mxu0 %vm7661_vm0, %v327_v29 }
  0x51   : > { %4752 = vmatprep.mubr.msk.bf16.mxu1 %vm7661_vm0, %v393_v30  ;;  %4688 = vmatprep.mubr.msk.bf16.mxu0 %vm7661_vm0, %v329_v31 }
  0x58   : > { %4753 = vmatmul.mubr.msk.bf16.gmra.mrb[28].mxu1 %vm7661_vm0, %v395_v32  ;;  %4689 = vmatmul.mubr.msk.bf16.gmra.mrb[28].mxu0 %vm7661_vm0, %v331_v33 }
  0x59   : > { %4756 = vmatprep.mubr.msk.bf16.mxu1 %vm7661_vm0, %v397_v34  ;;  %4692 = vmatprep.mubr.msk.bf16.mxu0 %vm7661_vm0, %v333_v35 }
  0x60   : > { %4757 = vmatmul.mubr.msk.bf16.gmra.mrb[32].mxu1 %vm7661_vm0, %v399_v36  ;;  %4693 = vmatmul.mubr.msk.bf16.gmra.mrb[32].mxu0 %vm7661_vm0, %v335_v37 }
  0x61   : > { %4760 = vmatprep.mubr.msk.bf16.mxu1 %vm7661_vm0, %v401_v38  ;;  %4696 = vmatprep.mubr.msk.bf16.mxu0 %vm7661_vm0, %v337_v39 }
  0x68   : > { %4761 = vmatmul.mubr.msk.bf16.gmra.mrb[36].mxu1 %vm7661_vm0, %v403_v40  ;;  %4697 = vmatmul.mubr.msk.bf16.gmra.mrb[36].mxu0 %vm7661_vm0, %v339_v41  ;;  %v5669_v41 = vld [vmem:[%s7654_s4] ss:$0 sm:$0xff] }
  0x69   : > { %4700 = vmatprep.mubr.msk.bf16.mxu0 %vm7661_vm0, %v341_v42  ;;  %4764 = vmatprep.mubr.msk.bf16.mxu1 %vm7661_vm0, %v405_v43 }
  0x70   : > { %4701 = vmatmul.mubr.msk.bf16.gmra.mrb[40].mxu0 %vm7661_vm0, %v343_v44  ;;  %4765 = vmatmul.mubr.msk.bf16.gmra.mrb[40].mxu1 %vm7661_vm0, %v407_v45 }
  0x71   : > { %4768 = vmatprep.mubr.msk.bf16.mxu1 %vm7661_vm0, %v409_v46  ;;  %4704 = vmatprep.mubr.msk.bf16.mxu0 %vm7661_vm0, %v345_v47 }
  0x78   : > { %4769 = vmatmul.mubr.msk.bf16.gmra.mrb[44].mxu1 %vm7661_vm0, %v411_v48  ;;  %4705 = vmatmul.mubr.msk.bf16.gmra.mrb[44].mxu0 %vm7661_vm0, %v347_v49 }
  0x79   : > { %4772 = vmatprep.mubr.msk.bf16.mxu1 %vm7661_vm0, %v413_v50  ;;  %4708 = vmatprep.mubr.msk.bf16.mxu0 %vm7661_vm0, %v349_v51 }
  0x80   : > { %4773 = vmatmul.mubr.msk.bf16.gmra.mrb[48].mxu1 %vm7661_vm0, %v415_v52  ;;  %4709 = vmatmul.mubr.msk.bf16.gmra.mrb[48].mxu0 %vm7661_vm0, %v351_v53 }
  0x81   : > { %4776 = vmatprep.mubr.msk.bf16.mxu1 %vm7661_vm0, %v417_v54  ;;  %4712 = vmatprep.mubr.msk.bf16.mxu0 %vm7661_vm0, %v353_v55 }
  0x88   : > { %4777 = vmatmul.mubr.msk.bf16.gmra.mrb[52].mxu1 %vm7661_vm0, %v419_v56  ;;  %4713 = vmatmul.mubr.msk.bf16.gmra.mrb[52].mxu0 %vm7661_vm0, %v355_v57 }
  0x89   : > { %4780 = vmatprep.mubr.msk.bf16.mxu1 %vm7661_vm0, %v421_v58  ;;  %4716 = vmatprep.mubr.msk.bf16.mxu0 %vm7661_vm0, %v357_v59 }
  0x90   : > { %4781 = vmatmul.mubr.msk.bf16.gmra.mrb[56].mxu1 %vm7661_vm0, %v423_v60  ;;  %4717 = vmatmul.mubr.msk.bf16.gmra.mrb[56].mxu0 %vm7661_vm0, %v359_v61 }
  0x91   : > { %4784 = vmatprep.mubr.msk.bf16.mxu1 %vm7661_vm0, %v425_v62  ;;  %4720 = vmatprep.mubr.msk.bf16.mxu0 %vm7661_vm0, %v361_v63 }
  0x98   : > { %4785 = vmatmul.mubr.msk.bf16.gmra.mrb[60].mxu1 %vm7661_vm0, %v427_v0  ;;  %4721 = vmatmul.mubr.msk.bf16.gmra.mrb[60].mxu0 %vm7661_vm0, %v363_v1 }
  0xf3   : > { %v4662_v17 = vpop.f32.mrb[0].mxu0  ;;  %v4726_v18 = vpop.f32.mrb[0].mxu1 }
  0xf4   : > { %v1596_v19 = vadd.f32 %v4662_v17, %v5651_v15  ;;  %v1660_v20 = vadd.f32 %v4726_v18, %v5655_v16  ;;  %v992_v21 = vpop.f32.mrb[1].mxu0  ;;  %v1248_v22 = vpop.f32.mrb[1].mxu1 }
  0xf5   : > { %v1594_v23 = vadd.f32 %v5651_v15, %v992_v21  ;;  %v1658_v24 = vadd.f32 %v5655_v16, %v1248_v22  ;;  %v4663_v25 = vpop.f32.mrb[2].mxu0  ;;  %v4727_v26 = vpop.f32.mrb[2].mxu1 }
  0xf6   : > { %4968 = vtanh.f32 %v1596_v19  ;;  %v1597_v27 = vadd.f32 %v4663_v25, %v5651_v15  ;;  %v995_v28 = vpop.f32.mrb[3].mxu0  ;;  %v1251_v29 = vpop.f32.mrb[3].mxu1  ;;  %v1661_v30 = vadd.f32 %v4727_v26, %v5655_v16 }
  0xf7   : > { %4970 = vtanh.f32 %v1660_v20  ;;  %v1659_v31 = vadd.f32 %v5655_v16, %v1251_v29  ;;  %v1595_v32 = vadd.f32 %v5651_v15, %v995_v28 }
  0xf8   : > { %4972 = vtanh.f32 %v1594_v23 }
  0xf9   : > { %4974 = vtanh.f32 %v1658_v24 }
  0xfa   : > { %4976 = vtanh.f32 %v1597_v27 }
  0xfb   : > { %4978 = vtanh.f32 %v1661_v30  ;;  %v4666_v33 = vpop.f32.mrb[4].mxu0  ;;  %v4730_v34 = vpop.f32.mrb[4].mxu1 }
  0xfc   : > { %v1008_v35 = vpop.f32.mrb[5].mxu0  ;;  %v1264_v36 = vpop.f32.mrb[5].mxu1  ;;  %4980 = vtanh.f32 %v1659_v31  ;;  %v1600_v43 = vadd.f32 %v4666_v33, %v5651_v15  ;;  %v1664_v51 = vadd.f32 %v4730_v34, %v5655_v16 }
  0xfd   : > { %v4667_v37 = vpop.f32.mrb[6].mxu0  ;;  %v4731_v38 = vpop.f32.mrb[6].mxu1  ;;  %4982 = vtanh.f32 %v1595_v32  ;;  %v1598_v3 = vadd.f32 %v5651_v15, %v1008_v35  ;;  %v1662_v21 = vadd.f32 %v5655_v16, %v1264_v36 }
  0xfe   : > { %v1601_v39 = vadd.f32 %v4667_v37, %v5651_v15  ;;  %v1011_v40 = vpop.f32.mrb[7].mxu0  ;;  %v1267_v42 = vpop.f32.mrb[7].mxu1  ;;  %v1665_v49 = vadd.f32 %v4731_v38, %v5655_v16 }
  0xff   : > { %v1599_v0 = vadd.f32 %v5651_v15, %v1011_v40  ;;  %v1663_v20 = vadd.f32 %v5655_v16, %v1267_v42 }
 0x100   : > { %v4969_v44 = vpop.eup %4968  ;;  %4984 = vtanh.f32 %v1601_v39 }
 0x101   : > { %v4971_v45 = vpop.eup %4970  ;;  %v1859_v46 = vmul.f32 %v4969_v44, %v5669_v41  ;;  %4986 = vtanh.f32 %v1600_v43 }
 0x102   : > { %v4973_v47 = vpop.eup %4972  ;;  %v1923_v48 = vmul.f32 %v4971_v45, %v5669_v41  ;;  %4988 = vtanh.f32 %v1665_v49 }
 0x103   : > { %v4975_v50 = vpop.eup %4974  ;;  %v1991_v52 = vsel %vm7661_vm0, %v1859_v46, 0.0  ;;  %v4670_v53 = vpop.f32.mrb[8].mxu0  ;;  %v1857_v57 = vmul.f32 %v4973_v47, %v5669_v41  ;;  %4990 = vtanh.f32 %v1664_v51 }
 0x104   : > { %v4734_v54 = vpop.f32.mrb[8].mxu1  ;;  %v4977_v55 = vpop.eup %4976  ;;  %v2183_v56 = vsel %vm7661_vm0, %v1923_v48, 0.0  ;;  %1992 = vadd.xlane.f32.xlu1 %v1991_v52  ;;  %v1921_v18 = vmul.f32 %v4975_v50, %v5669_v41  ;;  %4992 = vtanh.f32 %v1599_v0  ;;  %v1604_v37 = vadd.f32 %v4670_v53, %v5651_v15 }
 0x105   : > { %v5679_v58 = vpop.f32.mrb[9].mxu0  ;;  %v5681_v59 = vpop.f32.mrb[9].mxu1  ;;  %2184 = vadd.xlane.f32.xlu0 %v2183_v56  ;;  %v1860_v61 = vmul.f32 %v4977_v55, %v5669_v41  ;;  %v1985_v17 = vsel %vm7661_vm0, %v1857_v57, 0.0  ;;  %4994 = vtanh.f32 %v1598_v3  ;;  %v1668_v47 = vadd.f32 %v4734_v54, %v5655_v16 }
 0x106   : > { %v4979_v60 = vpop.eup %4978  ;;  %v4671_v62 = vpop.f32.mrb[10].mxu0  ;;  %v2177_v27 = vsel %vm7661_vm0, %v1921_v18, 0.0  ;;  %4996 = vtanh.f32 %v1663_v20  ;;  %v1520_v3 = vcombine.high %v5633_v10, %v5633_v10 }
 0x107   : > { %v5684_v63 = vpop.f32.mrb[10].mxu1  ;;  %v1027_v1 = vpop.f32.mrb[11].mxu0  ;;  %v1994_v5 = vsel %vm7661_vm0, %v1860_v61, 0.0  ;;  %v1924_v7 = vmul.f32 %v4979_v60, %v5669_v41  ;;  %v1605_v34 = vadd.f32 %v4671_v62, %v5651_v15  ;;  %4998 = vtanh.f32 %v1662_v21 }
 0x108   : > { %v5687_v2 = vpop.f32.mrb[11].mxu1  ;;  %v4981_v9 = vpop.eup %4980  ;;  %1995 = vadd.xlane.f32.xlu1 %v1994_v5  ;;  %v1603_v49 = vadd.f32 %v5651_v15, %v1027_v1 }
 0x109   : > { %v4983_v19 = vpop.eup %4982  ;;  %1986 = vadd.xlane.f32.xlu0 %v1985_v17  ;;  %v2186_v22 = vsel %vm7661_vm0, %v1924_v7, 0.0  ;;  %v1922_v23 = vmul.f32 %v4981_v9, %v5669_v41  ;;  %5000 = vtanh.f32 %v1605_v34  ;;  %v1667_v1 = vadd.f32 %v5655_v16, %v5687_v2 }
 0x10a   : > { %v4985_v26 = vpop.eup %4984  ;;  %v1858_v28 = vmul.f32 %v4983_v19, %v5669_v41  ;;  %5002 = vtanh.f32 %v1604_v37  ;;  %v1602_v9 = vadd.f32 %v5651_v15, %v5679_v58  ;;  %v1521_v58 = vcombine.high %v5636_v11, %v5636_v11 }
 0x10b   : > { %v5698_v24 = vpop.f32.mrb[12].mxu0  ;;  %v5700_v25 = vpop.f32.mrb[12].mxu1  ;;  %v2180_v38 = vsel %vm7661_vm0, %v1922_v23, 0.0  ;;  %v1864_v39 = vmul.f32 %v4985_v26, %v5669_v41  ;;  %5004 = vtanh.f32 %v1668_v47  ;;  %v1666_v23 = vadd.f32 %v5655_v16, %v5681_v59 }
 0x10c   : > { %2187 = vadd.xlane.f32.xlu1 %v2186_v22  ;;  %v5704_v29 = vpop.f32.mrb[13].mxu0  ;;  %v1296_v30 = vpop.f32.mrb[13].mxu1  ;;  %v1988_v42 = vsel %vm7661_vm0, %v1858_v28, 0.0  ;;  %5006 = vtanh.f32 %v1603_v49  ;;  %v5755_v22 = vrot.slane %v1520_v3, %v5630_v8  ;;  %v1669_v47 = vadd.f32 %v5684_v63, %v5655_v16 }
 0x10d   : > { %v4987_v31 = vpop.eup %4986  ;;  %2178 = vadd.xlane.f32.xlu0 %v2177_v27  ;;  %v4675_v32 = vpop.f32.mrb[14].mxu0  ;;  %v5715_v44 = vadd.f32 %v5655_v16, %v1296_v30  ;;  %v2006_v50 = vsel %vm7661_vm0, %v1864_v39, 0.0  ;;  %5008 = vtanh.f32 %v1667_v1 }
 0x10e   : > { %v4739_v33 = vpop.f32.mrb[14].mxu1  ;;  %v5707_v35 = vpop.f32.mrb[15].mxu0  ;;  %v1863_v43 = vmul.f32 %v4987_v31, %v5669_v41  ;;  %v1609_v10 = vadd.f32 %v4675_v32, %v5651_v15  ;;  %7672 = vst [vmem:[#allocation10_spill] sm:$0xff] %v5755_v22  ;;  %5010 = vtanh.f32 %v1602_v9  ;;  %v5781_v39 = vrot.slane %v5755_v22, %v5643_v13 }
 0x10f   : > { %v1299_v36 = vpop.f32.mrb[15].mxu1  ;;  %v4989_v40 = vpop.eup %4988  ;;  %v5718_v45 = vadd.f32 %v4739_v33, %v5655_v16 }
 0x110   : > { %2181 = vadd.xlane.f32.xlu1 %v2180_v38  ;;  %v4991_v46 = vpop.eup %4990  ;;  %v5722_v48 = vadd.f32 %v5655_v16, %v1299_v36  ;;  %v1928_v51 = vmul.f32 %v4989_v40, %v5669_v41  ;;  %v2003_v56 = vsel %vm7661_vm0, %v1863_v43, 0.0  ;;  %5012 = vtanh.f32 %v1609_v10 }
 0x111   : > { %1989 = vadd.xlane.f32.xlu0 %v1988_v42  ;;  %v4993_v55 = vpop.eup %4992  ;;  %v1927_v54 = vmul.f32 %v4991_v46, %v5669_v41  ;;  %v1607_v38 = vadd.f32 %v5651_v15, %v5707_v35  ;;  %v5784_v40 = vrot.slane %v1521_v58, %v5630_v8  ;;  %5014 = vtanh.f32 %v1666_v23 }
 0x112   : > { %v4995_v61 = vpop.eup %4994  ;;  %v2198_v17 = vsel %vm7661_vm0, %v1928_v51, 0.0  ;;  %v1862_v18 = vmul.f32 %v4993_v55, %v5669_v41 }
 0x113   : > { %v5727_v52 = vpop.f32.mrb[16].mxu0  ;;  %v5729_v53 = vpop.f32.mrb[16].mxu1  ;;  %v2195_v20 = vsel %vm7661_vm0, %v1927_v54, 0.0  ;;  %v1861_v2 = vmul.f32 %v4995_v61, %v5669_v41  ;;  %5016 = vtanh.f32 %v1607_v38  ;;  %v1608_v54 = vadd.f32 %v5698_v24, %v5651_v15 }
 0x114   : > { %2007 = vadd.xlane.f32.xlu1 %v2006_v50  ;;  %v5733_v57 = vpop.f32.mrb[17].mxu0  ;;  %v5735_v60 = vpop.f32.mrb[17].mxu1  ;;  %v2000_v26 = vsel %vm7661_vm0, %v1862_v18, 0.0  ;;  %5018 = vtanh.f32 %v1669_v47  ;;  %v1606_v38 = vadd.f32 %v5651_v15, %v5704_v29 }
 0x115   : > { %2004 = vadd.xlane.f32.xlu0 %v2003_v56  ;;  %v4679_v62 = vpop.f32.mrb[18].mxu0  ;;  %v5737_v0 = vpop.f32.mrb[18].mxu1  ;;  %v1997_v32 = vsel %vm7661_vm0, %v1861_v2, 0.0  ;;  %v5799_v56 = vrot.slane %v5784_v40, %v5643_v13 }
 0x116   : > { %v5743_v5 = vpop.f32.mrb[19].mxu0  ;;  %v5745_v7 = vpop.f32.mrb[19].mxu1  ;;  %v1613_v55 = vadd.f32 %v4679_v62, %v5781_v39 }
 0x117   : > { %v4997_v19 = vpop.eup %4996 }
 0x118   : > { %2199 = vadd.xlane.f32.xlu1 %v2198_v17  ;;  %v4999_v21 = vpop.eup %4998  ;;  %v1926_v27 = vmul.f32 %v4997_v19, %v5669_v41  ;;  %5020 = vtanh.f32 %v1613_v55 }
 0x119   : > { %2196 = vadd.xlane.f32.xlu0 %v2195_v20  ;;  %v5001_v31 = vpop.eup %5000  ;;  %v1925_v33 = vmul.f32 %v4999_v21, %v5669_v41  ;;  %v1677_v21 = vadd.f32 %v5737_v0, %v5799_v56  ;;  %5022 = vtanh.f32 %v1608_v54  ;;  %v1611_v0 = vadd.f32 %v5781_v39, %v5743_v5 }
 0x11a   : > { %v5003_v36 = vpop.eup %5002  ;;  %v2192_v49 = vsel %vm7661_vm0, %v1926_v27, 0.0  ;;  %v1868_v35 = vmul.f32 %v5001_v31, %v5669_v41 }
 0x11b   : > { %v5763_v28 = vpop.f32.mrb[20].mxu1  ;;  %v5765_v30 = vpop.f32.mrb[20].mxu0  ;;  %v2189_v51 = vsel %vm7661_vm0, %v1925_v33, 0.0  ;;  %v1867_v8 = vmul.f32 %v5003_v36, %v5669_v41  ;;  %5024 = vtanh.f32 %v1677_v21 }
 0x11c   : > { %2001 = vadd.xlane.f32.xlu1 %v2000_v26  ;;  %v5769_v34 = vpop.f32.mrb[21].mxu1  ;;  %v5771_v11 = vpop.f32.mrb[21].mxu0  ;;  %v2018_v61 = vsel %vm7661_vm0, %v1868_v35, 0.0  ;;  %v1672_v26 = vadd.f32 %v5700_v25, %v5655_v16 }
 0x11d   : > { %1998 = vadd.xlane.f32.xlu0 %v1997_v32  ;;  %v5773_v59 = vpop.f32.mrb[22].mxu1  ;;  %v5775_v37 = vpop.f32.mrb[22].mxu0  ;;  %v2015_v62 = vsel %vm7661_vm0, %v1867_v8, 0.0 }
 0x11e   : > { %v5786_v42 = vpop.f32.mrb[23].mxu1  ;;  %v5788_v43 = vpop.f32.mrb[23].mxu0  ;;  %5026 = vtanh.f32 %v1672_v26 }
 0x11f   : > { %v5005_v46 = vpop.eup %5004  ;;  %5028 = vtanh.f32 %v1611_v0 }
 0x120   : > { %v5007_v50 = vpop.eup %5006  ;;  %2193 = vadd.xlane.f32.xlu1 %v2192_v49  ;;  %v1931_v63 = vmul.f32 %v5005_v46, %v5669_v41  ;;  %5030 = vtanh.f32 %v1606_v38 }
 0x121   : > { %2190 = vadd.xlane.f32.xlu0 %v2189_v51  ;;  %v1866_v1 = vmul.f32 %v5007_v50, %v5669_v41  ;;  %v5009_v17 = vpop.eup %5008 }
 0x122   : > { %v5011_v20 = vpop.eup %5010  ;;  %v2207_v10 = vsel %vm7661_vm0, %v1931_v63, 0.0  ;;  %v1930_v31 = vmul.f32 %v5009_v17, %v5669_v41  ;;  %v1675_v63 = vadd.f32 %v5799_v56, %v5745_v7  ;;  %v1680_v7 = vadd.f32 %v5763_v28, %v5799_v56 }
 0x123   : > { %v5806_v3 = vpop.f32.mrb[24].mxu1  ;;  %v5808_v9 = vpop.f32.mrb[24].mxu0  ;;  %v2012_v27 = vsel %vm7661_vm0, %v1866_v1, 0.0  ;;  %v1865_v33 = vmul.f32 %v5011_v20, %v5669_v41 }
 0x124   : > { %2019 = vadd.xlane.f32.xlu1 %v2018_v61  ;;  %v5811_v18 = vpop.f32.mrb[25].mxu1  ;;  %v5813_v19 = vpop.f32.mrb[25].mxu0  ;;  %v2204_v16 = vsel %vm7661_vm0, %v1930_v31, 0.0  ;;  %5032 = vtanh.f32 %v1675_v63 }
 0x125   : > { %2016 = vadd.xlane.f32.xlu0 %v2015_v62  ;;  %v5815_v2 = vpop.f32.mrb[26].mxu1  ;;  %v5817_v24 = vpop.f32.mrb[26].mxu0  ;;  %v2009_v35 = vsel %vm7661_vm0, %v1865_v33, 0.0  ;;  %5034 = vtanh.f32 %v5715_v44 }
 0x126   : > { %v5822_v58 = vpop.f32.mrb[27].mxu1  ;;  %v5824_v23 = vpop.f32.mrb[27].mxu0  ;;  %5036 = vtanh.f32 %v1680_v7 }
 0x127   : > { %v5013_v32 = vpop.eup %5012  ;;  %5038 = vtanh.f32 %v5718_v45  ;;  %v1612_v45 = vadd.f32 %v5727_v52, %v5781_v39 }
 0x128   : > { %2013 = vadd.xlane.f32.xlu1 %v2012_v27  ;;  %v5015_v36 = vpop.eup %5014  ;;  %v1872_v25 = vmul.f32 %v5013_v32, %v5669_v41 }
 0x129   : > { %2208 = vadd.xlane.f32.xlu0 %v2207_v10  ;;  %v5017_v49 = vpop.eup %5016  ;;  %v1929_v50 = vmul.f32 %v5015_v36, %v5669_v41 }
 0x12a   : > { %v5019_v29 = vpop.eup %5018  ;;  %v2030_v62 = vsel %vm7661_vm0, %v1872_v25, 0.0  ;;  %v1870_v20 = vmul.f32 %v5017_v49, %v5669_v41 }
 0x12b   : > { %v5837_v46 = vpop.f32.mrb[28].mxu1  ;;  %v4690_v47 = vpop.f32.mrb[28].mxu0  ;;  %v2201_v26 = vsel %vm7661_vm0, %v1929_v50, 0.0  ;;  %v1932_v27 = vmul.f32 %v5019_v29, %v5669_v41  ;;  %v1678_v29 = vadd.f32 %v5799_v56, %v5769_v34  ;;  %v1617_v34 = vadd.f32 %v5775_v37, %v5781_v39 }
 0x12c   : > { %2205 = vadd.xlane.f32.xlu1 %v2204_v16  ;;  %v5841_v51 = vpop.f32.mrb[29].mxu1  ;;  %v5844_v5 = vadd.f32 %v4690_v47, %v5781_v39  ;;  %v1104_v15 = vpop.f32.mrb[29].mxu0  ;;  %v2024_v36 = vsel %vm7661_vm0, %v1870_v20, 0.0 }
 0x12d   : > { %2010 = vadd.xlane.f32.xlu0 %v2009_v35  ;;  %v4755_v8 = vpop.f32.mrb[30].mxu1  ;;  %v4691_v55 = vpop.f32.mrb[30].mxu0  ;;  %v5852_v1 = vadd.f32 %v5781_v39, %v1104_v15  ;;  %v2210_v25 = vsel %vm7661_vm0, %v1932_v27, 0.0  ;;  %5040 = vtanh.f32 %v1678_v29  ;;  %v1615_v29 = vadd.f32 %v5781_v39, %v5788_v43 }
 0x12e   : > { %v5849_v54 = vadd.f32 %v4755_v8, %v5799_v56  ;;  %v1363_v61 = vpop.f32.mrb[31].mxu1  ;;  %v1107_v17 = vpop.f32.mrb[31].mxu0  ;;  %v5864_v31 = vadd.f32 %v4691_v55, %v5781_v39  ;;  %5042 = vtanh.f32 %v5722_v48 }
 0x12f   : > { %v5857_v21 = vadd.f32 %v5799_v56, %v1363_v61  ;;  %v5021_v10 = vpop.eup %5020  ;;  %v5867_v33 = vadd.f32 %v5781_v39, %v1107_v17  ;;  %5044 = vtanh.f32 %v1617_v34  ;;  %v1684_v34 = vadd.f32 %v5806_v3, %v5799_v56 }
 0x130   : > { %2031 = vadd.xlane.f32.xlu1 %v2030_v62  ;;  %v5023_v32 = vpop.eup %5022  ;;  %v1876_v0 = vmul.f32 %v5021_v10, %v5669_v41  ;;  %5046 = vtanh.f32 %v1612_v45 }
 0x131   : > { %2202 = vadd.xlane.f32.xlu0 %v2201_v26  ;;  %v5025_v16 = vpop.eup %5024  ;;  %v1871_v47 = vmul.f32 %v5023_v32, %v5669_v41  ;;  %5048 = vtanh.f32 %v1615_v29 }
 0x132   : > { %v5027_v44 = vpop.eup %5026  ;;  %v2042_v63 = vsel %vm7661_vm0, %v1876_v0, 0.0  ;;  %v1940_v61 = vmul.f32 %v5025_v16, %v5669_v41 }
 0x133   : > { %v5872_v38 = vpop.f32.mrb[32].mxu1  ;;  %v5874_v28 = vpop.f32.mrb[32].mxu0  ;;  %v2027_v62 = vsel %vm7661_vm0, %v1871_v47, 0.0  ;;  %v1935_v20 = vmul.f32 %v5027_v44, %v5669_v41 }
 0x134   : > { %2025 = vadd.xlane.f32.xlu1 %v2024_v36  ;;  %v5878_v49 = vpop.f32.mrb[33].mxu1  ;;  %v5880_v35 = vpop.f32.mrb[33].mxu0  ;;  %v2234_v26 = vsel %vm7661_vm0, %v1940_v61, 0.0 }
 0x135   : > { %2211 = vadd.xlane.f32.xlu0 %v2210_v25  ;;  %v5882_v50 = vpop.f32.mrb[34].mxu1  ;;  %v5884_v15 = vpop.f32.mrb[34].mxu0  ;;  %v2219_v0 = vsel %vm7661_vm0, %v1935_v20, 0.0 }
 0x136   : > { %v5888_v8 = vpop.f32.mrb[35].mxu1  ;;  %v5890_v55 = vpop.f32.mrb[35].mxu0 }
 0x137   : > { %v5029_v17 = vpop.eup %5028 }
 0x138   : > { %2043 = vadd.xlane.f32.xlu1 %v2042_v63  ;;  %v5031_v10 = vpop.eup %5030  ;;  %v1874_v7 = vmul.f32 %v5029_v17, %v5669_v41  ;;  %v1676_v17 = vadd.f32 %v5729_v53, %v5799_v56  ;;  %v1610_v53 = vadd.f32 %v5781_v39, %v5733_v57 }
 0x139   : > { %2028 = vadd.xlane.f32.xlu0 %v2027_v62  ;;  %v5033_v36 = vpop.eup %5032  ;;  %v1869_v16 = vmul.f32 %v5031_v10, %v5669_v41 }
 0x13a   : > { %v5035_v25 = vpop.eup %5034  ;;  %v2036_v62 = vsel %vm7661_vm0, %v1874_v7, 0.0  ;;  %v1938_v20 = vmul.f32 %v5033_v36, %v5669_v41  ;;  %5050 = vtanh.f32 %v1676_v17 }
 0x13b   : > { %v5904_v27 = vpop.f32.mrb[36].mxu1  ;;  %v5906_v32 = vpop.f32.mrb[36].mxu0  ;;  %v2021_v10 = vsel %vm7661_vm0, %v1869_v16, 0.0  ;;  %v1933_v43 = vmul.f32 %v5035_v25, %v5669_v41  ;;  %5052 = vtanh.f32 %v1684_v34  ;;  %v1551_v34 = vcombine.high %v5647_v14, %v5647_v14 }
 0x13c   : > { %2235 = vadd.xlane.f32.xlu1 %v2234_v26  ;;  %v5910_v37 = vpop.f32.mrb[37].mxu1  ;;  %v5912_v48 = vpop.f32.mrb[37].mxu0  ;;  %v2228_v45 = vsel %vm7661_vm0, %v1938_v20, 0.0  ;;  %5054 = vtanh.f32 %v1610_v53  ;;  %v1621_v53 = vadd.f32 %v5817_v24, %v5781_v39 }
 0x13d   : > { %2220 = vadd.xlane.f32.xlu0 %v2219_v0  ;;  %v5914_v52 = vpop.f32.mrb[38].mxu1  ;;  %v5916_v47 = vpop.f32.mrb[38].mxu0  ;;  %v2213_v3 = vsel %vm7661_vm0, %v1933_v43, 0.0 }
 0x13e   : > { %v5037_v44 = vpop.eup %5036  ;;  %v5920_v63 = vpop.f32.mrb[39].mxu1 }
 0x13f   : > { %v5922_v61 = vpop.f32.mrb[39].mxu0  ;;  %v5039_v26 = vpop.eup %5038  ;;  %v1943_v0 = vmul.f32 %v5037_v44, %v5669_v41 }
 0x140   : > { %2037 = vadd.xlane.f32.xlu1 %v2036_v62  ;;  %v5041_v16 = vpop.eup %5040  ;;  %v1936_v25 = vmul.f32 %v5039_v26, %v5669_v41 }
 0x141   : > { %2022 = vadd.xlane.f32.xlu0 %v2021_v10  ;;  %v5043_v29 = vpop.eup %5042  ;;  %v2243_v57 = vsel %vm7661_vm0, %v1943_v0, 0.0  ;;  %v1682_v10 = vadd.f32 %v5799_v56, %v5811_v18  ;;  %v1941_v0 = vmul.f32 %v5041_v16, %v5669_v41  ;;  %v1550_v18 = vcombine.high %v5640_v12, %v5640_v12 }
 0x142   : > { %v2222_v4 = vsel %vm7661_vm0, %v1936_v25, 0.0  ;;  %v1934_v22 = vmul.f32 %v5043_v29, %v5669_v41 }
 0x143   : > { %v5936_v7 = vpop.f32.mrb[40].mxu0  ;;  %v5938_v36 = vpop.f32.mrb[40].mxu1  ;;  %5056 = vtanh.f32 %v1682_v10  ;;  %v2237_v16 = vsel %vm7661_vm0, %v1941_v0, 0.0  ;;  %v5982_v10 = vrot.slane %v1550_v18, %v5643_v13 }
 0x144   : > { %2229 = vadd.xlane.f32.xlu1 %v2228_v45  ;;  %v5942_v62 = vpop.f32.mrb[41].mxu0  ;;  %v5944_v44 = vpop.f32.mrb[41].mxu1  ;;  %v1674_v45 = vadd.f32 %v5799_v56, %v5735_v60  ;;  %v1616_v60 = vadd.f32 %v5765_v30, %v5781_v39 }
 0x145   : > { %2214 = vadd.xlane.f32.xlu0 %v2213_v3  ;;  %v5947_v17 = vpop.f32.mrb[42].mxu0  ;;  %v5949_v20 = vpop.f32.mrb[42].mxu1 }
 0x146   : > { %7673 = vst [vmem:[#allocation11_spill] sm:$0xff] %v5949_v20  ;;  %v5955_v43 = vpop.f32.mrb[43].mxu0  ;;  %v5957_v26 = vpop.f32.mrb[43].mxu1  ;;  %5058 = vtanh.f32 %v1674_v45 }
 0x147   : > { %7674 = vst [vmem:[#allocation12_spill] sm:$0xff] %v5957_v26  ;;  %v5045_v3 = vpop.eup %5044  ;;  %v5969_v26 = vrot.slane %v1551_v34, %v5643_v13  ;;  %5060 = vtanh.f32 %v1621_v53 }
 0x148   : > { %2244 = vadd.xlane.f32.xlu1 %v2243_v57  ;;  %v5047_v14 = vpop.eup %5046  ;;  %v1880_v25 = vmul.f32 %v5045_v3, %v5669_v41  ;;  %v2216_v57 = vsel %vm7661_vm0, %v1934_v22, 0.0  ;;  %v1614_v22 = vadd.f32 %v5781_v39, %v5771_v11  ;;  %5062 = vtanh.f32 %v1616_v60 }
 0x149   : > { %2223 = vadd.xlane.f32.xlu0 %v2222_v4  ;;  %v5049_v4 = vpop.eup %5048  ;;  %v1875_v24 = vmul.f32 %v5047_v14, %v5669_v41  ;;  %v1685_v14 = vadd.f32 %v5815_v2, %v5799_v56  ;;  %v1619_v60 = vadd.f32 %v5781_v39, %v5824_v23 }
 0x14a   : > { %v5051_v30 = vpop.eup %5050 }
 0x14b   : > { %v5975_v29 = vpop.f32.mrb[44].mxu1  ;;  %v5977_v12 = vpop.f32.mrb[44].mxu0  ;;  %v2039_v11 = vsel %vm7661_vm0, %v1875_v24, 0.0  ;;  %v1939_v2 = vmul.f32 %v5051_v30, %v5669_v41  ;;  %5064 = vtanh.f32 %v1685_v14 }
 0x14c   : > { %7675 = vst [vmem:[#allocation13_spill] sm:$0xff] %v5977_v12  ;;  %2238 = vadd.xlane.f32.xlu1 %v2237_v16  ;;  %v1424_v34 = vpop.f32.mrb[45].mxu1  ;;  %v1168_v45 = vpop.f32.mrb[45].mxu0  ;;  %5066 = vtanh.f32 %v1614_v22 }
 0x14d   : > { %2217 = vadd.xlane.f32.xlu0 %v2216_v57  ;;  %v5985_v0 = vadd.f32 %v5969_v26, %v1424_v34  ;;  %v5987_v3 = vpop.f32.mrb[46].mxu1  ;;  %v5989_v6 = vpop.f32.mrb[46].mxu0  ;;  %v5996_v18 = vadd.f32 %v5982_v10, %v1168_v45  ;;  %v2054_v34 = vsel %vm7661_vm0, %v1880_v25, 0.0  ;;  %v1681_v25 = vadd.f32 %v5773_v59, %v5799_v56 }
 0x14e   : > { %v5053_v12 = vpop.eup %5052  ;;  %v1427_v16 = vpop.f32.mrb[47].mxu1  ;;  %v2231_v30 = vsel %vm7661_vm0, %v1939_v2, 0.0  ;;  %5068 = vtanh.f32 %v1619_v60 }
 0x14f   : > { %7676 = vst [vmem:[#allocation14_spill] sm:$0xff] %v5985_v0  ;;  %v5998_v57 = vpop.f32.mrb[47].mxu0  ;;  %v1878_v0 = vmul.f32 %v5049_v4, %v5669_v41  ;;  %v6003_v20 = vadd.f32 %v5969_v26, %v1427_v16  ;;  %v5055_v53 = vpop.eup %5054  ;;  %v1947_v45 = vmul.f32 %v5053_v12, %v5669_v41  ;;  %5070 = vtanh.f32 %v1681_v25 }
 0x150   : > { %2055 = vadd.xlane.f32.xlu1 %v2054_v34  ;;  %v5057_v34 = vpop.eup %5056  ;;  %v1873_v12 = vmul.f32 %v5055_v53, %v5669_v41  ;;  %v1679_v53 = vadd.f32 %v5799_v56, %v5786_v42  ;;  %v1620_v25 = vadd.f32 %v5808_v9, %v5781_v39 }
 0x151   : > { %2040 = vadd.xlane.f32.xlu0 %v2039_v11  ;;  %v2048_v4 = vsel %vm7661_vm0, %v1878_v0, 0.0  ;;  %v5059_v23 = vpop.eup %5058  ;;  %v2255_v59 = vsel %vm7661_vm0, %v1947_v45, 0.0 }
 0x152   : > { %v2033_v45 = vsel %vm7661_vm0, %v1873_v12, 0.0 }
 0x153   : > { %v6013_v16 = vpop.f32.mrb[48].mxu1  ;;  %v6015_v24 = vpop.f32.mrb[48].mxu0 }
 0x154   : > { %7677 = vst [vmem:[#allocation15_spill] sm:$0xff] %v6015_v24  ;;  %2049 = vadd.xlane.f32.xlu1 %v2048_v4  ;;  %v6019_v14 = vpop.f32.mrb[49].mxu1  ;;  %v6021_v11 = vpop.f32.mrb[49].mxu0  ;;  %v1683_v24 = vadd.f32 %v5799_v56, %v5822_v58  ;;  %v1937_v58 = vmul.f32 %v5059_v23, %v5669_v41 }
 0x155   : > { %7678 = vst [vmem:[#allocation16_spill] sm:$0xff] %v6021_v11  ;;  %2232 = vadd.xlane.f32.xlu0 %v2231_v30  ;;  %v6024_v22 = vpop.f32.mrb[50].mxu1  ;;  %v6026_v0 = vpop.f32.mrb[50].mxu0  ;;  %v1945_v30 = vmul.f32 %v5057_v34, %v5669_v41 }
 0x156   : > { %7679 = vst [vmem:[#allocation17_spill] sm:$0xff] %v6024_v22  ;;  %v6030_v2 = vpop.f32.mrb[51].mxu1  ;;  %v6032_v4 = vpop.f32.mrb[51].mxu0  ;;  %v1688_v22 = vadd.f32 %v5837_v46, %v5799_v56  ;;  %5072 = vtanh.f32 %v1683_v24  ;;  %v2225_v46 = vsel %vm7661_vm0, %v1937_v58, 0.0  ;;  %v1618_v58 = vadd.f32 %v5781_v39, %v5813_v19 }
 0x157   : > { %7680 = vst [vmem:[#allocation18_spill] sm:$0xff] %v6030_v2  ;;  %v5061_v11 = vpop.eup %5060  ;;  %5074 = vtanh.f32 %v1679_v53  ;;  %v2249_v42 = vsel %vm7661_vm0, %v1945_v30, 0.0 }
 0x158   : > { %2256 = vadd.xlane.f32.xlu1 %v2255_v59  ;;  %v5063_v60 = vpop.eup %5062  ;;  %v1884_v34 = vmul.f32 %v5061_v11, %v5669_v41  ;;  %5076 = vtanh.f32 %v1688_v22 }
 0x159   : > { %2034 = vadd.xlane.f32.xlu0 %v2033_v45  ;;  %v5065_v59 = vpop.eup %5064  ;;  %v1879_v23 = vmul.f32 %v5063_v60, %v5669_v41  ;;  %v1686_v45 = vadd.f32 %v5799_v56, %v5841_v51  ;;  %5078 = vtanh.f32 %v1620_v25 }
 0x15a   : > { %v5067_v9 = vpop.eup %5066  ;;  %v2066_v60 = vsel %vm7661_vm0, %v1884_v34, 0.0 }
 0x15b   : > { %v6045_v2 = vpop.f32.mrb[52].mxu1  ;;  %v6047_v12 = vpop.f32.mrb[52].mxu0  ;;  %5080 = vtanh.f32 %v1686_v45 }
 0x15c   : > { %7681 = vst [vmem:[#allocation19_spill] sm:$0xff] %v6047_v12  ;;  %2250 = vadd.xlane.f32.xlu1 %v2249_v42  ;;  %v6051_v24 = vpop.f32.mrb[53].mxu1  ;;  %v6053_v53 = vpop.f32.mrb[53].mxu0  ;;  %v1948_v42 = vmul.f32 %v5065_v59, %v5669_v41  ;;  %5082 = vtanh.f32 %v1618_v58 }
 0x15d   : > { %7682 = vst [vmem:[#allocation20_spill] sm:$0xff] %v6053_v53  ;;  %2226 = vadd.xlane.f32.xlu0 %v2225_v46  ;;  %v6055_v30 = vpop.f32.mrb[54].mxu1  ;;  %v6057_v11 = vpop.f32.mrb[54].mxu0  ;;  %v2051_v53 = vsel %vm7661_vm0, %v1879_v23, 0.0  ;;  %5084 = vtanh.f32 %v5864_v31 }
 0x15e   : > { %7683 = vst [vmem:[#allocation21_spill] sm:$0xff] %v6055_v30  ;;  %7684 = vst [vmem:[#allocation22_spill] sm:$0xff] %v6057_v11  ;;  %v6061_v12 = vpop.f32.mrb[55].mxu1  ;;  %v6063_v22 = vpop.f32.mrb[55].mxu0  ;;  %v1877_v30 = vmul.f32 %v5067_v9, %v5669_v41  ;;  %v2258_v56 = vsel %vm7661_vm0, %v1948_v42, 0.0  ;;  %5086 = vtanh.f32 %v5844_v5 }
 0x15f   : > { %v5069_v46 = vpop.eup %5068  ;;  %5088 = vtanh.f32 %v5867_v33 }
 0x160   : > { %2067 = vadd.xlane.f32.xlu1 %v2066_v60  ;;  %v5071_v11 = vpop.eup %5070  ;;  %v1882_v51 = vmul.f32 %v5069_v46, %v5669_v41  ;;  %v2045_v34 = vsel %vm7661_vm0, %v1877_v30, 0.0  ;;  %5090 = vtanh.f32 %v5852_v1 }
 0x161   : > { %2052 = vadd.xlane.f32.xlu0 %v2051_v53  ;;  %v5073_v19 = vpop.eup %5072  ;;  %v1944_v59 = vmul.f32 %v5071_v11, %v5669_v41  ;;  %5092 = vtanh.f32 %v5857_v21  ;;  %v1629_v21 = vadd.f32 %v5884_v15, %v5982_v10  ;;  %v1627_v15 = vadd.f32 %v5982_v10, %v5890_v55 }
 0x162   : > { %v5075_v53 = vpop.eup %5074  ;;  %v2060_v30 = vsel %vm7661_vm0, %v1882_v51, 0.0  ;;  %v1946_v11 = vmul.f32 %v5073_v19, %v5669_v41  ;;  %5094 = vtanh.f32 %v5849_v54 }
 0x163   : > { %v6073_v25 = vpop.f32.mrb[56].mxu1  ;;  %v6075_v39 = vpop.f32.mrb[56].mxu0 }
 0x164   : > { %7685 = vst [vmem:[#allocation23_spill] sm:$0xff] %v6075_v39  ;;  %2259 = vadd.xlane.f32.xlu1 %v2258_v56  ;;  %v6079_v23 = vpop.f32.mrb[57].mxu1  ;;  %v6081_v9 = vpop.f32.mrb[57].mxu0  ;;  %v2246_v56 = vsel %vm7661_vm0, %v1944_v59, 0.0  ;;  %v2252_v31 = vsel %vm7661_vm0, %v1946_v11, 0.0  ;;  %v1690_v59 = vadd.f32 %v5969_v26, %v5878_v49  ;;  %v1628_v11 = vadd.f32 %v5874_v28, %v5982_v10 }
 0x165   : > { %7686 = vst [vmem:[#allocation24_spill] sm:$0xff] %v6081_v9  ;;  %2046 = vadd.xlane.f32.xlu0 %v2045_v34  ;;  %v6083_v45 = vpop.f32.mrb[58].mxu1  ;;  %v6085_v58 = vpop.f32.mrb[58].mxu0  ;;  %v1942_v34 = vmul.f32 %v5075_v53, %v5669_v41 }
 0x166   : > { %v5077_v60 = vpop.eup %5076  ;;  %v6088_v42 = vpop.f32.mrb[59].mxu1  ;;  %5096 = vtanh.f32 %v1690_v59 }
 0x167   : > { %7687 = vst [vmem:[#allocation25_spill] sm:$0xff] %v6088_v42  ;;  %v6090_v46 = vpop.f32.mrb[59].mxu0  ;;  %v5079_v9 = vpop.eup %5078  ;;  %v1951_v39 = vmul.f32 %v5077_v60, %v5669_v41  ;;  %v2240_v19 = vsel %vm7661_vm0, %v1942_v34, 0.0  ;;  %5098 = vtanh.f32 %v1628_v11 }
 0x168   : > { %2061 = vadd.xlane.f32.xlu1 %v2060_v30  ;;  %v5081_v51 = vpop.eup %5080  ;;  %v1883_v53 = vmul.f32 %v5079_v9, %v5669_v41  ;;  %5100 = vtanh.f32 %v1629_v21 }
 0x169   : > { %2247 = vadd.xlane.f32.xlu0 %v2246_v56  ;;  %v5083_v33 = vpop.eup %5082  ;;  %v2267_v1 = vsel %vm7661_vm0, %v1951_v39, 0.0  ;;  %v1949_v9 = vmul.f32 %v5081_v51, %v5669_v41 }
 0x16a   : > { %v1881_v39 = vmul.f32 %v5083_v33, %v5669_v41  ;;  %v1553_v33 = vcombine.high %v5784_v40, %v5784_v40  ;;  %v1696_v40 = vadd.f32 %v5904_v27, %v5969_v26 }
 0x16b   : > { %v4786_v5 = vpop.f32.mrb[60].mxu1  ;;  %v6101_v42 = vpop.f32.mrb[60].mxu0  ;;  %v2261_v54 = vsel %vm7661_vm0, %v1949_v9, 0.0 }
 0x16c   : > { %7688 = vst [vmem:[#allocation26_spill] sm:$0xff] %v6101_v42  ;;  %2253 = vadd.xlane.f32.xlu1 %v2252_v31  ;;  %v6107_v30 = vpop.f32.mrb[61].mxu1  ;;  %v6109_v60 = vpop.f32.mrb[61].mxu0  ;;  %v2057_v59 = vsel %vm7661_vm0, %v1881_v39, 0.0 }
 0x16d   : > { %7689 = vst [vmem:[#allocation27_spill] sm:$0xff] %v6109_v60  ;;  %2241 = vadd.xlane.f32.xlu0 %v2240_v19  ;;  %v4787_v56 = vpop.f32.mrb[62].mxu1  ;;  %v6114_v42 = vpop.f32.mrb[62].mxu0  ;;  %v2063_v19 = vsel %vm7661_vm0, %v1883_v53, 0.0 }
 0x16e   : > { %v1491_v34 = vpop.f32.mrb[63].mxu1  ;;  %v6117_v49 = vpop.f32.mrb[63].mxu0 }
 0x16f   : > { %7690 = vst [vmem:[#allocation28_spill] sm:$0xff] %v6117_v49  ;;  %v5085_v31 = vpop.eup %5084  ;;  %v1692_v49 = vadd.f32 %v5872_v38, %v5969_v26  ;;  %v1626_v38 = vadd.f32 %v5982_v10, %v5880_v35  ;;  %v1693_v35 = vadd.f32 %v5882_v50, %v5969_v26  ;;  %v6161_v50 = vld [vmem:[%s7654_s4] ss:$0 sm:$0xff] }
 0x170   : > { %2268 = vadd.xlane.f32.xlu1 %v2267_v1  ;;  %v5087_v28 = vpop.eup %5086  ;;  %v1888_v51 = vmul.f32 %v5085_v31, %v5669_v41 }
 0x171   : > { %2064 = vadd.xlane.f32.xlu0 %v2063_v19  ;;  %v5089_v60 = vpop.eup %5088  ;;  %v1887_v53 = vmul.f32 %v5087_v28, %v5669_v41  ;;  %5102 = vtanh.f32 %v1692_v49  ;;  %v6144_v28 = vrot.slane %v1553_v33, %v5643_v13 }
 0x172   : > { %v5091_v1 = vpop.eup %5090  ;;  %v2078_v11 = vsel %vm7661_vm0, %v1888_v51, 0.0  ;;  %v1886_v9 = vmul.f32 %v5089_v60, %v5669_v41  ;;  %5104 = vtanh.f32 %v1627_v15 }
 0x173   : > { %v5093_v31 = vpop.eup %5092  ;;  %v2075_v19 = vsel %vm7661_vm0, %v1887_v53, 0.0  ;;  %v1885_v39 = vmul.f32 %v5091_v1, %v5669_v41  ;;  %v6149_v60 = vadd.f32 %v4786_v5, %v6144_v28  ;;  %5106 = vtanh.f32 %v1626_v38 }
 0x174   : > { %2262 = vadd.xlane.f32.xlu1 %v2261_v54  ;;  %v5095_v55 = vpop.eup %5094  ;;  %v2072_v54 = vsel %vm7661_vm0, %v1886_v9, 0.0  ;;  %v1950_v27 = vmul.f32 %v5093_v31, %v5669_v41  ;;  %v6154_v51 = vadd.f32 %v4787_v56, %v6144_v28  ;;  %5108 = vtanh.f32 %v1696_v40 }
 0x175   : > { %2058 = vadd.xlane.f32.xlu0 %v2057_v59  ;;  %v5097_v49 = vpop.eup %5096  ;;  %v2069_v59 = vsel %vm7661_vm0, %v1885_v39, 0.0  ;;  %v1952_v53 = vmul.f32 %v5095_v55, %v5669_v41  ;;  %v6165_v33 = vadd.f32 %v6144_v28, %v1491_v34  ;;  %v1694_v56 = vadd.f32 %v5969_v26, %v5910_v37 }
 0x176   : > { %v5099_v21 = vpop.eup %5098  ;;  %v1953_v5 = vmul.f32 %v6161_v50, %v5097_v49  ;;  %5110 = vtanh.f32 %v1693_v35  ;;  %v1691_v41 = vadd.f32 %v5969_v26, %v5888_v8  ;;  %v2264_v15 = vsel %vm7661_vm0, %v1950_v27, 0.0 }
 0x177   : > { %v1891_v1 = vmul.f32 %v6161_v50, %v5099_v21  ;;  %v5101_v38 = vpop.eup %5100  ;;  %5112 = vtanh.f32 %v1694_v56  ;;  %v1633_v37 = vadd.f32 %v5916_v47, %v5982_v10  ;;  %v1632_v8 = vadd.f32 %v5906_v32, %v5982_v10 }
 0x178   : > { %2079 = vadd.xlane.f32.xlu1 %v2078_v11  ;;  %v2270_v11 = vsel %vm7661_vm0, %v1952_v53, 0.0  ;;  %v2273_v34 = vsel %vm7661_vm0, %v1953_v5, 0.0  ;;  %5114 = vtanh.f32 %v1691_v41  ;;  %v1631_v35 = vadd.f32 %v5982_v10, %v5922_v61 }
 0x179   : > { %2076 = vadd.xlane.f32.xlu0 %v2075_v19  ;;  %v2087_v31 = vsel %vm7661_vm0, %v1891_v1, 0.0  ;;  %v1892_v19 = vmul.f32 %v6161_v50, %v5101_v38  ;;  %5116 = vtanh.f32 %v1633_v37  ;;  %v1630_v47 = vadd.f32 %v5982_v10, %v5912_v48 }
 0x17a   : > { %5118 = vtanh.f32 %v1632_v8  ;;  %v1637_v61 = vadd.f32 %v5947_v17, %v5982_v10  ;;  %v1635_v17 = vadd.f32 %v5982_v10, %v5955_v43  ;;  %v7691_v43 = vlaneseq }
 0x17b   : > { %v5103_v9 = vpop.eup %5102  ;;  %v2090_v21 = vsel %vm7661_vm0, %v1892_v19, 0.0  ;;  %5120 = vtanh.f32 %v1631_v35 }
 0x17c   : > { %2073 = vadd.xlane.f32.xlu1 %v2072_v54  ;;  %v5105_v40 = vpop.eup %5104  ;;  %v1955_v39 = vmul.f32 %v6161_v50, %v5103_v9  ;;  %v1697_v54 = vadd.f32 %v5914_v52, %v5969_v26  ;;  %5122 = vtanh.f32 %v1630_v47  ;;  %v1695_v52 = vadd.f32 %v5969_v26, %v5920_v63 }
 0x17d   : > { %2070 = vadd.xlane.f32.xlu0 %v2069_v59  ;;  %v5107_v55 = vpop.eup %5106  ;;  %v1890_v32 = vmul.f32 %v6161_v50, %v5105_v40  ;;  %v1704_v63 = vadd.f32 %v5975_v29, %v5969_v26  ;;  %v6211_v19 = vand.u32 127, %v7691_v43 }
 0x17e   : > { %v5109_v49 = vpop.eup %5108  ;;  %v2279_v27 = vsel %vm7661_vm0, %v1955_v39, 0.0  ;;  %v1889_v59 = vmul.f32 %v6161_v50, %v5107_v55  ;;  %5124 = vtanh.f32 %v1697_v54  ;;  %v1636_v39 = vadd.f32 %v5936_v7, %v5982_v10 }
 0x17f   : > { %v1959_v5 = vmul.f32 %v6161_v50, %v5109_v49  ;;  %v2084_v48 = vsel %vm7661_vm0, %v1890_v32, 0.0  ;;  %5126 = vtanh.f32 %v1637_v61  ;;  %v1634_v32 = vadd.f32 %v5982_v10, %v5942_v62 }
 0x180   : > { %2265 = vadd.xlane.f32.xlu1 %v2264_v15  ;;  %v5111_v53 = vpop.eup %5110  ;;  %v2081_v1 = vsel %vm7661_vm0, %v1889_v59, 0.0  ;;  %5128 = vtanh.f32 %v1695_v52  ;;  %v2512_v7 = vadd.s32 4294967280, %v6211_v19  ;;  %v2505_v61 = vadd.s32 4294967288, %v6211_v19 }
 0x181   : > { %2271 = vadd.xlane.f32.xlu0 %v2270_v11  ;;  %v5113_v56 = vpop.eup %5112  ;;  %v1956_v41 = vmul.f32 %v6161_v50, %v5111_v53  ;;  %v2291_v38 = vsel %vm7661_vm0, %v1959_v5, 0.0  ;;  %5130 = vtanh.f32 %v1635_v17  ;;  %v1641_v53 = vadd.f32 %v5989_v6, %v5982_v10 }
 0x182   : > { %v5115_v15 = vpop.eup %5114  ;;  %v1957_v11 = vmul.f32 %v6161_v50, %v5113_v56  ;;  %5132 = vtanh.f32 %v1704_v63  ;;  %v2519_v52 = vadd.s32 4294967272, %v6211_v19  ;;  %v1639_v17 = vadd.f32 %v5982_v10, %v5998_v57  ;;  %v7693_v63 = vld [vmem:[#allocation8_spill] sm:$0xff] }
 0x183   : > { %v5117_v9 = vpop.eup %5116  ;;  %5134 = vtanh.f32 %v1636_v39  ;;  %v6252_v43 = vsub.s32 %v2512_v7, %v7693_v63  ;;  %v6256_v57 = vsub.s32 %v6211_v19, %v7693_v63 }
 0x184   : > { %2274 = vadd.xlane.f32.xlu1 %v2273_v34  ;;  %v2282_v34 = vsel %vm7661_vm0, %v1956_v41, 0.0  ;;  %v5119_v37 = vpop.eup %5118  ;;  %v2285_v55 = vsel %vm7661_vm0, %v1957_v11, 0.0  ;;  %v1896_v49 = vmul.f32 %v6161_v50, %v5117_v9  ;;  %5136 = vtanh.f32 %v1634_v32  ;;  %v7692_v9 = vld [vmem:[#allocation11_spill] sm:$0xff] }
 0x185   : > { %2088 = vadd.xlane.f32.xlu0 %v2087_v31  ;;  %v1954_v31 = vmul.f32 %v6161_v50, %v5115_v15  ;;  %v5121_v29 = vpop.eup %5120  ;;  %v1895_v47 = vmul.f32 %v6161_v50, %v5119_v37  ;;  %v1698_v15 = vadd.f32 %v5969_v26, %v5944_v44  ;;  %5138 = vtanh.f32 %v1641_v53 }
 0x186   : > { %v2102_v56 = vsel %vm7661_vm0, %v1896_v49, 0.0  ;;  %v1894_v62 = vmul.f32 %v6161_v50, %v5121_v29 }
 0x187   : > { %v2276_v35 = vsel %vm7661_vm0, %v1954_v31, 0.0  ;;  %v2099_v41 = vsel %vm7661_vm0, %v1895_v47, 0.0  ;;  %v6248_v31 = vsub.s32 %v2505_v61, %v7693_v63 }
 0x188   : > { %2091 = vadd.xlane.f32.xlu1 %v2090_v21  ;;  %v5123_v21 = vpop.eup %5122  ;;  %v2096_v39 = vsel %vm7661_vm0, %v1894_v62, 0.0 }
 0x189   : > { %2280 = vadd.xlane.f32.xlu0 %v2279_v27  ;;  %v5125_v27 = vpop.eup %5124  ;;  %v1893_v6 = vmul.f32 %v6161_v50, %v5123_v21 }
 0x18a   : > { %v5127_v5 = vpop.eup %5126 }
 0x18b   : > { %v5129_v11 = vpop.eup %5128  ;;  %v1900_v37 = vmul.f32 %v6161_v50, %v5127_v5  ;;  %v2093_v49 = vsel %vm7661_vm0, %v1893_v6, 0.0 }
 0x18c   : > { %2085 = vadd.xlane.f32.xlu1 %v2084_v48  ;;  %v1700_v48 = vadd.f32 %v5938_v36, %v5969_v26  ;;  %v5131_v44 = vpop.eup %5130  ;;  %v1958_v47 = vmul.f32 %v6161_v50, %v5129_v11 }
 0x18d   : > { %2082 = vadd.xlane.f32.xlu0 %v2081_v1  ;;  %v1705_v1 = vadd.f32 %v5987_v3, %v5969_v26  ;;  %v6245_v3 = vadd.f32 %v7692_v9, %v5969_v26  ;;  %v5133_v21 = vpop.eup %5132  ;;  %v2114_v53 = vsel %vm7661_vm0, %v1900_v37, 0.0  ;;  %v1898_v61 = vmul.f32 %v6161_v50, %v5131_v44 }
 0x18e   : > { %5140 = vtanh.f32 %v1700_v48  ;;  %v5135_v6 = vpop.eup %5134  ;;  %v2533_v9 = vadd.s32 4294967256, %v6211_v19 }
 0x18f   : > { %5142 = vtanh.f32 %v1705_v1  ;;  %v5137_v37 = vpop.eup %5136  ;;  %v2108_v44 = vsel %vm7661_vm0, %v1898_v61, 0.0 }
 0x190   : > { %2292 = vadd.xlane.f32.xlu1 %v2291_v38  ;;  %v1960_v38 = vmul.f32 %v6161_v50, %v5125_v27  ;;  %5144 = vtanh.f32 %v1639_v17 }
 0x191   : > { %2283 = vadd.xlane.f32.xlu0 %v2282_v34  ;;  %v6208_v8 = vpop.xlane.xlu1 %1992  ;;  %5146 = vtanh.f32 %v1698_v15  ;;  %v2547_v15 = vadd.s32 4294967240, %v6211_v19 }
 0x192   : > { %v6213_v40 = vpop.xlane.xlu0 %2184  ;;  %v2516_v62 = vrot.slane %v6208_v8, %v6252_v43  ;;  %v1967_v8 = vmul.f32 %v6161_v50, %v5133_v21  ;;  %v1899_v21 = vmul.f32 %v6161_v50, %v5135_v6  ;;  %v7696_v6 = vld [vmem:[#allocation13_spill] sm:$0xff] }
 0x193   : > { %v2859_v5 = vrot.slane %v6213_v40, %v6252_v43 }
 0x194   : > { %2286 = vadd.xlane.f32.xlu1 %v2285_v55  ;;  %v6260_v55 = vsub.s32 %v2519_v52, %v7693_v63 }
 0x195   : > { %2277 = vadd.xlane.f32.xlu0 %v2276_v35  ;;  %v6223_v54 = vpop.xlane.xlu1 %1995  ;;  %v2294_v35 = vsel %vm7661_vm0, %v1960_v38, 0.0 }
 0x196   : > { %v1987_v59 = vpop.xlane.xlu0 %1986  ;;  %v2523_v40 = vrot.slane %v6223_v54, %v6260_v55 }
 0x197   : > { %v2504_v48 = vrot.slane %v1987_v59, %v6256_v57 }
 0x198   : > { %2103 = vadd.xlane.f32.xlu1 %v2102_v56 }
 0x199   : > { %2100 = vadd.xlane.f32.xlu0 %v2099_v41  ;;  %v2188_v36 = vpop.xlane.xlu1 %2187  ;;  %v1708_v41 = vadd.f32 %v6013_v16, %v6144_v28  ;;  %v7694_v16 = vld [vmem:[#allocation10_spill] sm:$0xff] }
 0x19a   : > { %v2179_v34 = vpop.xlane.xlu0 %2178  ;;  %v2864_v52 = vrot.slane %v2188_v36, %v6260_v55 }
 0x19b   : > { %v2850_v32 = vrot.slane %v2179_v34, %v6256_v57  ;;  %v1552_v34 = vcombine.high %v7694_v16, %v7694_v16  ;;  %5148 = vtanh.f32 %v1708_v41 }
 0x19c   : > { %2097 = vadd.xlane.f32.xlu1 %v2096_v39  ;;  %5150 = vtanh.f32 %v6245_v3 }
 0x19d   : > { %2094 = vadd.xlane.f32.xlu0 %v2093_v49  ;;  %v2182_v29 = vpop.xlane.xlu1 %2181  ;;  %v2526_v49 = vadd.s32 4294967264, %v6211_v19 }
 0x19e   : > { %v2854_v27 = vrot.slane %v2182_v29, %v6248_v31  ;;  %v1990_v7 = vpop.xlane.xlu0 %1989  ;;  %v5139_v29 = vpop.eup %5138 }
 0x19f   : > { %v2509_v56 = vrot.slane %v1990_v7, %v6248_v31  ;;  %v1904_v41 = vmul.f32 %v6161_v50, %v5139_v29  ;;  %v1897_v29 = vmul.f32 %v6161_v50, %v5137_v37 }
 0x1a0   : > { %v2855_v1 = vsel %vm2510_vm1, %v2854_v27, %v2850_v32  ;;  %2115 = vadd.xlane.f32.xlu1 %v2114_v53  ;;  %v5141_v32 = vpop.eup %5140  ;;  %v7695_v27 = vld [vmem:[#allocation12_spill] sm:$0xff]  ;;  %v2540_v53 = vadd.s32 4294967248, %v6211_v19 }
 0x1a1   : > { %v2860_v59 = vsel %vm2517_vm2, %v2859_v5, %v2855_v1  ;;  %v2511_v17 = vsel %vm2510_vm1, %v2509_v56, %v2504_v48  ;;  %2295 = vadd.xlane.f32.xlu0 %v2294_v35  ;;  %v6283_v38 = vpop.xlane.xlu1 %2007  ;;  %v2288_v35 = vsel %vm7661_vm0, %v1958_v47, 0.0  ;;  %v1699_v7 = vadd.f32 %v5969_v26, %v7695_v27  ;;  %v5143_v48 = vpop.eup %5142 }
 0x1a2   : > { %v2518_v36 = vsel %vm2517_vm2, %v2516_v62, %v2511_v17  ;;  %v6287_v11 = vpop.xlane.xlu0 %2004  ;;  %v6293_v54 = vsel %vm2524_vm3, %v2864_v52, %v2860_v59  ;;  %v2315_v5 = vsel %vm7661_vm0, %v1967_v8, 0.0  ;;  %v1706_v47 = vadd.f32 %v6144_v28, %v6019_v14  ;;  %v5145_v52 = vpop.eup %5144 }
 0x1a3   : > { %v2525_v39 = vsel %vm2524_vm3, %v2523_v40, %v2518_v36  ;;  %v6312_v62 = vsub.s32 %v2533_v9, %v7693_v63  ;;  %v6315_v26 = vrot.slane %v1552_v34, %v5643_v13  ;;  %v6319_v1 = vsub.s32 %v2526_v49, %v7693_v63 }
 0x1a4   : > { %2109 = vadd.xlane.f32.xlu1 %v2108_v44  ;;  %v1640_v40 = vadd.f32 %v7696_v6, %v5982_v10  ;;  %v2111_v14 = vsel %vm7661_vm0, %v1899_v21, 0.0  ;;  %v1963_v59 = vmul.f32 %v6161_v50, %v5141_v32  ;;  %5152 = vtanh.f32 %v1699_v7 }
 0x1a5   : > { %2289 = vadd.xlane.f32.xlu0 %v2288_v35  ;;  %v6304_v61 = vpop.xlane.xlu1 %2199  ;;  %v6327_v17 = vsub.s32 %v2540_v53, %v7693_v63  ;;  %v6330_v8 = vsub.s32 %v2547_v15, %v7693_v63  ;;  %5154 = vtanh.f32 %v1706_v47  ;;  %v1645_v10 = vadd.f32 %v6026_v0, %v6315_v26  ;;  %v5147_v35 = vpop.eup %5146 }
 0x1a6   : > { %v6309_v56 = vpop.xlane.xlu0 %2196  ;;  %v2126_v34 = vsel %vm7661_vm0, %v1904_v41, 0.0  ;;  %v1968_v44 = vmul.f32 %v6161_v50, %v5143_v48  ;;  %5156 = vtanh.f32 %v1640_v40  ;;  %v2303_v49 = vsel %vm7661_vm0, %v1963_v59, 0.0  ;;  %v5149_v7 = vpop.eup %5148 }
 0x1a7   : > { %v2544_v21 = vrot.slane %v6287_v11, %v6327_v17  ;;  %v1643_v27 = vadd.f32 %v6315_v26, %v6032_v4  ;;  %v2551_v53 = vrot.slane %v6283_v38, %v6330_v8  ;;  %5158 = vtanh.f32 %v1645_v10  ;;  %v5151_v40 = vpop.eup %5150 }
 0x1a8   : > { %2316 = vadd.xlane.f32.xlu1 %v2315_v5  ;;  %v2318_v48 = vsel %vm7661_vm0, %v1968_v44, 0.0  ;;  %v1902_v47 = vmul.f32 %v6161_v50, %v5145_v52  ;;  %v2105_v4 = vsel %vm7661_vm0, %v1897_v29, 0.0  ;;  %v1712_v38 = vadd.f32 %v6045_v2, %v6144_v28 }
 0x1a9   : > { %2112 = vadd.xlane.f32.xlu0 %v2111_v14  ;;  %v2002_v3 = vpop.xlane.xlu1 %2001  ;;  %v1961_v41 = vmul.f32 %v6161_v50, %v5147_v35  ;;  %5160 = vtanh.f32 %v5996_v18  ;;  %v2879_v14 = vrot.slane %v6309_v56, %v6327_v17  ;;  %v2884_v2 = vrot.slane %v6304_v61, %v6330_v8 }
 0x1aa   : > { %v1999_v36 = vpop.xlane.xlu0 %1998  ;;  %v2537_v9 = vrot.slane %v2002_v3, %v6312_v62  ;;  %v1971_v3 = vmul.f32 %v6161_v50, %v5149_v7  ;;  %5162 = vtanh.f32 %v1643_v27  ;;  %v2120_v56 = vsel %vm7661_vm0, %v1902_v47, 0.0 }
 0x1ab   : > { %v2530_v16 = vrot.slane %v1999_v36, %v6319_v1  ;;  %5164 = vtanh.f32 %v1712_v38  ;;  %v2297_v44 = vsel %vm7661_vm0, %v1961_v41, 0.0  ;;  %v1964_v61 = vmul.f32 %v6161_v50, %v5151_v40 }
 0x1ac   : > { %2127 = vadd.xlane.f32.xlu1 %v2126_v34  ;;  %v2568_v29 = vadd.s32 4294967216, %v6211_v19  ;;  %v1710_v27 = vadd.f32 %v6144_v28, %v6051_v24  ;;  %v7698_v24 = vld [vmem:[#allocation15_spill] sm:$0xff] }
 0x1ad   : > { %v2532_v0 = vsel %vm2531_vm4, %v2530_v16, %v2525_v39  ;;  %2304 = vadd.xlane.f32.xlu0 %v2303_v49  ;;  %v2194_v32 = vpop.xlane.xlu1 %2193  ;;  %v2554_v16 = vadd.s32 4294967232, %v6211_v19  ;;  %v1644_v47 = vadd.f32 %v7698_v24, %v6315_v26 }
 0x1ae   : > { %v2539_v15 = vsel %vm2538_vm5, %v2537_v9, %v2532_v0  ;;  %v2191_v37 = vpop.xlane.xlu0 %2190  ;;  %v2874_v5 = vrot.slane %v2194_v32, %v6312_v62  ;;  %v5153_v18 = vpop.eup %5152  ;;  %v2575_v32 = vadd.s32 4294967208, %v6211_v19  ;;  %v6405_v41 = vsub.s32 %v2568_v29, %v7693_v63 }
 0x1af   : > { %v2546_v11 = vsel %vm2545_vm6, %v2544_v21, %v2539_v15  ;;  %v2869_v39 = vrot.slane %v2191_v37, %v6319_v1  ;;  %v5155_v34 = vpop.eup %5154  ;;  %v2327_v21 = vsel %vm7661_vm0, %v1971_v3, 0.0  ;;  %v6391_v15 = vsub.s32 %v2554_v16, %v7693_v63  ;;  %v7700_v3 = vld [vmem:[#allocation22_spill] sm:$0xff] }
 0x1b0   : > { %2319 = vadd.xlane.f32.xlu1 %v2318_v48  ;;  %v6358_v6 = vsel %vm2552_vm7, %v2551_v53, %v2546_v11  ;;  %v5157_v0 = vpop.eup %5156  ;;  %v7697_v53 = vld [vmem:[#allocation14_spill] sm:$0xff]  ;;  %v1969_v37 = vmul.f32 %v6161_v50, %v5155_v34  ;;  %v1962_v48 = vmul.f32 %v6161_v50, %v5153_v18 }
 0x1b1   : > { %v2870_v52 = vsel %vm2531_vm4, %v2869_v39, %v6293_v54  ;;  %2106 = vadd.xlane.f32.xlu0 %v2105_v4  ;;  %v6365_v59 = vpop.xlane.xlu1 %2019  ;;  %v2561_v54 = vadd.s32 4294967224, %v6211_v19  ;;  %5166 = vtanh.f32 %v7697_v53  ;;  %v2306_v39 = vsel %vm7661_vm0, %v1964_v61, 0.0  ;;  %v7699_v4 = vld [vmem:[#allocation16_spill] sm:$0xff] }
 0x1b2   : > { %v2875_v36 = vsel %vm2538_vm5, %v2874_v5, %v2870_v52  ;;  %v6371_v9 = vpop.xlane.xlu0 %2016  ;;  %v5159_v5 = vpop.eup %5158  ;;  %5168 = vtanh.f32 %v6003_v20  ;;  %v1642_v38 = vadd.f32 %v6315_v26, %v7699_v4  ;;  %v1649_v20 = vadd.f32 %v7700_v3, %v6315_v26 }
 0x1b3   : > { %v2880_v10 = vsel %vm2545_vm6, %v2879_v14, %v2875_v36  ;;  %v6395_v11 = vsub.s32 %v2561_v54, %v7693_v63  ;;  %v6408_v14 = vsub.s32 %v2575_v32, %v7693_v63  ;;  %5170 = vtanh.f32 %v1710_v27  ;;  %v7701_v32 = vld [vmem:[#allocation21_spill] sm:$0xff] }
 0x1b4   : > { %2121 = vadd.xlane.f32.xlu1 %v2120_v56  ;;  %v6380_v49 = vsel %vm2552_vm7, %v2884_v2, %v2880_v10  ;;  %v5161_v2 = vpop.eup %5160  ;;  %v2321_v18 = vsel %vm7661_vm0, %v1969_v37, 0.0  ;;  %v1908_v10 = vmul.f32 %v6161_v50, %v5159_v5  ;;  %v2300_v16 = vsel %vm7661_vm0, %v1962_v48, 0.0 }
 0x1b5   : > { %2298 = vadd.xlane.f32.xlu0 %v2297_v44  ;;  %v2014_v35 = vpop.xlane.xlu1 %2013  ;;  %v5163_v56 = vpop.eup %5162  ;;  %v1903_v34 = vmul.f32 %v6161_v50, %v5157_v0  ;;  %5172 = vtanh.f32 %v1644_v47  ;;  %v2572_v44 = vrot.slane %v6371_v9, %v6405_v41  ;;  %v1713_v27 = vadd.f32 %v7701_v32, %v6144_v28 }
 0x1b6   : > { %v6387_v7 = vpop.xlane.xlu0 %2208  ;;  %v2565_v54 = vrot.slane %v2014_v35, %v6395_v11  ;;  %v2579_v35 = vrot.slane %v6365_v59, %v6408_v14  ;;  %5174 = vtanh.f32 %v1649_v20  ;;  %v2138_v37 = vsel %vm7661_vm0, %v1908_v10, 0.0  ;;  %v7702_v20 = vld [vmem:[#allocation17_spill] sm:$0xff] }
 0x1b7   : > { %v2123_v48 = vsel %vm7661_vm0, %v1903_v34, 0.0  ;;  %v1901_v59 = vmul.f32 %v6161_v50, %v5161_v2  ;;  %v2899_v4 = vrot.slane %v6387_v7, %v6405_v41  ;;  %5176 = vtanh.f32 %v1713_v27  ;;  %v7703_v27 = vld [vmem:[#allocation18_spill] sm:$0xff] }
 0x1b8   : > { %2328 = vadd.xlane.f32.xlu1 %v2327_v21  ;;  %v5165_v21 = vpop.eup %5164  ;;  %5178 = vtanh.f32 %v1642_v38 }
 0x1b9   : > { %2307 = vadd.xlane.f32.xlu0 %v2306_v39  ;;  %v2206_v40 = vpop.xlane.xlu1 %2205  ;;  %v2117_v34 = vsel %vm7661_vm0, %v1901_v59, 0.0  ;;  %v2596_v59 = vadd.s32 4294967184, %v6211_v19 }
 0x1ba   : > { %v2011_v52 = vpop.xlane.xlu0 %2010  ;;  %v2894_v39 = vrot.slane %v2206_v40, %v6395_v11  ;;  %v1975_v40 = vmul.f32 %v6161_v50, %v5165_v21 }
 0x1bb   : > { %v2558_v36 = vrot.slane %v2011_v52, %v6391_v15  ;;  %v5167_v47 = vpop.eup %5166 }
 0x1bc   : > { %2322 = vadd.xlane.f32.xlu1 %v2321_v18  ;;  %v1647_v18 = vadd.f32 %v6315_v26, %v6063_v22  ;;  %v2339_v21 = vsel %vm7661_vm0, %v1975_v40, 0.0 }
 0x1bd   : > { %v2560_v61 = vsel %vm2559_vm8, %v2558_v36, %v6358_v6  ;;  %2301 = vadd.xlane.f32.xlu0 %v2300_v16  ;;  %v6422_v29 = vpop.xlane.xlu1 %2031  ;;  %v1906_v6 = vmul.f32 %v6161_v50, %v5163_v56  ;;  %v1709_v36 = vadd.f32 %v7702_v20, %v6144_v28  ;;  %v5169_v56 = vpop.eup %5168 }
 0x1be   : > { %v2567_v0 = vsel %vm2566_vm9, %v2565_v54, %v2560_v61  ;;  %v2203_v53 = vpop.xlane.xlu0 %2202  ;;  %v5171_v16 = vpop.eup %5170  ;;  %v1965_v61 = vmul.f32 %v6161_v50, %v5167_v47  ;;  %5180 = vtanh.f32 %v1647_v18 }
 0x1bf   : > { %v2889_v9 = vrot.slane %v2203_v53, %v6391_v15  ;;  %v2574_v5 = vsel %vm2573_vm10, %v2572_v44, %v2567_v0  ;;  %v2132_v54 = vsel %vm7661_vm0, %v1906_v6, 0.0  ;;  %v1716_v44 = vadd.f32 %v6073_v25, %v6144_v28  ;;  %v5173_v32 = vpop.eup %5172 }
 0x1c0   : > { %2139 = vadd.xlane.f32.xlu1 %v2138_v37  ;;  %v6437_v24 = vsel %vm2580_vm11, %v2579_v35, %v2574_v5  ;;  %5182 = vtanh.f32 %v1709_v36  ;;  %v1707_v0 = vadd.f32 %v6144_v28, %v7703_v27  ;;  %v1973_v25 = vmul.f32 %v6161_v50, %v5171_v16 }
 0x1c1   : > { %v2890_v52 = vsel %vm2559_vm8, %v2889_v9, %v6380_v49  ;;  %2124 = vadd.xlane.f32.xlu0 %v2123_v48  ;;  %v6443_v3 = vpop.xlane.xlu1 %2025  ;;  %v2582_v53 = vadd.s32 4294967200, %v6211_v19  ;;  %v5175_v9 = vpop.eup %5174  ;;  %v2589_v37 = vadd.s32 4294967192, %v6211_v19  ;;  %5184 = vtanh.f32 %v1716_v44 }
 0x1c2   : > { %v2895_v2 = vsel %vm2566_vm9, %v2894_v39, %v2890_v52  ;;  %v2212_v10 = vpop.xlane.xlu0 %2211  ;;  %v2309_v6 = vsel %vm7661_vm0, %v1965_v61, 0.0  ;;  %v1966_v5 = vmul.f32 %v6161_v50, %v5169_v56  ;;  %v7704_v39 = vld [vmem:[#allocation19_spill] sm:$0xff]  ;;  %v1714_v52 = vadd.f32 %v6144_v28, %v6079_v23  ;;  %v5177_v18 = vpop.eup %5176 }
 0x1c3   : > { %v2900_v7 = vsel %vm2573_vm10, %v2899_v4, %v2895_v2  ;;  %v2904_v49 = vrot.slane %v2212_v10, %v6408_v14  ;;  %v1648_v48 = vadd.f32 %v7704_v39, %v6315_v26  ;;  %v2603_v4 = vadd.s32 4294967176, %v6211_v19  ;;  %v5179_v23 = vpop.eup %5178 }
 0x1c4   : > { %2133 = vadd.xlane.f32.xlu1 %v2132_v54  ;;  %5186 = vtanh.f32 %v1707_v0  ;;  %v2333_v20 = vsel %vm7661_vm0, %v1973_v25, 0.0  ;;  %v6485_v36 = vsub.s32 %v2582_v53, %v7693_v63  ;;  %v1912_v2 = vmul.f32 %v6161_v50, %v5175_v9 }
 0x1c5   : > { %v6459_v22 = vsel %vm2580_vm11, %v2904_v49, %v2900_v7  ;;  %2118 = vadd.xlane.f32.xlu0 %v2117_v34  ;;  %v6461_v38 = vpop.xlane.xlu1 %2043  ;;  %v6489_v10 = vsub.s32 %v2589_v37, %v7693_v63  ;;  %v2312_v56 = vsel %vm7661_vm0, %v1966_v5, 0.0  ;;  %v1907_v19 = vmul.f32 %v6161_v50, %v5173_v32  ;;  %v7706_v7 = vld [vmem:[#allocation20_spill] sm:$0xff] }
 0x1c6   : > { %v6464_v35 = vpop.xlane.xlu0 %2028  ;;  %5188 = vtanh.f32 %v1648_v48  ;;  %v1646_v49 = vadd.f32 %v6315_v26, %v7706_v7  ;;  %v6496_v54 = vsub.s32 %v2596_v59, %v7693_v63  ;;  %v6501_v34 = vsub.s32 %v2603_v4, %v7693_v63 }
 0x1c7   : > { %7705 = vst [vmem:[#allocation11_spill] sm:$0xff] %v6489_v10  ;;  %5190 = vtanh.f32 %v1714_v52  ;;  %v1653_v61 = vadd.f32 %v6085_v58, %v6315_v26  ;;  %v2150_v32 = vsel %vm7661_vm0, %v1912_v2, 0.0  ;;  %v1976_v27 = vmul.f32 %v6161_v50, %v5177_v18 }
 0x1c8   : > { %2340 = vadd.xlane.f32.xlu1 %v2339_v21  ;;  %7707 = vst [vmem:[#allocation10_spill] sm:$0xff] %v6496_v54  ;;  %v5181_v0 = vpop.eup %5180  ;;  %v2593_v25 = vrot.slane %v6443_v3, %v6489_v10  ;;  %v2135_v53 = vsel %vm7661_vm0, %v1907_v19, 0.0  ;;  %v1905_v9 = vmul.f32 %v6161_v50, %v5179_v23  ;;  %v1711_v58 = vadd.f32 %v6144_v28, %v6061_v12 }
 0x1c9   : > { %2310 = vadd.xlane.f32.xlu0 %v2309_v6  ;;  %v6476_v47 = vpop.xlane.xlu1 %2235  ;;  %v2600_v6 = vrot.slane %v6464_v35, %v6496_v54  ;;  %v2607_v48 = vrot.slane %v6422_v29, %v6501_v34  ;;  %v1717_v59 = vadd.f32 %v6083_v45, %v6144_v28  ;;  %5192 = vtanh.f32 %v1653_v61 }
 0x1ca   : > { %v6481_v40 = vpop.xlane.xlu0 %2220  ;;  %v5183_v37 = vpop.eup %5182  ;;  %5194 = vtanh.f32 %v1646_v49  ;;  %v2342_v52 = vsel %vm7661_vm0, %v1976_v27, 0.0  ;;  %v2129_v2 = vsel %vm7661_vm0, %v1905_v9, 0.0  ;;  %v1651_v19 = vadd.f32 %v6315_v26, %v6090_v46  ;;  %v7708_v49 = vld [vmem:[#allocation23_spill] sm:$0xff] }
 0x1cb   : > { %v5185_v3 = vpop.eup %5184  ;;  %v1972_v29 = vmul.f32 %v6161_v50, %v5183_v37  ;;  %5196 = vtanh.f32 %v1717_v59  ;;  %v7710_v37 = vld [vmem:[#allocation24_spill] sm:$0xff] }
 0x1cc   : > { %2334 = vadd.xlane.f32.xlu1 %v2333_v20  ;;  %5198 = vtanh.f32 %v1711_v58  ;;  %v1650_v58 = vadd.f32 %v6315_v26, %v7710_v37 }
 0x1cd   : > { %2313 = vadd.xlane.f32.xlu0 %v2312_v56  ;;  %v6498_v16 = vpop.xlane.xlu1 %2037  ;;  %v1979_v56 = vmul.f32 %v6161_v50, %v5185_v3  ;;  %v2330_v27 = vsel %vm7661_vm0, %v1972_v29, 0.0  ;;  %5200 = vtanh.f32 %v1651_v19  ;;  %v1718_v3 = vadd.f32 %v6144_v28, %v6107_v30  ;;  %v7711_v30 = vld [vmem:[#allocation26_spill] sm:$0xff] }
 0x1ce   : > { %v2023_v44 = vpop.xlane.xlu0 %2022  ;;  %v5187_v45 = vpop.eup %5186 }
 0x1cf   : > { %v2586_v21 = vrot.slane %v2023_v44, %v6485_v36  ;;  %v1652_v44 = vadd.f32 %v7708_v49, %v6315_v26  ;;  %v2351_v46 = vsel %vm7661_vm0, %v1979_v56, 0.0 }
 0x1d0   : > { %2151 = vadd.xlane.f32.xlu1 %v2150_v32  ;;  %v5189_v7 = vpop.eup %5188 }
 0x1d1   : > { %v2588_v5 = vsel %vm2587_vm12, %v2586_v21, %v6437_v24  ;;  %2136 = vadd.xlane.f32.xlu0 %v2135_v53  ;;  %v6518_v39 = vpop.xlane.xlu1 %2229  ;;  %v1910_v24 = vmul.f32 %v6161_v50, %v5181_v0  ;;  %v5191_v21 = vpop.eup %5190  ;;  %v1970_v0 = vmul.f32 %v6161_v50, %v5187_v45  ;;  %v7709_v53 = vld [vmem:[#allocation25_spill] sm:$0xff]  ;;  %5202 = vtanh.f32 %v1652_v44 }
 0x1d2   : > { %v2595_v4 = vsel %vm2594_vm13, %v2593_v25, %v2588_v5  ;;  %v2215_v12 = vpop.xlane.xlu0 %2214  ;;  %v1715_v9 = vadd.f32 %v6144_v28, %v7709_v53  ;;  %v1656_v28 = vadd.f32 %v7711_v30, %v6315_v26 }
 0x1d3   : > { %v2602_v35 = vsel %vm2601_vm14, %v2600_v6, %v2595_v4  ;;  %v2144_v61 = vsel %vm7661_vm0, %v1910_v24, 0.0  ;;  %v2909_v32 = vrot.slane %v2215_v12, %v6485_v36  ;;  %v5193_v59 = vpop.eup %5192  ;;  %v2919_v4 = vrot.slane %v6481_v40, %v6496_v54 }
 0x1d4   : > { %v6529_v20 = vsel %vm2608_vm15, %v2607_v48, %v2602_v35  ;;  %2343 = vadd.xlane.f32.xlu1 %v2342_v52  ;;  %v1977_v48 = vmul.f32 %v6161_v50, %v5191_v21  ;;  %v2324_v35 = vsel %vm7661_vm0, %v1970_v0, 0.0  ;;  %v1911_v52 = vmul.f32 %v6161_v50, %v5189_v7  ;;  %v5195_v24 = vpop.eup %5194 }
 0x1d5   : > { %2130 = vadd.xlane.f32.xlu0 %v2129_v2  ;;  %v6533_v18 = vpop.xlane.xlu1 %2244  ;;  %v2910_v12 = vsel %vm2587_vm12, %v2909_v32, %v6459_v22  ;;  %5204 = vtanh.f32 %v1715_v9  ;;  %v1916_v56 = vmul.f32 %v6161_v50, %v5193_v59  ;;  %v5197_v19 = vpop.eup %5196  ;;  %v1909_v49 = vmul.f32 %v6161_v50, %v5195_v24 }
 0x1d6   : > { %v6538_v23 = vpop.xlane.xlu0 %2223  ;;  %5206 = vtanh.f32 %v1650_v58  ;;  %v2345_v22 = vsel %vm7661_vm0, %v1977_v48, 0.0  ;;  %v2147_v7 = vsel %vm7661_vm0, %v1911_v52, 0.0  ;;  %v5199_v44 = vpop.eup %5198  ;;  %v1657_v32 = vadd.f32 %v6114_v42, %v6315_v26 }
 0x1d7   : > { %5208 = vtanh.f32 %v1718_v3  ;;  %v1980_v53 = vmul.f32 %v6161_v50, %v5197_v19  ;;  %v5201_v9 = vpop.eup %5200  ;;  %v2141_v37 = vsel %vm7661_vm0, %v1909_v49, 0.0  ;;  %v1974_v58 = vmul.f32 %v6161_v50, %v5199_v44  ;;  %v7713_v3 = vld [vmem:[#allocation28_spill] sm:$0xff] }
 0x1d8   : > { %2145 = vadd.xlane.f32.xlu1 %v2144_v61  ;;  %5210 = vtanh.f32 %v1656_v28  ;;  %v1655_v42 = vadd.f32 %v6315_v26, %v7713_v3 }
 0x1d9   : > { %2331 = vadd.xlane.f32.xlu0 %v2330_v27  ;;  %v6546_v25 = vpop.xlane.xlu1 %2238  ;;  %v7712_v27 = vld [vmem:[#allocation27_spill] sm:$0xff]  ;;  %5212 = vtanh.f32 %v1657_v32  ;;  %v2354_v59 = vsel %vm7661_vm0, %v1980_v53, 0.0 }
 0x1da   : > { %v2218_v6 = vpop.xlane.xlu0 %2217  ;;  %v1654_v0 = vadd.f32 %v6315_v26, %v7712_v27 }
 0x1db   : > { %v2914_v5 = vrot.slane %v2218_v6, %v6489_v10  ;;  %v5203_v6 = vpop.eup %5202 }
 0x1dc   : > { %2352 = vadd.xlane.f32.xlu1 %v2351_v46  ;;  %v2162_v46 = vsel %vm7661_vm0, %v1916_v56, 0.0  ;;  %5214 = vtanh.f32 %v1654_v0  ;;  %v1915_v52 = vmul.f32 %v6161_v50, %v5203_v6 }
 0x1dd   : > { %v2915_v2 = vsel %vm2594_vm13, %v2914_v5, %v2910_v12  ;;  %2325 = vadd.xlane.f32.xlu0 %v2324_v35  ;;  %v6564_v29 = vpop.xlane.xlu1 %2055  ;;  %v2336_v35 = vsel %vm7661_vm0, %v1974_v58, 0.0  ;;  %5216 = vtanh.f32 %v1655_v42 }
 0x1de   : > { %v6569_v40 = vsel %vm2601_vm14, %v2919_v4, %v2915_v2  ;;  %v6571_v45 = vpop.xlane.xlu0 %2040  ;;  %v1914_v4 = vmul.f32 %v6161_v50, %v5201_v9  ;;  %5218 = vtanh.f32 %v6165_v33  ;;  %v2159_v19 = vsel %vm7661_vm0, %v1915_v52, 0.0 }
 0x1df   : > { %v5205_v12 = vpop.eup %5204  ;;  %5220 = vtanh.f32 %v6154_v51  ;;  %v2617_v51 = vrot.slane %v6498_v16, %v6248_v31 }
 0x1e0   : > { %2346 = vadd.xlane.f32.xlu1 %v2345_v22  ;;  %v5207_v24 = vpop.eup %5206  ;;  %v2156_v22 = vsel %vm7661_vm0, %v1914_v4, 0.0  ;;  %v1978_v56 = vmul.f32 %v6161_v50, %v5205_v12  ;;  %5222 = vtanh.f32 %v6149_v60  ;;  %v2622_v12 = vrot.slane %v6571_v45, %v6252_v43 }
 0x1e1   : > { %2148 = vadd.xlane.f32.xlu0 %v2147_v7  ;;  %v6577_v61 = vpop.xlane.xlu1 %2049  ;;  %v5209_v30 = vpop.eup %5208  ;;  %v1913_v7 = vmul.f32 %v6161_v50, %v5207_v24 }
 0x1e2   : > { %v6579_v21 = vpop.xlane.xlu0 %2232  ;;  %v5211_v26 = vpop.eup %5210  ;;  %v1981_v44 = vmul.f32 %v6161_v50, %v5209_v30  ;;  %v2348_v33 = vsel %vm7661_vm0, %v1978_v56, 0.0  ;;  %v2627_v56 = vrot.slane %v6461_v38, %v6260_v55  ;;  %v2637_v38 = vrot.slane %v6577_v61, %v6312_v62 }
 0x1e3   : > { %v1919_v27 = vmul.f32 %v6161_v50, %v5211_v26  ;;  %v5213_v0 = vpop.eup %5212  ;;  %v2153_v53 = vsel %vm7661_vm0, %v1913_v7, 0.0  ;;  %v5229_v26 = vld [vmem:[%s7654_s4] ss:$0 sm:$0xff] }
 0x1e4   : > { %2163 = vadd.xlane.f32.xlu1 %v2162_v46  ;;  %v2357_v58 = vsel %vm7661_vm0, %v1981_v44, 0.0  ;;  %v1920_v3 = vmul.f32 %v6161_v50, %v5213_v0 }
 0x1e5   : > { %2142 = vadd.xlane.f32.xlu0 %v2141_v37  ;;  %v6589_v5 = vpop.xlane.xlu1 %2256  ;;  %v2171_v60 = vsel %vm7661_vm0, %v1919_v27, 0.0 }
 0x1e6   : > { %v2035_v48 = vpop.xlane.xlu0 %2034  ;;  %v5215_v9 = vpop.eup %5214  ;;  %v2174_v30 = vsel %vm7661_vm0, %v1920_v3, 0.0 }
 0x1e7   : > { %v2613_v46 = vrot.slane %v2035_v48, %v6256_v57  ;;  %v5217_v42 = vpop.eup %5216 }
 0x1e8   : > { %2355 = vadd.xlane.f32.xlu1 %v2354_v59  ;;  %v1917_v59 = vmul.f32 %v6161_v50, %v5215_v9  ;;  %v5219_v4 = vpop.eup %5218 }
 0x1e9   : > { %2337 = vadd.xlane.f32.xlu0 %v2336_v35  ;;  %v6597_v2 = vpop.xlane.xlu1 %2250  ;;  %v2618_v48 = vsel %vm2510_vm1, %v2617_v51, %v2613_v46  ;;  %v5221_v50 = vpop.eup %5220 }
 0x1ea   : > { %v6599_v28 = vpop.xlane.xlu0 %2226  ;;  %v2623_v16 = vsel %vm2517_vm2, %v2622_v12, %v2618_v48  ;;  %v2165_v45 = vsel %vm7661_vm0, %v1917_v59, 0.0  ;;  %v5223_v7 = vpop.eup %5222 }
 0x1eb   : > { %v2628_v27 = vsel %vm2524_vm3, %v2627_v56, %v2623_v16 }
 0x1ec   : > { %2157 = vadd.xlane.f32.xlu1 %v2156_v22  ;;  %v1918_v22 = vmul.f32 %v5229_v26, %v5217_v42 }
 0x1ed   : > { %2160 = vadd.xlane.f32.xlu0 %v2159_v19  ;;  %v6606_v49 = vpop.xlane.xlu1 %2067  ;;  %v1982_v19 = vmul.f32 %v5229_v26, %v5219_v4  ;;  %v2647_v4 = vrot.slane %v6564_v29, %v6330_v8 }
 0x1ee   : > { %v2053_v32 = vpop.xlane.xlu0 %2052  ;;  %v2168_v46 = vsel %vm7661_vm0, %v1918_v22, 0.0  ;;  %v2667_v29 = vrot.slane %v6606_v49, %v6408_v14 }
 0x1ef   : > { %v2360_v9 = vsel %vm7661_vm0, %v1982_v19, 0.0  ;;  %v2642_v3 = vrot.slane %v2053_v32, %v6327_v17 }
 0x1f0   : > { %2349 = vadd.xlane.f32.xlu1 %v2348_v33 }
 0x1f1   : > { %2154 = vadd.xlane.f32.xlu0 %v2153_v53  ;;  %v6615_v37 = vpop.xlane.xlu1 %2259  ;;  %v1984_v53 = vmul.f32 %v5229_v26, %v5221_v50 }
 0x1f2   : > { %v2047_v6 = vpop.xlane.xlu0 %2046 }
 0x1f3   : > { %v2632_v24 = vrot.slane %v2047_v6, %v6319_v1  ;;  %v2366_v42 = vsel %vm7661_vm0, %v1984_v53, 0.0 }
 0x1f4   : > { %2358 = vadd.xlane.f32.xlu1 %v2357_v58  ;;  %v1983_v58 = vmul.f32 %v5229_v26, %v5223_v7 }
 0x1f5   : > { %2172 = vadd.xlane.f32.xlu0 %v2171_v60  ;;  %v2062_v35 = vpop.xlane.xlu1 %2061  ;;  %v2633_v0 = vsel %vm2531_vm4, %v2632_v24, %v2628_v27 }
 0x1f6   : > { %v6626_v52 = vpop.xlane.xlu0 %2247  ;;  %v2638_v6 = vsel %vm2538_vm5, %v2637_v38, %v2633_v0  ;;  %v2363_v48 = vsel %vm7661_vm0, %v1983_v58, 0.0  ;;  %v2657_v24 = vrot.slane %v2062_v35, %v6395_v11  ;;  %vm3163_vm0 = vcmask 1041409  }
 0x1f7   : > { %v2643_v61 = vsel %vm2545_vm6, %v2642_v3, %v2638_v6 }
 0x1f8   : > { %2175 = vadd.xlane.f32.xlu1 %v2174_v30  ;;  %v2648_v32 = vsel %vm2552_vm7, %v2647_v4, %v2643_v61 }
 0x1f9   : > { %2166 = vadd.xlane.f32.xlu0 %v2165_v45  ;;  %v6637_v44 = vpop.xlane.xlu1 %2253 }
 0x1fa   : > { %v6640_v33 = vpop.xlane.xlu0 %2241 }
 0x1fc   : > { %2169 = vadd.xlane.f32.xlu1 %v2168_v46 }
 0x1fd   : > { %2361 = vadd.xlane.f32.xlu0 %v2360_v9  ;;  %v6647_v51 = vpop.xlane.xlu1 %2268 }
 0x1fe   : > { %7714 = vst [vmem:[#allocation12_spill] sm:$0xff] %v6647_v51  ;;  %v2065_v60 = vpop.xlane.xlu0 %2064 }
 0x1ff   : > { %v2662_v56 = vrot.slane %v2065_v60, %v6405_v41 }
 0x200   : > { %2367 = vadd.xlane.f32.xlu1 %v2366_v42 }
 0x201   : > { %2364 = vadd.xlane.f32.xlu0 %v2363_v48  ;;  %v6654_v59 = vpop.xlane.xlu1 %2262 }
 0x202   : > { %v2059_v12 = vpop.xlane.xlu0 %2058 }
 0x203   : > { %v2652_v16 = vrot.slane %v2059_v12, %v6391_v15 }
 0x205   : > { %v2653_v30 = vsel %vm2559_vm8, %v2652_v16, %v2648_v32  ;;  %v2080_v26 = vpop.xlane.xlu1 %2079 }
 0x206   : > { %v2658_v22 = vsel %vm2566_vm9, %v2657_v24, %v2653_v30  ;;  %v2077_v50 = vpop.xlane.xlu0 %2076  ;;  %v2687_v9 = vrot.slane %v2080_v26, %v6501_v34 }
 0x207   : > { %v2663_v45 = vsel %vm2573_vm10, %v2662_v56, %v2658_v22  ;;  %v2682_v46 = vrot.slane %v2077_v50, %v6496_v54 }
 0x208   : > { %v2668_v0 = vsel %vm2580_vm11, %v2667_v29, %v2663_v45 }
 0x209   : > { %v2074_v19 = vpop.xlane.xlu1 %2073 }
 0x20a   : > { %v2071_v7 = vpop.xlane.xlu0 %2070  ;;  %v2677_v27 = vrot.slane %v2074_v19, %v6489_v10 }
 0x20b   : > { %v2672_v35 = vrot.slane %v2071_v7, %v6485_v36 }
 0x20d   : > { %v2673_v53 = vsel %vm2587_vm12, %v2672_v35, %v2668_v0  ;;  %v6672_v38 = vpop.xlane.xlu1 %2265 }
 0x20e   : > { %7715 = vst [vmem:[#allocation13_spill] sm:$0xff] %v6672_v38  ;;  %v2678_v58 = vsel %vm2594_vm13, %v2677_v27, %v2673_v53  ;;  %v6676_v6 = vpop.xlane.xlu0 %2271  ;;  %v2933_v38 = vrot.slane %v6518_v39, %v6248_v31 }
 0x20f   : > { %7716 = vst [vmem:[#allocation14_spill] sm:$0xff] %v6676_v6  ;;  %v2683_v49 = vsel %vm2601_vm14, %v2682_v46, %v2678_v58 }
 0x210   : > { %v2688_v60 = vsel %vm2608_vm15, %v2687_v9, %v2683_v49 }
 0x211   : > { %v6682_v3 = vsel %vm3163_vm0, %v2688_v60, %v6529_v20  ;;  %v6684_v42 = vpop.xlane.xlu1 %2274 }
 0x212   : > { %7717 = vst [vmem:[#allocation15_spill] sm:$0xff] %v6682_v3  ;;  %v2089_v48 = vpop.xlane.xlu0 %2088 }
 0x215   : > { %v6686_v61 = vpop.xlane.xlu1 %2091 }
 0x216   : > { %v6688_v4 = vpop.xlane.xlu0 %2280 }
 0x219   : > { %v2086_v12 = vpop.xlane.xlu1 %2085 }
 0x21a   : > { %v2083_v16 = vpop.xlane.xlu0 %2082 }
 0x21d   : > { %v6690_v24 = vpop.xlane.xlu1 %2292 }
 0x21e   : > { %v6692_v32 = vpop.xlane.xlu0 %2283 }
 0x221   : > { %v6694_v30 = vpop.xlane.xlu1 %2286 }
 0x222   : > { %v6696_v26 = vpop.xlane.xlu0 %2277 }
 0x225   : > { %v6698_v22 = vpop.xlane.xlu1 %2103 }
 0x226   : > { %v6700_v20 = vpop.xlane.xlu0 %2100 }
 0x229   : > { %v6702_v50 = vpop.xlane.xlu1 %2097 }
 0x22a   : > { %v2095_v56 = vpop.xlane.xlu0 %2094 }
 0x22d   : > { %v6704_v45 = vpop.xlane.xlu1 %2115 }
 0x22e   : > { %v6706_v19 = vpop.xlane.xlu0 %2295 }
 0x22f   : > { %7718 = vst [vmem:[#allocation16_spill] sm:$0xff] %v6706_v19  ;;  %v2692_v19 = vrot.slane %v2083_v16, %v6256_v57 }
 0x231   : > { %v6708_v29 = vpop.xlane.xlu1 %2109 }
 0x232   : > { %v6710_v7 = vpop.xlane.xlu0 %2289 }
 0x235   : > { %v6712_v27 = vpop.xlane.xlu1 %2316 }
 0x236   : > { %7719 = vst [vmem:[#allocation22_spill] sm:$0xff] %v6712_v27  ;;  %v6714_v35 = vpop.xlane.xlu0 %2112 }
 0x239   : > { %v6716_v0 = vpop.xlane.xlu1 %2127 }
 0x23a   : > { %7720 = vst [vmem:[#allocation21_spill] sm:$0xff] %v6716_v0  ;;  %v6718_v46 = vpop.xlane.xlu0 %2304 }
 0x23b   : > { %7721 = vst [vmem:[#allocation17_spill] sm:$0xff] %v6718_v46 }
 0x23d   : > { %v6720_v53 = vpop.xlane.xlu1 %2319 }
 0x23e   : > { %7722 = vst [vmem:[#allocation18_spill] sm:$0xff] %v6720_v53  ;;  %v6722_v9 = vpop.xlane.xlu0 %2106 }
 0x241   : > { %v6724_v58 = vpop.xlane.xlu1 %2121 }
 0x242   : > { %7723 = vst [vmem:[#allocation19_spill] sm:$0xff] %v6724_v58  ;;  %v6726_v49 = vpop.xlane.xlu0 %2298 }
 0x243   : > { %7724 = vst [vmem:[#allocation20_spill] sm:$0xff] %v6726_v49  ;;  %v2938_v49 = vrot.slane %v6579_v21, %v6252_v43  ;;  %v2948_v21 = vrot.slane %v6546_v25, %v6319_v1  ;;  %v2706_v25 = vrot.slane %v6686_v61, %v6260_v55  ;;  %v3012_v61 = vrot.slane %v6696_v26, %v6248_v31 }
 0x244   : > { %v2721_v26 = vrot.slane %v6700_v20, %v6327_v17  ;;  %v2731_v20 = vrot.slane %v6722_v9, %v6391_v15 }
 0x245   : > { %v6728_v60 = vpop.xlane.xlu1 %2328 }
 0x246   : > { %v6730_v63 = vpop.xlane.xlu0 %2307 }
 0x247   : > { %7725 = vst [vmem:[#allocation23_spill] sm:$0xff] %v6730_v63  ;;  %v2929_v63 = vrot.slane %v6599_v28, %v6256_v57 }
 0x249   : > { %v6732_v13 = vpop.xlane.xlu1 %2322 }
 0x24a   : > { %v6734_v3 = vpop.xlane.xlu0 %2301 }
 0x24b   : > { %7726 = vst [vmem:[#allocation25_spill] sm:$0xff] %v6734_v3 }
 0x24d   : > { %v6736_v27 = vpop.xlane.xlu1 %2139 }
 0x24e   : > { %v6738_v6 = vpop.xlane.xlu0 %2124 }
 0x24f   : > { %7727 = vst [vmem:[#allocation24_spill] sm:$0xff] %v6738_v6  ;;  %v2934_v6 = vsel %vm2510_vm1, %v2933_v38, %v2929_v63  ;;  %v2953_v63 = vrot.slane %v6640_v33, %v6312_v62  ;;  %v2958_v33 = vrot.slane %v6533_v18, %v6327_v17 }
 0x251   : > { %v2134_v0 = vpop.xlane.xlu1 %2133 }
 0x252   : > { %v6740_v53 = vpop.xlane.xlu0 %2118 }
 0x255   : > { %v6742_v46 = vpop.xlane.xlu1 %2340 }
 0x256   : > { %7728 = vst [vmem:[#allocation26_spill] sm:$0xff] %v6742_v46  ;;  %v6744_v58 = vpop.xlane.xlu0 %2310  ;;  %v2696_v46 = vrot.slane %v2086_v12, %v6248_v31  ;;  %v2701_v12 = vrot.slane %v2089_v48, %v6252_v43 }
 0x257   : > { %7729 = vst [vmem:[#allocation27_spill] sm:$0xff] %v6744_v58  ;;  %v2939_v58 = vsel %vm2517_vm2, %v2938_v49, %v2934_v6 }
 0x258   : > { %v2697_v38 = vsel %vm2510_vm1, %v2696_v46, %v2692_v19 }
 0x259   : > { %v6746_v51 = vpop.xlane.xlu1 %2334 }
 0x25a   : > { %v6750_v54 = vpop.xlane.xlu0 %2313 }
 0x25b   : > { %7730 = vst [vmem:[#allocation28_spill] sm:$0xff] %v6750_v54  ;;  %v2943_v54 = vrot.slane %v6476_v47, %v6260_v55 }
 0x25d   : > { %v6754_v10 = vpop.xlane.xlu1 %2151 }
 0x25e   : > { %7731 = vst [vmem:[#allocation29_spill] sm:$0xff] %v6754_v10  ;;  %v2137_v3 = vpop.xlane.xlu0 %2136  ;;  %v2944_v10 = vsel %vm2524_vm3, %v2943_v54, %v2939_v58  ;;  %v2711_v54 = vrot.slane %v2095_v56, %v6319_v1 }
 0x25f   : > { %v2949_v49 = vsel %vm2531_vm4, %v2948_v21, %v2944_v10  ;;  %v2716_v10 = vrot.slane %v6702_v50, %v6312_v62  ;;  %v3008_v50 = vrot.slane %v6684_v42, %v6256_v57  ;;  %v3017_v42 = vrot.slane %v6688_v4, %v6252_v43 }
 0x260   : > { %v2954_v47 = vsel %vm2538_vm5, %v2953_v63, %v2949_v49  ;;  %v2963_v63 = vrot.slane %v6626_v52, %v6330_v8  ;;  %v2968_v52 = vrot.slane %v6597_v2, %v6391_v15  ;;  %v2924_v4 = vrot.slane %v6538_v23, %v6501_v34 }
 0x261   : > { %v6762_v28 = vpop.xlane.xlu1 %2343  ;;  %v2959_v48 = vsel %vm2545_vm6, %v2958_v33, %v2954_v47  ;;  %v3087_v47 = vrot.slane %v6732_v13, %v6256_v57  ;;  %v2780_v33 = vrot.slane %v2137_v3, %v6252_v43 }
 0x262   : > { %7732 = vst [vmem:[#allocation30_spill] sm:$0xff] %v6762_v28  ;;  %v2131_v39 = vpop.xlane.xlu0 %2130  ;;  %v2702_v28 = vsel %vm2517_vm2, %v2701_v12, %v2697_v38  ;;  %v2964_v38 = vsel %vm2552_vm7, %v2963_v63, %v2959_v48  ;;  %v2775_v12 = vrot.slane %v2134_v0, %v6248_v31  ;;  %v3096_v48 = vrot.slane %v6728_v60, %v6252_v43 }
 0x263   : > { %v2707_v58 = vsel %vm2524_vm3, %v2706_v25, %v2702_v28  ;;  %v2771_v18 = vrot.slane %v2131_v39, %v6256_v57  ;;  %v2785_v63 = vrot.slane %v6736_v27, %v6260_v55  ;;  %v3022_v43 = vrot.slane %v6692_v32, %v6260_v55 }
 0x264   : > { %v2712_v56 = vsel %vm2531_vm4, %v2711_v54, %v2707_v58  ;;  %v3013_v54 = vsel %vm2510_vm1, %v3012_v61, %v3008_v50  ;;  %v3032_v32 = vrot.slane %v6710_v7, %v6312_v62  ;;  %v2983_v7 = vrot.slane %v6615_v37, %v6408_v14 }
 0x265   : > { %v6772_v6 = vpop.xlane.xlu1 %2145  ;;  %v2717_v39 = vsel %vm2538_vm5, %v2716_v10, %v2712_v56  ;;  %v2776_v0 = vsel %vm2510_vm1, %v2775_v12, %v2771_v18  ;;  %v2973_v10 = vrot.slane %v6637_v44, %v6395_v11  ;;  %v3018_v9 = vsel %vm2517_vm2, %v3017_v42, %v3013_v54 }
 0x266   : > { %v2332_v16 = vpop.xlane.xlu0 %2331  ;;  %v2722_v25 = vsel %vm2545_vm6, %v2721_v26, %v2717_v39  ;;  %v2781_v3 = vsel %vm2517_vm2, %v2780_v33, %v2776_v0  ;;  %v2736_v12 = vrot.slane %v6708_v29, %v6395_v11  ;;  %v2795_v50 = vrot.slane %v6772_v6, %v6312_v62 }
 0x267   : > { %v3101_v61 = vrot.slane %v2332_v16, %v6260_v55  ;;  %v2786_v27 = vsel %vm2524_vm3, %v2785_v63, %v2781_v3  ;;  %v6862_v39 = vsel %vm2608_vm15, %v2924_v4, %v6569_v40  ;;  %v3106_v26 = vrot.slane %v6746_v51, %v6319_v1 }
 0x268   : > { %v3037_v51 = vrot.slane %v6690_v24, %v6327_v17  ;;  %v7734_v24 = vld [vmem:[#allocation16_spill] sm:$0xff] }
 0x269   : > { %v6783_v19 = vpop.xlane.xlu1 %2352 }
 0x26a   : > { %v2326_v46 = vpop.xlane.xlu0 %2325 }
 0x26b   : > { %v3091_v28 = vrot.slane %v2326_v46, %v6248_v31  ;;  %v2969_v31 = vsel %vm2559_vm8, %v2968_v52, %v2964_v38  ;;  %v2726_v46 = vrot.slane %v6698_v22, %v6330_v8  ;;  %v2978_v22 = vrot.slane %v6589_v5, %v6405_v41 }
 0x26c   : > { %v2974_v23 = vsel %vm2566_vm9, %v2973_v10, %v2969_v31  ;;  %v3023_v5 = vsel %vm2524_vm3, %v3022_v43, %v3018_v9  ;;  %v3027_v52 = vrot.slane %v6694_v30, %v6319_v1  ;;  %v2988_v31 = vrot.slane %v6654_v59, %v6485_v36  ;;  %v7738_v43 = vld [vmem:[#allocation11_spill] sm:$0xff] }
 0x26d   : > { %v6795_v21 = vpop.xlane.xlu1 %2346  ;;  %v3092_v13 = vsel %vm2510_vm1, %v3091_v28, %v3087_v47  ;;  %v2727_v60 = vsel %vm2552_vm7, %v2726_v46, %v2722_v25  ;;  %v2979_v47 = vsel %vm2573_vm10, %v2978_v22, %v2974_v23  ;;  %v2746_v59 = vrot.slane %v6704_v45, %v6408_v14  ;;  %v7737_v45 = vld [vmem:[#allocation25_spill] sm:$0xff] }
 0x26e   : > { %v6800_v49 = vpop.xlane.xlu0 %2148  ;;  %v3097_v56 = vsel %vm2517_vm2, %v3096_v48, %v3092_v13  ;;  %v2732_v44 = vsel %vm2559_vm8, %v2731_v20, %v2727_v60  ;;  %v3028_v6 = vsel %vm2531_vm4, %v3027_v52, %v3023_v5  ;;  %v2984_v25 = vsel %vm2580_vm11, %v2983_v7, %v2979_v47  ;;  %v7733_v20 = vld [vmem:[#allocation26_spill] sm:$0xff]  ;;  %v7739_v60 = vld [vmem:[#allocation13_spill] sm:$0xff]  ;;  %v7742_v5 = vld [vmem:[#allocation12_spill] sm:$0xff] }
 0x26f   : > { %v3102_v55 = vsel %vm2524_vm3, %v3101_v61, %v3097_v56  ;;  %v2737_v29 = vsel %vm2566_vm9, %v2736_v12, %v2732_v44  ;;  %v3033_v37 = vsel %vm2538_vm5, %v3032_v32, %v3028_v6  ;;  %v2800_v54 = vrot.slane %v6800_v49, %v6327_v17  ;;  %v7740_v44 = vld [vmem:[#allocation30_spill] sm:$0xff] }
 0x270   : > { %v3116_v49 = vrot.slane %v7733_v20, %v6327_v17  ;;  %v3042_v46 = vrot.slane %v7734_v24, %v6330_v8  ;;  %v3038_v48 = vsel %vm2545_vm6, %v3037_v51, %v3033_v37  ;;  %v3052_v9 = vrot.slane %v7737_v45, %v6395_v11 }
 0x271   : > { %v6815_v2 = vpop.xlane.xlu1 %2163  ;;  %v2993_v56 = vrot.slane %v7739_v60, %v7738_v43  ;;  %v3121_v61 = vrot.slane %v7740_v44, %v6330_v8  ;;  %v2989_v47 = vsel %vm2587_vm12, %v2988_v31, %v2984_v25  ;;  %vm3165_vm1 = vcmask 1042434   ;;  %v7746_v31 = vld [vmem:[#allocation21_spill] sm:$0xff] }
 0x272   : > { %v2143_v57 = vpop.xlane.xlu0 %2142  ;;  %v3043_v12 = vsel %vm2552_vm7, %v3042_v46, %v3038_v48  ;;  %v7749_v46 = vld [vmem:[#allocation28_spill] sm:$0xff]  ;;  %v2825_v45 = vrot.slane %v6815_v2, %v6408_v14  ;;  %vm3167_vm2 = vcmask 1043459   ;;  %vm3169_vm3 = vcmask 1044484  }
 0x273   : > { %v2790_v58 = vrot.slane %v2143_v57, %v6319_v1  ;;  %v3107_v1 = vsel %vm2531_vm4, %v3106_v26, %v3102_v55  ;;  %v2994_v37 = vsel %vm2594_vm13, %v2993_v56, %v2989_v47  ;;  %v3072_v48 = vrot.slane %v7749_v46, %v7738_v43 }
 0x275   : > { %v6842_v18 = vpop.xlane.xlu1 %2355  ;;  %v2791_v28 = vsel %vm2531_vm4, %v2790_v58, %v2786_v27  ;;  %v7736_v58 = vld [vmem:[#allocation29_spill] sm:$0xff]  ;;  %vm3171_vm4 = vcmask 1045509  }
 0x276   : > { %v2338_v38 = vpop.xlane.xlu0 %2337  ;;  %v2796_v0 = vsel %vm2538_vm5, %v2795_v50, %v2791_v28  ;;  %v2805_v4 = vrot.slane %v7736_v58, %v6330_v8  ;;  %v7743_v28 = vld [vmem:[#allocation19_spill] sm:$0xff]  ;;  %v7750_v58 = vld [vmem:[#allocation14_spill] sm:$0xff]  ;;  %v3141_v56 = vrot.slane %v6842_v18, %v6408_v14 }
 0x277   : > { %v3111_v16 = vrot.slane %v2338_v38, %v6312_v62  ;;  %v2741_v62 = vrot.slane %v6714_v35, %v6405_v41  ;;  %v2751_v35 = vrot.slane %v6740_v53, %v6485_v36  ;;  %v2801_v13 = vsel %vm2545_vm6, %v2800_v54, %v2796_v0  ;;  %v7735_v53 = vld [vmem:[#allocation20_spill] sm:$0xff]  ;;  %v7741_v38 = vld [vmem:[#allocation10_spill] sm:$0xff]  ;;  %v7744_v54 = vld [vmem:[#allocation17_spill] sm:$0xff] }
 0x278   : > { %v3047_v3 = vrot.slane %v7735_v53, %v6391_v15  ;;  %v2806_v27 = vsel %vm2552_vm7, %v2805_v4, %v2801_v13  ;;  %v2998_v32 = vrot.slane %v7742_v5, %v7741_v38  ;;  %v2756_v52 = vrot.slane %v7743_v28, %v7738_v43 }
 0x279   : > { %v2158_v30 = vpop.xlane.xlu1 %2157  ;;  %v2742_v33 = vsel %vm2573_vm10, %v2741_v62, %v2737_v29  ;;  %v3112_v42 = vsel %vm2538_vm5, %v3111_v16, %v3107_v1  ;;  %v3126_v0 = vrot.slane %v6795_v21, %v6391_v15  ;;  %v7745_v1 = vld [vmem:[#allocation24_spill] sm:$0xff]  ;;  %v3136_v53 = vrot.slane %v6783_v19, %v6405_v41 }
 0x27a   : > { %v2161_v40 = vpop.xlane.xlu0 %2160  ;;  %v2747_v17 = vsel %vm2580_vm11, %v2746_v59, %v2742_v33  ;;  %v3117_v63 = vsel %vm2545_vm6, %v3116_v49, %v3112_v42  ;;  %v3048_v16 = vsel %vm2559_vm8, %v3047_v3, %v3043_v12  ;;  %v2815_v7 = vrot.slane %v2158_v30, %v6395_v11  ;;  %v7748_v49 = vld [vmem:[#allocation27_spill] sm:$0xff] }
 0x27b   : > { %v2752_v23 = vsel %vm2587_vm12, %v2751_v35, %v2747_v17  ;;  %v3122_v8 = vsel %vm2552_vm7, %v3121_v61, %v3117_v63  ;;  %v3053_v6 = vsel %vm2566_vm9, %v3052_v9, %v3048_v16  ;;  %v3057_v30 = vrot.slane %v7744_v54, %v6405_v41  ;;  %v7747_v35 = vld [vmem:[#allocation23_spill] sm:$0xff]  ;;  %v7751_v9 = vld [vmem:[#allocation22_spill] sm:$0xff] }
 0x27c   : > { %v2757_v62 = vsel %vm2594_vm13, %v2756_v52, %v2752_v23  ;;  %v2761_v51 = vrot.slane %v7745_v1, %v7741_v38  ;;  %v2766_v33 = vrot.slane %v7746_v31, %v6501_v34  ;;  %v3062_v42 = vrot.slane %v7747_v35, %v6408_v14 }
 0x27d   : > { %v2350_v57 = vpop.xlane.xlu1 %2349  ;;  %v2820_v25 = vrot.slane %v2161_v40, %v6405_v41  ;;  %v3058_v59 = vsel %vm2573_vm10, %v3057_v30, %v3053_v6  ;;  %v3067_v13 = vrot.slane %v7748_v49, %v6485_v36  ;;  %v3003_v4 = vrot.slane %v7750_v58, %v6501_v34 }
 0x27e   : > { %v2155_v10 = vpop.xlane.xlu0 %2154  ;;  %v3131_v29 = vrot.slane %v2350_v57, %v6395_v11  ;;  %v2762_v20 = vsel %vm2601_vm14, %v2761_v51, %v2757_v62  ;;  %v3077_v17 = vrot.slane %v7751_v9, %v7741_v38  ;;  %v3063_v41 = vsel %vm2580_vm11, %v3062_v42, %v3058_v59 }
 0x27f   : > { %v2810_v22 = vrot.slane %v2155_v10, %v6391_v15  ;;  %v3127_v15 = vsel %vm2559_vm8, %v3126_v0, %v3122_v8  ;;  %v2999_v10 = vsel %vm2601_vm14, %v2998_v32, %v2994_v37  ;;  %v2767_v63 = vsel %vm2608_vm15, %v2766_v33, %v2762_v20  ;;  %v2369_v8 = vld [vmem:[%s299_s16] sm:$0xff]  ;;  %v7754_v20 = vld [vmem:[#allocation9_spill] sm:$0xff] }
 0x280   : > { %v3132_v57 = vsel %vm2566_vm9, %v3131_v29, %v3127_v15  ;;  %v3068_v60 = vsel %vm2587_vm12, %v3067_v13, %v3063_v41  ;;  %vm3173_vm5 = vcmask 1046534   ;;  %v7752_v29 = vld [vmem:[#allocation15_spill] sm:$0xff]  ;;  %v3004_v54 = vsel %vm2608_vm15, %v3003_v4, %v2999_v10  ;;  %v7755_v13 = vld [vmem:[#allocation8_spill] sm:$0xff] }
 0x281   : > { %v2811_v50 = vsel %vm2559_vm8, %v2810_v22, %v2806_v27  ;;  %v6916_v55 = vpop.xlane.xlu1 %2358  ;;  %v3137_v19 = vsel %vm2573_vm10, %v3136_v53, %v3132_v57  ;;  %v3073_v61 = vsel %vm2594_vm13, %v3072_v48, %v3068_v60  ;;  %vm3175_vm6 = vcmask 1047559   ;;  %v5232_v60 = vld [vmem:[%s5486_s17 + $0x10] sm:$0xff]  }
 0x282   : > { %v2173_v26 = vpop.xlane.xlu0 %2172  ;;  %v2816_v11 = vsel %vm2566_vm9, %v2815_v7, %v2811_v50  ;;  %v3146_v27 = vrot.slane %v6916_v55, %v6485_v36  ;;  %v3142_v14 = vsel %vm2580_vm11, %v3141_v56, %v3137_v19  ;;  %v3078_v50 = vsel %vm2601_vm14, %v3077_v17, %v3073_v61 }
 0x283   : > { %v2821_v40 = vsel %vm2573_vm10, %v2820_v25, %v2816_v11  ;;  %v2840_v5 = vrot.slane %v2173_v26, %v7741_v38  ;;  %v3166_v26 = vsel %vm3165_vm1, %v2767_v63, %v7752_v29  ;;  %vm2370_vm7 = vcmp.gt.f32.partialorder %v2369_v8, 0.5  ;;  %v5231_v63 = vld [vmem:[%s5486_s17 + $0x8] sm:$0xff]  }
 0x284   : > { %v2826_v23 = vsel %vm2580_vm11, %v2825_v45, %v2821_v40  ;;  %v3147_v6 = vsel %vm2587_vm12, %v3146_v27, %v3142_v14  ;;  %v3258_v57 = vsub.s32 1, %v7755_v13  ;;  %v3325_v46 = vsub.s32 2, %v7755_v13 }
 0x285   : > { %v2176_v21 = vpop.xlane.xlu1 %2175  ;;  %v3392_v53 = vsub.s32 3, %v7755_v13  ;;  %v3727_v41 = vunpack.c.l.bf16 %v5231_v63  ;;  %v3459_v19 = vsub.s32 4, %v7755_v13  ;;  %v3729_v56 = vunpack.c.l.bf16 %v5232_v60 }
 0x286   : > { %v2167_v24 = vpop.xlane.xlu0 %2166  ;;  %v2845_v18 = vrot.slane %v2176_v21, %v6501_v34  ;;  %vm7756_vm8 = vcmask 261120   ;;  %v3728_v27 = vunpack.c.h.bf16 %v5231_v63 }
 0x287   : > { %v2830_v3 = vrot.slane %v2167_v24, %v6485_v36  ;;  %vm7757_vm9 = vmmov %vm7756_vm8 }
 0x288   : > { %vm7758_vm10 = vmmov %vm7756_vm8 }
 0x289   : > { %v2170_v22 = vpop.xlane.xlu1 %2169  ;;  %v2831_v32 = vsel %vm2587_vm12, %v2830_v3, %v2826_v23  ;;  %v5230_v3 = vld [vmem:[%s5486_s17] sm:$0xff]   ;;  %vm7759_vm11 = vmmov %vm7756_vm8 }
 0x28a   : > { %v2362_v2 = vpop.xlane.xlu0 %2361  ;;  %v2835_v44 = vrot.slane %v2170_v22, %v7738_v43  ;;  %v3725_v58 = vunpack.c.l.bf16 %v5230_v3  ;;  %v3726_v4 = vunpack.c.h.bf16 %v5230_v3  ;;  %vm7760_vm12 = vmmov %vm7756_vm8 }
 0x28b   : > { %v3151_v12 = vrot.slane %v2362_v2, %v7738_v43  ;;  %v7753_v43 = vld [vmem:[#allocation18_spill] sm:$0xff] }
 0x28c   : > { %v2836_v28 = vsel %vm2594_vm13, %v2835_v44, %v2831_v32  ;;  %v3082_v47 = vrot.slane %v7753_v43, %v6501_v34 }
 0x28d   : > { %v2841_v52 = vsel %vm2601_vm14, %v2840_v5, %v2836_v28  ;;  %v2368_v36 = vpop.xlane.xlu1 %2367  ;;  %v3152_v37 = vsel %vm2594_vm13, %v3151_v12, %v3147_v6  ;;  %vm7761_vm13 = vmmov %vm7756_vm8 }
 0x28e   : > { %v2846_v55 = vsel %vm2608_vm15, %v2845_v18, %v2841_v52  ;;  %v2365_v16 = vpop.xlane.xlu0 %2364  ;;  %v3161_v7 = vrot.slane %v2368_v36, %v6501_v34  ;;  %v3083_v34 = vsel %vm2608_vm15, %v3082_v47, %v3078_v50  ;;  %v3730_v36 = vunpack.c.h.bf16 %v5232_v60 }
 0x28f   : > { %v3156_v62 = vrot.slane %v2365_v16, %v7741_v38  ;;  %v3168_v0 = vsel %vm3167_vm2, %v2846_v55, %v3166_v26  ;;  %v5233_v16 = vld [vmem:[%s5486_s17 + $0x18] sm:$0xff]  }
 0x290   : > { %v3170_v30 = vsel %vm3169_vm3, %v6862_v39, %v3168_v0  ;;  %v3732_v6 = vunpack.c.h.bf16 %v5233_v16 }
 0x291   : > { %v3157_v1 = vsel %vm2601_vm14, %v3156_v62, %v3152_v37  ;;  %v3172_v51 = vsel %vm3171_vm4, %v3004_v54, %v3170_v30  ;;  %vm7762_vm14 = vmmov %vm7756_vm8 }
 0x292   : > { %v3162_v38 = vsel %vm2608_vm15, %v3161_v7, %v3157_v1  ;;  %v3174_v11 = vsel %vm3173_vm5, %v3083_v34, %v3172_v51  ;;  %v3731_v7 = vunpack.c.l.bf16 %v5233_v16  ;;  %vm7763_vm15 = vmmov %vm7756_vm8 }
 0x293   : > { %v3176_v31 = vsel %vm3175_vm6, %v3162_v38, %v3174_v11  ;;  %v5234_v38 = vld [vmem:[%s5486_s17 + $0x20] sm:$0xff]  }
 0x294   : > { %v3178_v33 = vsel %vm2370_vm7, %v3176_v31, -1e+12  ;;  %v3733_v11 = vunpack.c.l.bf16 %v5234_v38  ;;  %vm7764_vm7 = vmmov %vm7756_vm8 }
 0x295   : > { %3179 = vmax.xlane.f32.xlu0 %v3178_v33 }
 0x322   : > { %v3180_v35 = vpop.xlane.xlu0 %3179 }
 0x323   : > { %v3181_v42 = vsub.f32 %v3178_v33, %v3180_v35 }
 0x325   : > { %v3182_v39 = vmul.f32 1.442695, %v3181_v42 }
 0x327   : > { %5224 = vpow2.f32 %v3182_v39  ;;  %v3734_v39 = vunpack.c.h.bf16 %v5234_v38 }
 0x331   : > { %v5225_v25 = vpop.eup %5224 }
 0x332   : > { %3184 = vadd.xlane.f32.xlu1 %v5225_v25 }
 0x3bf   : > { %v3185_v15 = vpop.xlane.xlu1 %3184 }
 0x3c0   : > { %5226 = vrcp.f32 %v3185_v15 }
 0x3ca   : > { %v5227_v21 = vpop.eup %5226 }
 0x3cb   : > { %v7004_v59 = vmul.f32 %v5227_v21, %v5225_v25 }
 0x3cd   : > { %v3192_v49 = vrot.slane %v7004_v59, %v7754_v20  ;;  %3188 = vst [vmem:[%s7010_s20] sm:$0xff] %v7004_v59  ;;  %v3259_v24 = vrot.slane %v7004_v59, %v3258_v57  ;;  %v3326_v48 = vrot.slane %v7004_v59, %v3325_v46  ;;  %v3393_v40 = vrot.slane %v7004_v59, %v3392_v53 }
 0x3ce   : > { %v7028_v32 = vrot.slane %v7004_v59, %v3459_v19 }
 0x3cf   : > { %3198 = vbcast.lane.b32.xlu1 %v3192_v49, 264  ;;  %3194 = vbcast.lane.b32.xlu0 %v3192_v49, 256 }
 0x3d3   : > { %3202 = vbcast.lane.b32.xlu1 %v3192_v49, 272  ;;  %3210 = vbcast.lane.b32.xlu0 %v3192_v49, 288 }
 0x3d7   : > { %3206 = vbcast.lane.b32.xlu1 %v3192_v49, 280  ;;  %3218 = vbcast.lane.b32.xlu0 %v3192_v49, 304 }
 0x3db   : > { %3214 = vbcast.lane.b32.xlu1 %v3192_v49, 296  ;;  %3226 = vbcast.lane.b32.xlu0 %v3192_v49, 320 }
 0x3df   : > { %3222 = vbcast.lane.b32.xlu1 %v3192_v49, 312  ;;  %3234 = vbcast.lane.b32.xlu0 %v3192_v49, 336 }
 0x3e3   : > { %3230 = vbcast.lane.b32.xlu1 %v3192_v49, 328  ;;  %3242 = vbcast.lane.b32.xlu0 %v3192_v49, 352 }
 0x3e7   : > { %3238 = vbcast.lane.b32.xlu1 %v3192_v49, 344  ;;  %3250 = vbcast.lane.b32.xlu0 %v3192_v49, 368 }
 0x3eb   : > { %3246 = vbcast.lane.b32.xlu1 %v3192_v49, 360  ;;  %3261 = vbcast.lane.b32.xlu0 %v3259_v24, 256 }
 0x3ef   : > { %3254 = vbcast.lane.b32.xlu1 %v3192_v49, 376  ;;  %3269 = vbcast.lane.b32.xlu0 %v3259_v24, 272 }
 0x3f3   : > { %3265 = vbcast.lane.b32.xlu1 %v3259_v24, 264  ;;  %3277 = vbcast.lane.b32.xlu0 %v3259_v24, 288 }
 0x3f7   : > { %3273 = vbcast.lane.b32.xlu1 %v3259_v24, 280  ;;  %3285 = vbcast.lane.b32.xlu0 %v3259_v24, 304 }
 0x3fb   : > { %3281 = vbcast.lane.b32.xlu1 %v3259_v24, 296  ;;  %3293 = vbcast.lane.b32.xlu0 %v3259_v24, 320 }
 0x3ff   : > { %3289 = vbcast.lane.b32.xlu1 %v3259_v24, 312  ;;  %3301 = vbcast.lane.b32.xlu0 %v3259_v24, 336 }
 0x403   : > { %3297 = vbcast.lane.b32.xlu1 %v3259_v24, 328  ;;  %3309 = vbcast.lane.b32.xlu0 %v3259_v24, 352 }
 0x407   : > { %3305 = vbcast.lane.b32.xlu1 %v3259_v24, 344  ;;  %3317 = vbcast.lane.b32.xlu0 %v3259_v24, 368 }
 0x40b   : > { %3313 = vbcast.lane.b32.xlu1 %v3259_v24, 360  ;;  %3328 = vbcast.lane.b32.xlu0 %v3326_v48, 256 }
 0x40f   : > { %3321 = vbcast.lane.b32.xlu1 %v3259_v24, 376  ;;  %3336 = vbcast.lane.b32.xlu0 %v3326_v48, 272  ;;  %v5235_v24 = vld [vmem:[%s5486_s17 + $0x28] sm:$0xff]  }
 0x410   : > { %v3735_v46 = vunpack.c.l.bf16 %v5235_v24 }
 0x413   : > { %3332 = vbcast.lane.b32.xlu1 %v3326_v48, 264  ;;  %3344 = vbcast.lane.b32.xlu0 %v3326_v48, 288 }
 0x417   : > { %3340 = vbcast.lane.b32.xlu1 %v3326_v48, 280  ;;  %3352 = vbcast.lane.b32.xlu0 %v3326_v48, 304 }
 0x41b   : > { %3348 = vbcast.lane.b32.xlu1 %v3326_v48, 296  ;;  %3360 = vbcast.lane.b32.xlu0 %v3326_v48, 320 }
 0x41f   : > { %3356 = vbcast.lane.b32.xlu1 %v3326_v48, 312  ;;  %3368 = vbcast.lane.b32.xlu0 %v3326_v48, 336 }
 0x423   : > { %3364 = vbcast.lane.b32.xlu1 %v3326_v48, 328  ;;  %3376 = vbcast.lane.b32.xlu0 %v3326_v48, 352 }
 0x427   : > { %3372 = vbcast.lane.b32.xlu1 %v3326_v48, 344  ;;  %3384 = vbcast.lane.b32.xlu0 %v3326_v48, 368 }
 0x42b   : > { %3380 = vbcast.lane.b32.xlu1 %v3326_v48, 360  ;;  %3395 = vbcast.lane.b32.xlu0 %v3393_v40, 256 }
 0x42f   : > { %3388 = vbcast.lane.b32.xlu1 %v3326_v48, 376  ;;  %3403 = vbcast.lane.b32.xlu0 %v3393_v40, 272  ;;  %v3526_v48 = vsub.s32 5, %v7755_v13 }
 0x431   : > { %v7056_v63 = vrot.slane %v7004_v59, %v3526_v48 }
 0x433   : > { %3399 = vbcast.lane.b32.xlu1 %v3393_v40, 264  ;;  %3411 = vbcast.lane.b32.xlu0 %v3393_v40, 288 }
 0x437   : > { %3407 = vbcast.lane.b32.xlu1 %v3393_v40, 280  ;;  %3419 = vbcast.lane.b32.xlu0 %v3393_v40, 304 }
 0x43b   : > { %3415 = vbcast.lane.b32.xlu1 %v3393_v40, 296  ;;  %3427 = vbcast.lane.b32.xlu0 %v3393_v40, 320 }
 0x43f   : > { %3423 = vbcast.lane.b32.xlu1 %v3393_v40, 312  ;;  %3435 = vbcast.lane.b32.xlu0 %v3393_v40, 336 }
 0x441   : > { %v3199_v10 = vpop.permute.xlu1 %3198  ;;  %v3195_v45 = vpop.permute.xlu0 %3194 }
 0x442   : > { %v3854_v9 = vmul.f32 %v3726_v4, %v3199_v10  ;;  %v3853_v17 = vmul.f32 %v3725_v58, %v3195_v45  ;;  %v3736_v4 = vunpack.c.h.bf16 %v5235_v24  ;;  %v5236_v45 = vld [vmem:[%s5486_s17 + $0x40] sm:$0xff]  }
 0x443   : > { %3431 = vbcast.lane.b32.xlu1 %v3393_v40, 328  ;;  %3443 = vbcast.lane.b32.xlu0 %v3393_v40, 352 }
 0x444   : > { %v3982_v2 = vsel %vm7756_vm8, %v3854_v9, 0.0  ;;  %v3981_v44 = vsel %vm7757_vm9, %v3853_v17, 0.0  ;;  %vm7765_vm8 = vmmov %vm7764_vm7  ;;  %v3741_v9 = vunpack.c.l.bf16 %v5236_v45  ;;  %v3593_v17 = vsub.s32 6, %v7755_v13 }
 0x445   : > { %v3203_v22 = vpop.permute.xlu1 %3202  ;;  %v3211_v23 = vpop.permute.xlu0 %3210  ;;  %v3983_v14 = vadd.f32 %v3982_v2, %v3981_v44  ;;  %v3742_v2 = vunpack.c.h.bf16 %v5236_v45  ;;  %v3660_v44 = vsub.s32 7, %v7755_v13  ;;  %vm7766_vm9 = vmmov %vm7764_vm7 }
 0x446   : > { %v3855_v61 = vmul.f32 %v3727_v41, %v3203_v22  ;;  %v3857_v28 = vmul.f32 %v3729_v56, %v3211_v23  ;;  %v5237_v56 = vld [vmem:[%s5486_s17 + $0x48] sm:$0xff]  }
 0x447   : > { %3439 = vbcast.lane.b32.xlu1 %v3393_v40, 344  ;;  %3451 = vbcast.lane.b32.xlu0 %v3393_v40, 368  ;;  %v3743_v23 = vunpack.c.l.bf16 %v5237_v56  ;;  %v3744_v13 = vunpack.c.h.bf16 %v5237_v56 }
 0x448   : > { %v3984_v5 = vsel %vm7758_vm10, %v3855_v61, 0.0  ;;  %v3988_v43 = vsel %vm7760_vm12, %v3857_v28, 0.0  ;;  %vm7767_vm10 = vmmov %vm7764_vm7 }
 0x449   : > { %v3207_v18 = vpop.permute.xlu1 %3206  ;;  %v3219_v12 = vpop.permute.xlu0 %3218  ;;  %v3985_v50 = vadd.f32 %v3984_v5, %v3983_v14  ;;  %vm7769_vm12 = vmmov %vm7764_vm7 }
 0x44a   : > { %v3856_v52 = vmul.f32 %v3728_v27, %v3207_v18  ;;  %v3859_v0 = vmul.f32 %v3731_v7, %v3219_v12  ;;  %v5238_v27 = vld [vmem:[%s5486_s17 + $0x30] sm:$0xff]   ;;  %v7067_v18 = vrot.slane %v7004_v59, %v3593_v17 }
 0x44b   : > { %3447 = vbcast.lane.b32.xlu1 %v3393_v40, 360  ;;  %3462 = vbcast.lane.b32.xlu0 %v7028_v32, 256  ;;  %v3737_v5 = vunpack.c.l.bf16 %v5238_v27  ;;  %v3738_v28 = vunpack.c.h.bf16 %v5238_v27 }
 0x44c   : > { %v3986_v55 = vsel %vm7759_vm11, %v3856_v52, 0.0  ;;  %v3992_v51 = vsel %vm7762_vm14, %v3859_v0, 0.0  ;;  %vm7768_vm11 = vmmov %vm7764_vm7 }
 0x44d   : > { %v3987_v8 = vadd.f32 %v3986_v55, %v3985_v50  ;;  %v3215_v29 = vpop.permute.xlu1 %3214  ;;  %v3227_v26 = vpop.permute.xlu0 %3226  ;;  %vm7771_vm14 = vmmov %vm7764_vm7 }
 0x44e   : > { %v3858_v47 = vmul.f32 %v3730_v36, %v3215_v29  ;;  %v3861_v25 = vmul.f32 %v3733_v11, %v3227_v26  ;;  %v5239_v36 = vld [vmem:[%s5486_s17 + $0x50] sm:$0xff]   ;;  %v7074_v29 = vrot.slane %v7004_v59, %v3660_v44 }
 0x44f   : > { %v3989_v62 = vadd.f32 %v3988_v43, %v3987_v8  ;;  %3455 = vbcast.lane.b32.xlu1 %v3393_v40, 376  ;;  %3470 = vbcast.lane.b32.xlu0 %v7028_v32, 272  ;;  %v3745_v50 = vunpack.c.l.bf16 %v5239_v36 }
 0x450   : > { %v3990_v37 = vsel %vm7761_vm13, %v3858_v47, 0.0  ;;  %v3996_v57 = vsel %vm7764_vm7, %v3861_v25, 0.0  ;;  %vm7770_vm13 = vmmov %vm7764_vm7 }
 0x451   : > { %v3991_v54 = vadd.f32 %v3990_v37, %v3989_v62  ;;  %v3223_v30 = vpop.permute.xlu1 %3222  ;;  %v3235_v1 = vpop.permute.xlu0 %3234  ;;  %v5240_v37 = vld [vmem:[%s5486_s17 + $0x58] sm:$0xff]  }
 0x452   : > { %v3860_v34 = vmul.f32 %v3732_v6, %v3223_v30  ;;  %v3863_v10 = vmul.f32 %v3735_v46, %v3235_v1  ;;  %v3746_v1 = vunpack.c.h.bf16 %v5239_v36  ;;  %v3748_v46 = vunpack.c.h.bf16 %v5240_v37 }
 0x453   : > { %3466 = vbcast.lane.b32.xlu1 %v7028_v32, 264  ;;  %3478 = vbcast.lane.b32.xlu0 %v7028_v32, 288  ;;  %v3993_v31 = vadd.f32 %v3992_v51, %v3991_v54  ;;  %v3747_v54 = vunpack.c.l.bf16 %v5240_v37 }
 0x454   : > { %v3994_v42 = vsel %vm7763_vm15, %v3860_v34, 0.0  ;;  %v4000_v61 = vsel %vm7766_vm9, %v3863_v10, 0.0  ;;  %vm7772_vm15 = vmmov %vm7764_vm7 }
 0x455   : > { %v3231_v33 = vpop.permute.xlu1 %3230  ;;  %v3243_v35 = vpop.permute.xlu0 %3242  ;;  %v3995_v15 = vadd.f32 %v3994_v42, %v3993_v31  ;;  %vm7774_vm9 = vmmov %vm7764_vm7 }
 0x456   : > { %v3862_v49 = vmul.f32 %v3734_v39, %v3231_v33  ;;  %v3865_v26 = vmul.f32 %v3737_v5, %v3243_v35  ;;  %v5241_v33 = vld [vmem:[%s5486_s17 + $0x38] sm:$0xff]  }
 0x457   : > { %3474 = vbcast.lane.b32.xlu1 %v7028_v32, 280  ;;  %3486 = vbcast.lane.b32.xlu0 %v7028_v32, 304  ;;  %v3997_v53 = vadd.f32 %v3996_v57, %v3995_v15  ;;  %v3739_v35 = vunpack.c.l.bf16 %v5241_v33  ;;  %v3740_v42 = vunpack.c.h.bf16 %v5241_v33 }
 0x458   : > { %v3998_v58 = vsel %vm7765_vm8, %v3862_v49, 0.0  ;;  %v4004_v31 = vsel %vm7771_vm14, %v3865_v26, 0.0  ;;  %v5242_v49 = vld [vmem:[%s5486_s17 + $0x60] sm:$0xff]   ;;  %vm7773_vm8 = vmmov %vm7764_vm7 }
 0x459   : > { %v3239_v21 = vpop.permute.xlu1 %3238  ;;  %v7043_v20 = vpop.permute.xlu0 %3250  ;;  %v3999_v41 = vadd.f32 %v3998_v58, %v3997_v53  ;;  %v3749_v57 = vunpack.c.l.bf16 %v5242_v49  ;;  %v3750_v56 = vunpack.c.h.bf16 %v5242_v49  ;;  %vm7779_vm14 = vmmov %vm7764_vm7  ;;  %v5246_v49 = vld [vmem:[%s5486_s17 + $0x80] sm:$0xff]  }
 0x45a   : > { %v3864_v60 = vmul.f32 %v3736_v4, %v3239_v21  ;;  %v3867_v4 = vmul.f32 %v3739_v35, %v7043_v20 }
 0x45b   : > { %3482 = vbcast.lane.b32.xlu1 %v7028_v32, 296  ;;  %3494 = vbcast.lane.b32.xlu0 %v7028_v32, 320  ;;  %v4001_v12 = vadd.f32 %v4000_v61, %v3999_v41  ;;  %v5243_v41 = vld [vmem:[%s5486_s17 + $0x68] sm:$0xff]  }
 0x45c   : > { %v4002_v16 = vsel %vm7767_vm10, %v3864_v60, 0.0  ;;  %vm7775_vm10 = vmmov %vm7764_vm7 }
 0x45d   : > { %v3247_v40 = vpop.permute.xlu1 %3246  ;;  %v3262_v3 = vpop.permute.xlu0 %3261  ;;  %v4003_v6 = vadd.f32 %v4002_v16, %v4001_v12 }
 0x45e   : > { %v3869_v14 = vmul.f32 %v3741_v9, %v3262_v3  ;;  %v3866_v34 = vmul.f32 %v3738_v28, %v3247_v40 }
 0x45f   : > { %3490 = vbcast.lane.b32.xlu1 %v7028_v32, 312  ;;  %3502 = vbcast.lane.b32.xlu0 %v7028_v32, 336  ;;  %v4005_v25 = vadd.f32 %v4004_v31, %v4003_v6 }
 0x460   : > { %v4018_v43 = vsel %vm7768_vm11, %v3869_v14, 0.0  ;;  %v4006_v48 = vsel %vm7764_vm7, %v3866_v34, 0.0  ;;  %vm7776_vm11 = vmmov %vm7764_vm7 }
 0x461   : > { %v7058_v19 = vpop.permute.xlu1 %3254  ;;  %v3270_v22 = vpop.permute.xlu0 %3269  ;;  %v4007_v45 = vadd.f32 %v4006_v48, %v4005_v25  ;;  %v4008_v20 = vsel %vm7776_vm11, %v3867_v4, 0.0  ;;  %vm7784_vm11 = vmmov %vm7764_vm7 }
 0x462   : > { %v3871_v7 = vmul.f32 %v3743_v23, %v3270_v22  ;;  %v3751_v22 = vunpack.c.l.bf16 %v5243_v41  ;;  %v3868_v23 = vmul.f32 %v3740_v42, %v7058_v19 }
 0x463   : > { %3498 = vbcast.lane.b32.xlu1 %v7028_v32, 328  ;;  %3533 = vbcast.lane.b32.xlu0 %v7056_v63, 264  ;;  %v4009_v14 = vadd.f32 %v4008_v20, %v4007_v45 }
 0x464   : > { %v4021_v51 = vsel %vm7770_vm13, %v3871_v7, 0.0  ;;  %vm7778_vm13 = vmmov %vm7764_vm7 }
 0x465   : > { %v3266_v52 = vpop.permute.xlu1 %3265  ;;  %v3278_v55 = vpop.permute.xlu0 %3277 }
 0x466   : > { %v3870_v8 = vmul.f32 %v3742_v2, %v3266_v52  ;;  %v3873_v38 = vmul.f32 %v3745_v50, %v3278_v55  ;;  %v5244_v52 = vld [vmem:[%s5486_s17 + $0x70] sm:$0xff]   ;;  %v3752_v50 = vunpack.c.h.bf16 %v5243_v41  ;;  %v4010_v55 = vsel %vm7778_vm13, %v3868_v23, 0.0  ;;  %vm7786_vm13 = vmmov %vm7764_vm7 }
 0x467   : > { %3529 = vbcast.lane.b32.xlu1 %v7056_v63, 256  ;;  %3600 = vbcast.lane.b32.xlu0 %v7067_v18, 264  ;;  %v3753_v36 = vunpack.c.l.bf16 %v5244_v52  ;;  %v3754_v34 = vunpack.c.h.bf16 %v5244_v52 }
 0x468   : > { %v4019_v47 = vsel %vm7769_vm12, %v3870_v8, 0.0  ;;  %v4025_v53 = vsel %vm7773_vm8, %v3873_v38, 0.0  ;;  %vm7777_vm12 = vmmov %vm7764_vm7 }
 0x469   : > { %v4020_v62 = vadd.f32 %v4019_v47, %v4018_v43  ;;  %v3274_v0 = vpop.permute.xlu1 %3273  ;;  %v3286_v30 = vpop.permute.xlu0 %3285  ;;  %v4011_v43 = vadd.f32 %v4010_v55, %v4009_v14  ;;  %vm7781_vm8 = vmmov %vm7764_vm7 }
 0x46a   : > { %v3872_v59 = vmul.f32 %v3744_v13, %v3274_v0  ;;  %v3875_v40 = vmul.f32 %v3747_v54, %v3286_v30 }
 0x46b   : > { %v4022_v11 = vadd.f32 %v4021_v51, %v4020_v62  ;;  %3596 = vbcast.lane.b32.xlu1 %v7067_v18, 256  ;;  %3663 = vbcast.lane.b32.xlu0 %v7074_v29, 256  ;;  %v5245_v62 = vld [vmem:[%s5486_s17 + $0x78] sm:$0xff]  }
 0x46c   : > { %v4023_v39 = vsel %vm7772_vm15, %v3872_v59, 0.0  ;;  %v4029_v2 = vsel %vm7775_vm10, %v3875_v40, 0.0  ;;  %vm7780_vm15 = vmmov %vm7764_vm7  ;;  %v3755_v0 = vunpack.c.l.bf16 %v5245_v62  ;;  %v4012_v59 = vrot.slane %v4011_v43, 4 }
 0x46d   : > { %v4024_v15 = vadd.f32 %v4023_v39, %v4022_v11  ;;  %v3282_v21 = vpop.permute.xlu1 %3281  ;;  %v3294_v24 = vpop.permute.xlu0 %3293  ;;  %v3756_v25 = vunpack.c.h.bf16 %v5245_v62  ;;  %vm7783_vm10 = vmmov %vm7764_vm7 }
 0x46e   : > { %v3874_v3 = vmul.f32 %v3746_v1, %v3282_v21  ;;  %v3877_v44 = vmul.f32 %v3749_v57, %v3294_v24  ;;  %v3757_v57 = vunpack.c.l.bf16 %v5246_v49  ;;  %v4013_v24 = vadd.f32 %v4012_v59, %v4011_v43 }
 0x46f   : > { %v4026_v58 = vadd.f32 %v4025_v53, %v4024_v15  ;;  %3537 = vbcast.lane.b32.xlu1 %v7056_v63, 272  ;;  %3604 = vbcast.lane.b32.xlu0 %v7067_v18, 272 }
 0x470   : > { %v4027_v10 = vsel %vm7774_vm9, %v3874_v3, 0.0  ;;  %v4033_v16 = vsel %vm7779_vm14, %v3877_v44, 0.0  ;;  %vm7782_vm9 = vmmov %vm7764_vm7  ;;  %v4014_v41 = vrot.slane %v4013_v24, 2  ;;  %v5248_v44 = vld [vmem:[%s5486_s17 + $0x90] sm:$0xff]  }
 0x471   : > { %v4028_v9 = vadd.f32 %v4027_v10, %v4026_v58  ;;  %v3290_v17 = vpop.permute.xlu1 %3289  ;;  %v3302_v60 = vpop.permute.xlu0 %3301  ;;  %v5247_v58 = vld [vmem:[%s5486_s17 + $0x88] sm:$0xff]   ;;  %v3758_v10 = vunpack.c.h.bf16 %v5246_v49  ;;  %vm7787_vm14 = vmmov %vm7764_vm7 }
 0x472   : > { %v3876_v61 = vmul.f32 %v3748_v46, %v3290_v17  ;;  %v3879_v7 = vmul.f32 %v3751_v22, %v3302_v60  ;;  %v3759_v4 = vunpack.c.l.bf16 %v5247_v58 }
 0x473   : > { %v4030_v27 = vadd.f32 %v4029_v2, %v4028_v9  ;;  %3667 = vbcast.lane.b32.xlu1 %v7074_v29, 264  ;;  %3671 = vbcast.lane.b32.xlu0 %v7074_v29, 272 }
 0x474   : > { %v4031_v5 = vsel %vm7777_vm12, %v3876_v61, 0.0  ;;  %v4037_v54 = vsel %vm7764_vm7, %v3879_v7, 0.0  ;;  %vm7785_vm12 = vmmov %vm7764_vm7  ;;  %v3761_v61 = vunpack.c.l.bf16 %v5248_v44 }
 0x475   : > { %v4032_v12 = vadd.f32 %v4031_v5, %v4030_v27  ;;  %v3298_v28 = vpop.permute.xlu1 %3297  ;;  %v3310_v19 = vpop.permute.xlu0 %3309  ;;  %v3760_v27 = vunpack.c.h.bf16 %v5247_v58 }
 0x476   : > { %v3878_v8 = vmul.f32 %v3750_v56, %v3298_v28  ;;  %v3881_v30 = vmul.f32 %v3753_v36, %v3310_v19  ;;  %v5249_v19 = vld [vmem:[%s5486_s17 + $0x98] sm:$0xff]  }
 0x477   : > { %v4034_v13 = vadd.f32 %v4033_v16, %v4032_v12  ;;  %3541 = vbcast.lane.b32.xlu1 %v7056_v63, 280  ;;  %3545 = vbcast.lane.b32.xlu0 %v7056_v63, 288  ;;  %v4015_v12 = vadd.f32 %v4014_v41, %v4013_v24  ;;  %v3764_v59 = vunpack.c.h.bf16 %v5249_v19 }
 0x478   : > { %v4035_v26 = vsel %vm7780_vm15, %v3878_v8, 0.0  ;;  %v4041_v35 = vsel %vm7782_vm9, %v3881_v30, 0.0  ;;  %vm7788_vm15 = vmmov %vm7764_vm7 }
 0x479   : > { %v4036_v47 = vadd.f32 %v4035_v26, %v4034_v13  ;;  %v3306_v6 = vpop.permute.xlu1 %3305  ;;  %v3318_v37 = vpop.permute.xlu0 %3317  ;;  %v3762_v13 = vunpack.c.h.bf16 %v5248_v44  ;;  %vm7790_vm9 = vmmov %vm7764_vm7 }
 0x47a   : > { %v3880_v1 = vmul.f32 %v3752_v50, %v3306_v6  ;;  %v3883_v42 = vmul.f32 %v3755_v0, %v3318_v37  ;;  %v3763_v50 = vunpack.c.l.bf16 %v5249_v19  ;;  %v4016_v6 = vrot.slane %v4015_v12, 1 }
 0x47b   : > { %v4038_v51 = vadd.f32 %v4037_v54, %v4036_v47  ;;  %3608 = vbcast.lane.b32.xlu1 %v7067_v18, 280  ;;  %3612 = vbcast.lane.b32.xlu0 %v7067_v18, 288  ;;  %v5250_v54 = vld [vmem:[%s5486_s17 + $0xa0] sm:$0xff]  }
 0x47c   : > { %v4039_v38 = vsel %vm7781_vm8, %v3880_v1, 0.0  ;;  %v4045_v40 = vsel %vm7784_vm11, %v3883_v42, 0.0  ;;  %v3765_v30 = vunpack.c.l.bf16 %v5250_v54  ;;  %vm7789_vm8 = vmmov %vm7764_vm7 }
 0x47d   : > { %v4040_v11 = vadd.f32 %v4039_v38, %v4038_v51  ;;  %v3314_v31 = vpop.permute.xlu1 %3313  ;;  %v3329_v33 = vpop.permute.xlu0 %3328  ;;  %vm7792_vm11 = vmmov %vm7764_vm7 }
 0x47e   : > { %v3882_v39 = vmul.f32 %v3754_v34, %v3314_v31  ;;  %v3885_v9 = vmul.f32 %v3757_v57, %v3329_v33 }
 0x47f   : > { %v4042_v15 = vadd.f32 %v4041_v35, %v4040_v11  ;;  %3675 = vbcast.lane.b32.xlu1 %v7074_v29, 280  ;;  %3679 = vbcast.lane.b32.xlu0 %v7074_v29, 288  ;;  %v4017_v35 = vadd.f32 %v4016_v6, %v4015_v12 }
 0x480   : > { %v4043_v21 = vsel %vm7783_vm10, %v3882_v39, 0.0  ;;  %v4055_v5 = vsel %vm7786_vm13, %v3885_v9, 0.0  ;;  %vm7791_vm10 = vmmov %vm7764_vm7 }
 0x481   : > { %v4044_v46 = vadd.f32 %v4043_v21, %v4042_v15  ;;  %v3322_v48 = vpop.permute.xlu1 %3321  ;;  %v3337_v53 = vpop.permute.xlu0 %3336  ;;  %v5251_v15 = vld [vmem:[%s5486_s17 + $0xa8] sm:$0xff]  }
 0x482   : > { %v3884_v3 = vmul.f32 %v3756_v25, %v3322_v48  ;;  %v3887_v23 = vmul.f32 %v3759_v4, %v3337_v53  ;;  %v3767_v21 = vunpack.c.l.bf16 %v5251_v15  ;;  %v3766_v48 = vunpack.c.h.bf16 %v5250_v54 }
 0x483   : > { %v4046_v45 = vadd.f32 %v4045_v40, %v4044_v46  ;;  %3549 = vbcast.lane.b32.xlu1 %v7056_v63, 296  ;;  %3553 = vbcast.lane.b32.xlu0 %v7056_v63, 304 }
 0x484   : > { %v4047_v17 = vsel %vm7785_vm12, %v3884_v3, 0.0  ;;  %v4058_v16 = vsel %vm7788_vm15, %v3887_v23, 0.0  ;;  %vm7793_vm12 = vmmov %vm7764_vm7 }
 0x485   : > { %v4048_v22 = vadd.f32 %v4047_v17, %v4046_v45  ;;  %v3333_v60 = vpop.permute.xlu1 %3332  ;;  %v3345_v56 = vpop.permute.xlu0 %3344 }
 0x486   : > { %v3886_v2 = vmul.f32 %v3758_v10, %v3333_v60  ;;  %v3889_v7 = vmul.f32 %v3761_v61, %v3345_v56  ;;  %v5252_v10 = vld [vmem:[%s5486_s17 + $0xb0] sm:$0xff]   ;;  %v3768_v60 = vunpack.c.h.bf16 %v5251_v15  ;;  %v5253_v61 = vld [vmem:[%s5486_s17 + $0xb8] sm:$0xff]  }
 0x487   : > { %v4049_v20 = vrot.slane %v4048_v22, 4  ;;  %3616 = vbcast.lane.b32.xlu1 %v7067_v18, 296  ;;  %3620 = vbcast.lane.b32.xlu0 %v7067_v18, 304  ;;  %v3769_v45 = vunpack.c.l.bf16 %v5252_v10 }
 0x488   : > { %v4056_v14 = vsel %vm7787_vm14, %v3886_v2, 0.0  ;;  %v4062_v34 = vsel %vm7789_vm8, %v3889_v7, 0.0 }
 0x489   : > { %v4050_v28 = vadd.f32 %v4049_v20, %v4048_v22  ;;  %v4057_v52 = vadd.f32 %v4056_v14, %v4055_v5  ;;  %v3341_v36 = vpop.permute.xlu1 %3340  ;;  %v3353_v55 = vpop.permute.xlu0 %3352 }
 0x48a   : > { %v3888_v8 = vmul.f32 %v3760_v27, %v3341_v36  ;;  %v3891_v51 = vmul.f32 %v3763_v50, %v3353_v55  ;;  %v3771_v27 = vunpack.c.l.bf16 %v5253_v61 }
 0x48b   : > { %v4051_v26 = vrot.slane %v4050_v28, 2  ;;  %v4059_v43 = vadd.f32 %v4058_v16, %v4057_v52  ;;  %3683 = vbcast.lane.b32.xlu1 %v7074_v29, 296  ;;  %3687 = vbcast.lane.b32.xlu0 %v7074_v29, 304 }
 0x48c   : > { %v4060_v47 = vsel %vm7764_vm7, %v3888_v8, 0.0  ;;  %v4066_v57 = vsel %vm7791_vm10, %v3891_v51, 0.0 }
 0x48d   : > { %v4052_v62 = vadd.f32 %v4051_v26, %v4050_v28  ;;  %v4061_v0 = vadd.f32 %v4060_v47, %v4059_v43  ;;  %v3349_v37 = vpop.permute.xlu1 %3348  ;;  %v3361_v1 = vpop.permute.xlu0 %3360  ;;  %v3770_v28 = vunpack.c.h.bf16 %v5252_v10  ;;  %v5254_v47 = vld [vmem:[%s5486_s17 + $0xc0] sm:$0xff]  }
 0x48e   : > { %v3890_v38 = vmul.f32 %v3762_v13, %v3349_v37  ;;  %v3893_v24 = vmul.f32 %v3765_v30, %v3361_v1  ;;  %v3772_v13 = vunpack.c.h.bf16 %v5253_v61  ;;  %v3773_v6 = vunpack.c.l.bf16 %v5254_v47  ;;  %v5255_v1 = vld [vmem:[%s5486_s17 + $0xc8] sm:$0xff]  }
 0x48f   : > { %v4053_v11 = vrot.slane %v4052_v62, 1  ;;  %v4063_v31 = vadd.f32 %v4062_v34, %v4061_v0  ;;  %3557 = vbcast.lane.b32.xlu1 %v7056_v63, 312  ;;  %3561 = vbcast.lane.b32.xlu0 %v7056_v63, 320  ;;  %v3775_v34 = vunpack.c.l.bf16 %v5255_v1  ;;  %v3774_v51 = vunpack.c.h.bf16 %v5254_v47 }
 0x490   : > { %v4064_v33 = vsel %vm7790_vm9, %v3890_v38, 0.0  ;;  %v4070_v17 = vsel %vm7793_vm12, %v3893_v24, 0.0 }
 0x491   : > { %v4054_v42 = vadd.f32 %v4053_v11, %v4052_v62  ;;  %v4065_v39 = vadd.f32 %v4064_v33, %v4063_v31  ;;  %v3357_v25 = vpop.permute.xlu1 %3356  ;;  %v3369_v49 = vpop.permute.xlu0 %3368 }
 0x492   : > { %v3892_v46 = vmul.f32 %v3764_v59, %v3357_v25  ;;  %v3895_v41 = vmul.f32 %v3767_v21, %v3369_v49  ;;  %v5256_v25 = vld [vmem:[%s5486_s17 + $0xd0] sm:$0xff]   ;;  %v3776_v21 = vunpack.c.h.bf16 %v5255_v1 }
 0x493   : > { %v7138_v53 = vsel %vm3163_vm0, %v4054_v42, %v4017_v35  ;;  %v4067_v40 = vadd.f32 %v4066_v57, %v4065_v39  ;;  %3624 = vbcast.lane.b32.xlu1 %v7067_v18, 312  ;;  %3628 = vbcast.lane.b32.xlu0 %v7067_v18, 320  ;;  %vm7794_vm0 = vmmov %vm7764_vm7  ;;  %v3777_v15 = vunpack.c.l.bf16 %v5256_v25 }
 0x494   : > { %v4068_v3 = vsel %vm7792_vm11, %v3892_v46, 0.0  ;;  %vm7795_vm13 = vmmov %vm7794_vm0 }
 0x495   : > { %v4069_v58 = vadd.f32 %v4068_v3, %v4067_v40  ;;  %v3365_v4 = vpop.permute.xlu1 %3364  ;;  %v3377_v9 = vpop.permute.xlu0 %3376  ;;  %v4074_v5 = vsel %vm7795_vm13, %v3895_v41, 0.0  ;;  %vm7796_vm14 = vmmov %vm7794_vm0  ;;  %v5257_v3 = vld [vmem:[%s5486_s17 + $0xd8] sm:$0xff]  }
 0x496   : > { %v3894_v22 = vmul.f32 %v3766_v48, %v3365_v4  ;;  %v3897_v14 = vmul.f32 %v3769_v45, %v3377_v9  ;;  %vm7797_vm15 = vmmov %vm7794_vm0 }
 0x497   : > { %v4071_v56 = vadd.f32 %v4070_v17, %v4069_v58  ;;  %3691 = vbcast.lane.b32.xlu1 %v7074_v29, 312  ;;  %3695 = vbcast.lane.b32.xlu0 %v7074_v29, 320  ;;  %vm7798_vm7 = vmmov %vm7794_vm0  ;;  %v3779_v58 = vunpack.c.l.bf16 %v5257_v3  ;;  %v3778_v17 = vunpack.c.h.bf16 %v5256_v25 }
 0x498   : > { %v4072_v23 = vsel %vm7794_vm0, %v3894_v22, 0.0  ;;  %v4078_v16 = vsel %vm7797_vm15, %v3897_v14, 0.0  ;;  %vm7799_vm8 = vmmov %vm7794_vm0 }
 0x499   : > { %v4073_v2 = vadd.f32 %v4072_v23, %v4071_v56  ;;  %v3373_v44 = vpop.permute.xlu1 %3372  ;;  %v3385_v20 = vpop.permute.xlu0 %3384  ;;  %vm7800_vm9 = vmmov %vm7794_vm0 }
 0x49a   : > { %v3896_v12 = vmul.f32 %v3768_v60, %v3373_v44  ;;  %v3899_v7 = vmul.f32 %v3771_v27, %v3385_v20  ;;  %vm7801_vm10 = vmmov %vm7794_vm0  ;;  %v5258_v44 = vld [vmem:[%s5486_s17 + $0xe0] sm:$0xff]  }
 0x49b   : > { %v4075_v52 = vadd.f32 %v4074_v5, %v4073_v2  ;;  %3565 = vbcast.lane.b32.xlu1 %v7056_v63, 328  ;;  %3569 = vbcast.lane.b32.xlu0 %v7056_v63, 336  ;;  %vm7802_vm11 = vmmov %vm7794_vm0  ;;  %v3781_v61 = vunpack.c.l.bf16 %v5258_v44  ;;  %v3782_v47 = vunpack.c.h.bf16 %v5258_v44 }
 0x49c   : > { %v4076_v36 = vsel %vm7796_vm14, %v3896_v12, 0.0  ;;  %v4082_v54 = vsel %vm7799_vm8, %v3899_v7, 0.0  ;;  %vm7803_vm12 = vmmov %vm7794_vm0  ;;  %v3780_v12 = vunpack.c.h.bf16 %v5257_v3 }
 0x49d   : > { %v4077_v19 = vadd.f32 %v4076_v36, %v4075_v52  ;;  %v3381_v50 = vpop.permute.xlu1 %3380  ;;  %v3396_v55 = vpop.permute.xlu0 %3395  ;;  %vm7804_vm13 = vmmov %vm7794_vm0 }
 0x49e   : > { %v3898_v8 = vmul.f32 %v3770_v28, %v3381_v50  ;;  %v3901_v59 = vmul.f32 %v3773_v6, %v3396_v55  ;;  %vm7805_vm14 = vmmov %vm7794_vm0 }
 0x49f   : > { %v4079_v26 = vadd.f32 %v4078_v16, %v4077_v19  ;;  %3632 = vbcast.lane.b32.xlu1 %v7067_v18, 328  ;;  %3506 = vbcast.lane.b32.xlu0 %v7028_v32, 344  ;;  %v5259_v16 = vld [vmem:[%s5486_s17 + $0xe8] sm:$0xff]   ;;  %vm7806_vm15 = vmmov %vm7794_vm0 }
 0x4a0   : > { %v4080_v43 = vsel %vm7798_vm7, %v3898_v8, 0.0  ;;  %v4092_v57 = vsel %vm7801_vm10, %v3901_v59, 0.0  ;;  %v3783_v7 = vunpack.c.l.bf16 %v5259_v16  ;;  %vm7807_vm7 = vmmov %vm7794_vm0 }
 0x4a1   : > { %v4081_v62 = vadd.f32 %v4080_v43, %v4079_v26  ;;  %v3389_v0 = vpop.permute.xlu1 %3388  ;;  %v3404_v37 = vpop.permute.xlu0 %3403  ;;  %vm7808_vm8 = vmmov %vm7794_vm0 }
 0x4a2   : > { %v3900_v30 = vmul.f32 %v3772_v13, %v3389_v0  ;;  %v3903_v42 = vmul.f32 %v3775_v34, %v3404_v37  ;;  %vm7811_vm10 = vmmov %vm7794_vm0 }
 0x4a3   : > { %v4083_v38 = vadd.f32 %v4082_v54, %v4081_v62  ;;  %3699 = vbcast.lane.b32.xlu1 %v7074_v29, 328  ;;  %3573 = vbcast.lane.b32.xlu0 %v7056_v63, 344 }
 0x4a4   : > { %v4084_v11 = vsel %vm7800_vm9, %v3900_v30, 0.0  ;;  %v4095_v10 = vsel %vm7803_vm12, %v3903_v42, 0.0  ;;  %v5260_v30 = vld [vmem:[%s5486_s17 + $0xf0] sm:$0xff]   ;;  %v5261_v42 = vld [vmem:[%s5486_s17 + $0xf8] sm:$0xff]   ;;  %vm7810_vm9 = vmmov %vm7794_vm0 }
 0x4a5   : > { %v4085_v31 = vadd.f32 %v4084_v11, %v4083_v38  ;;  %v3400_v33 = vpop.permute.xlu1 %3399  ;;  %v3412_v35 = vpop.permute.xlu0 %3411  ;;  %v3785_v1 = vunpack.c.l.bf16 %v5260_v30  ;;  %v3784_v11 = vunpack.c.h.bf16 %v5259_v16  ;;  %vm7813_vm12 = vmmov %vm7794_vm0 }
 0x4a6   : > { %v3902_v39 = vmul.f32 %v3774_v51, %v3400_v33  ;;  %v3905_v45 = vmul.f32 %v3777_v15, %v3412_v35 }
 0x4a7   : > { %v4086_v49 = vrot.slane %v4085_v31, 4  ;;  %3636 = vbcast.lane.b32.xlu1 %v7067_v18, 336  ;;  %3510 = vbcast.lane.b32.xlu0 %v7028_v32, 352 }
 0x4a8   : > { %v4093_v24 = vsel %vm7802_vm11, %v3902_v39, 0.0  ;;  %v4099_v20 = vsel %vm7804_vm13, %v3905_v45, 0.0  ;;  %v3787_v39 = vunpack.c.l.bf16 %v5261_v42  ;;  %vm7812_vm11 = vmmov %vm7794_vm0  ;;  %v3788_v45 = vunpack.c.h.bf16 %v5261_v42 }
 0x4a9   : > { %v4087_v46 = vadd.f32 %v4086_v49, %v4085_v31  ;;  %v4094_v48 = vadd.f32 %v4093_v24, %v4092_v57  ;;  %v3408_v40 = vpop.permute.xlu1 %3407  ;;  %v3420_v4 = vpop.permute.xlu0 %3419  ;;  %v3786_v57 = vunpack.c.h.bf16 %v5260_v30  ;;  %vm7814_vm13 = vmmov %vm7794_vm0 }
 0x4aa   : > { %v3904_v9 = vmul.f32 %v3776_v21, %v3408_v40  ;;  %v3907_v5 = vmul.f32 %v3779_v58, %v3420_v4 }
 0x4ab   : > { %v4088_v41 = vrot.slane %v4087_v46, 2  ;;  %v4096_v22 = vadd.f32 %v4095_v10, %v4094_v48  ;;  %3703 = vbcast.lane.b32.xlu1 %v7074_v29, 336  ;;  %3577 = vbcast.lane.b32.xlu0 %v7056_v63, 352 }
 0x4ac   : > { %v4097_v60 = vsel %vm7794_vm0, %v3904_v9, 0.0  ;;  %v4103_v13 = vsel %vm7806_vm15, %v3907_v5, 0.0  ;;  %vm7816_vm15 = vmmov %vm7794_vm0 }
 0x4ad   : > { %v4089_v56 = vadd.f32 %v4088_v41, %v4087_v46  ;;  %v4098_v23 = vadd.f32 %v4097_v60, %v4096_v22  ;;  %v3416_v2 = vpop.permute.xlu1 %3415  ;;  %v3428_v27 = vpop.permute.xlu0 %3427  ;;  %v5262_v41 = vld [vmem:[%s5486_s17 + $0x100] sm:$0xff]  }
 0x4ae   : > { %v3906_v14 = vmul.f32 %v3778_v17, %v3416_v2  ;;  %v3909_v26 = vmul.f32 %v3781_v61, %v3428_v27  ;;  %v3789_v22 = vunpack.c.l.bf16 %v5262_v41  ;;  %v5263_v61 = vld [vmem:[%s5486_s17 + $0x108] sm:$0xff]  }
 0x4af   : > { %v4090_v28 = vrot.slane %v4089_v56, 1  ;;  %v4100_v52 = vadd.f32 %v4099_v20, %v4098_v23  ;;  %3640 = vbcast.lane.b32.xlu1 %v7067_v18, 344  ;;  %3514 = vbcast.lane.b32.xlu0 %v7028_v32, 360  ;;  %v3791_v27 = vunpack.c.l.bf16 %v5263_v61  ;;  %v3790_v20 = vunpack.c.h.bf16 %v5262_v41  ;;  %v5268_v41 = vld [vmem:[%s5486_s17 + $0x140] sm:$0xff]  }
 0x4b0   : > { %v4101_v36 = vsel %vm7805_vm14, %v3906_v14, 0.0  ;;  %v4107_v51 = vsel %vm7808_vm8, %v3909_v26, 0.0  ;;  %v3792_v16 = vunpack.c.h.bf16 %v5263_v61  ;;  %vm7815_vm14 = vmmov %vm7794_vm0 }
 0x4b1   : > { %v4091_v19 = vadd.f32 %v4090_v28, %v4089_v56  ;;  %v4102_v50 = vadd.f32 %v4101_v36, %v4100_v52  ;;  %v3424_v55 = vpop.permute.xlu1 %3423  ;;  %v3436_v8 = vpop.permute.xlu0 %3435  ;;  %vm7818_vm8 = vmmov %vm7794_vm0 }
 0x4b2   : > { %v3908_v43 = vmul.f32 %v3780_v12, %v3424_v55  ;;  %v3911_v38 = vmul.f32 %v3783_v7, %v3436_v8 }
 0x4b3   : > { %v7182_v6 = vsel %vm3165_vm1, %v4091_v19, %v7138_v53  ;;  %v4104_v62 = vadd.f32 %v4103_v13, %v4102_v50  ;;  %3707 = vbcast.lane.b32.xlu1 %v7074_v29, 344  ;;  %3581 = vbcast.lane.b32.xlu0 %v7056_v63, 360  ;;  %vm7809_vm1 = vmmov %vm7794_vm0  ;;  %v5264_v50 = vld [vmem:[%s5486_s17 + $0x110] sm:$0xff]  }
 0x4b4   : > { %v4105_v0 = vsel %vm7807_vm7, %v3908_v43, 0.0  ;;  %v4111_v15 = vsel %vm7810_vm9, %v3911_v38, 0.0  ;;  %v3793_v55 = vunpack.c.l.bf16 %v5264_v50  ;;  %vm7817_vm7 = vmmov %vm7794_vm0 }
 0x4b5   : > { %v4106_v37 = vadd.f32 %v4105_v0, %v4104_v62  ;;  %v3432_v54 = vpop.permute.xlu1 %3431  ;;  %v3444_v34 = vpop.permute.xlu0 %3443  ;;  %vm7820_vm9 = vmmov %vm7794_vm0 }
 0x4b6   : > { %v3910_v59 = vmul.f32 %v3782_v47, %v3432_v54  ;;  %v3913_v21 = vmul.f32 %v3785_v1, %v3444_v34  ;;  %v5265_v47 = vld [vmem:[%s5486_s17 + $0x118] sm:$0xff]   ;;  %v3794_v1 = vunpack.c.h.bf16 %v5264_v50 }
 0x4b7   : > { %v4108_v53 = vadd.f32 %v4107_v51, %v4106_v37  ;;  %3644 = vbcast.lane.b32.xlu1 %v7067_v18, 352  ;;  %3518 = vbcast.lane.b32.xlu0 %v7028_v32, 368  ;;  %v3795_v62 = vunpack.c.l.bf16 %v5265_v47 }
 0x4b8   : > { %v4109_v31 = vsel %vm7809_vm1, %v3910_v59, 0.0  ;;  %v4115_v58 = vsel %vm7812_vm11, %v3913_v21, 0.0  ;;  %vm7819_vm1 = vmmov %vm7794_vm0 }
 0x4b9   : > { %v4110_v33 = vadd.f32 %v4109_v31, %v4108_v53  ;;  %v3440_v35 = vpop.permute.xlu1 %3439  ;;  %v3452_v25 = vpop.permute.xlu0 %3451  ;;  %v7217_v53 = vld [vmem:[%s5486_s17 + $0x120] sm:$0xff]   ;;  %vm7822_vm11 = vmmov %vm7794_vm0 }
 0x4ba   : > { %v3912_v49 = vmul.f32 %v3784_v11, %v3440_v35  ;;  %v3915_v4 = vmul.f32 %v3787_v39, %v3452_v25  ;;  %v3797_v31 = vunpack.c.l.bf16 %v7217_v53  ;;  %v3796_v25 = vunpack.c.h.bf16 %v5265_v47 }
 0x4bb   : > { %v4112_v24 = vadd.f32 %v4111_v15, %v4110_v33  ;;  %3711 = vbcast.lane.b32.xlu1 %v7074_v29, 352  ;;  %3585 = vbcast.lane.b32.xlu0 %v7056_v63, 368 }
 0x4bc   : > { %v4113_v46 = vsel %vm7811_vm10, %v3912_v49, 0.0  ;;  %v4119_v2 = vsel %vm7794_vm0, %v3915_v4, 0.0  ;;  %vm7821_vm10 = vmmov %vm7794_vm0 }
 0x4bd   : > { %v4114_v48 = vadd.f32 %v4113_v46, %v4112_v24  ;;  %v3448_v40 = vpop.permute.xlu1 %3447  ;;  %v3463_v3 = vpop.permute.xlu0 %3462 }
 0x4be   : > { %v3914_v10 = vmul.f32 %v3786_v57, %v3448_v40 }
 0x4bf   : > { %v4116_v9 = vadd.f32 %v4115_v58, %v4114_v48  ;;  %3648 = vbcast.lane.b32.xlu1 %v7067_v18, 360  ;;  %3522 = vbcast.lane.b32.xlu0 %v7028_v32, 376  ;;  %v3917_v32 = vmul.f32 %v3789_v22, %v3463_v3  ;;  %v7224_v48 = vld [vmem:[%s5486_s17 + $0x128] sm:$0xff]   ;;  %v3806_v22 = vunpack.c.h.bf16 %v5268_v41 }
 0x4c0   : > { %v4117_v17 = vsel %vm7813_vm12, %v3914_v10, 0.0  ;;  %v3799_v40 = vunpack.c.l.bf16 %v7224_v48 }
 0x4c1   : > { %v4118_v60 = vadd.f32 %v4117_v17, %v4116_v9  ;;  %v3456_v56 = vpop.permute.xlu1 %3455  ;;  %v3471_v23 = vpop.permute.xlu0 %3470  ;;  %v4129_v8 = vsel %vm7815_vm14, %v3917_v32, 0.0 }
 0x4c2   : > { %v3916_v44 = vmul.f32 %v3788_v45, %v3456_v56  ;;  %v3919_v36 = vmul.f32 %v3791_v27, %v3471_v23 }
 0x4c3   : > { %v4120_v5 = vadd.f32 %v4119_v2, %v4118_v60  ;;  %3715 = vbcast.lane.b32.xlu1 %v7074_v29, 360  ;;  %3589 = vbcast.lane.b32.xlu0 %v7056_v63, 376 }
 0x4c4   : > { %v4121_v14 = vsel %vm7814_vm13, %v3916_v44, 0.0  ;;  %v4132_v37 = vsel %vm7817_vm7, %v3919_v36, 0.0 }
 0x4c5   : > { %v4122_v12 = vadd.f32 %v4121_v14, %v4120_v5  ;;  %v3467_v28 = vpop.permute.xlu1 %3466  ;;  %v3479_v52 = vpop.permute.xlu0 %3478 }
 0x4c6   : > { %v3918_v19 = vmul.f32 %v3790_v20, %v3467_v28  ;;  %v3921_v54 = vmul.f32 %v3793_v55, %v3479_v52 }
 0x4c7   : > { %v4123_v7 = vrot.slane %v4122_v12, 4  ;;  %3652 = vbcast.lane.b32.xlu1 %v7067_v18, 368  ;;  %3656 = vbcast.lane.b32.xlu0 %v7067_v18, 376 }
 0x4c8   : > { %v4130_v63 = vsel %vm7816_vm15, %v3918_v19, 0.0  ;;  %v4136_v35 = vsel %vm7819_vm1, %v3921_v54, 0.0 }
 0x4c9   : > { %v4124_v13 = vadd.f32 %v4123_v7, %v4122_v12  ;;  %v4131_v26 = vadd.f32 %v4130_v63, %v4129_v8  ;;  %v3475_v43 = vpop.permute.xlu1 %3474  ;;  %v3487_v0 = vpop.permute.xlu0 %3486 }
 0x4ca   : > { %v3920_v30 = vmul.f32 %v3792_v16, %v3475_v43  ;;  %v3923_v42 = vmul.f32 %v3795_v62, %v3487_v0 }
 0x4cb   : > { %v4125_v34 = vrot.slane %v4124_v13, 2  ;;  %v4133_v51 = vadd.f32 %v4132_v37, %v4131_v26  ;;  %3719 = vbcast.lane.b32.xlu1 %v7074_v29, 368 }
 0x4cc   : > { %v4134_v18 = vsel %vm7818_vm8, %v3920_v30, 0.0  ;;  %v4140_v58 = vsel %vm7821_vm10, %v3923_v42, 0.0 }
 0x4cd   : > { %v4126_v38 = vadd.f32 %v4125_v34, %v4124_v13  ;;  %v4135_v59 = vadd.f32 %v4134_v18, %v4133_v51  ;;  %v3483_v11 = vpop.permute.xlu1 %3482  ;;  %v3495_v33 = vpop.permute.xlu0 %3494 }
 0x4ce   : > { %v3922_v39 = vmul.f32 %v3794_v1, %v3483_v11  ;;  %v3925_v4 = vmul.f32 %v3797_v31, %v3495_v33 }
 0x4cf   : > { %v4127_v15 = vrot.slane %v4126_v38, 1  ;;  %v4137_v21 = vadd.f32 %v4136_v35, %v4135_v59  ;;  %3723 = vbcast.lane.b32.xlu1 %v7074_v29, 376  ;;  %v3798_v29 = vunpack.c.h.bf16 %v7217_v53 }
 0x4d0   : > { %v4138_v49 = vsel %vm7820_vm9, %v3922_v39, 0.0 }
 0x4d1   : > { %v4128_v57 = vadd.f32 %v4127_v15, %v4126_v38  ;;  %v4139_v24 = vadd.f32 %v4138_v49, %v4137_v21  ;;  %v3491_v46 = vpop.permute.xlu1 %3490  ;;  %v3503_v3 = vpop.permute.xlu0 %3502 }
 0x4d2   : > { %v3924_v10 = vmul.f32 %v3796_v25, %v3491_v46 }
 0x4d3   : > { %v7240_v45 = vsel %vm3167_vm2, %v4128_v57, %v7182_v6  ;;  %v4141_v9 = vadd.f32 %v4140_v58, %v4139_v24 }
 0x4d4   : > { %v4142_v17 = vsel %vm7822_vm11, %v3924_v10, 0.0 }
 0x4d5   : > { %5307 = shalt.err (!%p5304_p4)
}
 0x4d6   : > { %s5308_s16 = scalar_lea.hbm %s7235_s9, 128  ;;  %s5312_s29 = scalar_lea.hbm %s7655_s5, 256 }
 0x4d7   : > { %p5309_p7 = scmp.ne.s32.totalorder %s7235_s9, %s5308_s16  ;;  %p5313_p10 = scmp.lt.u32.totalorder %s7235_s9, %s7655_s5 }
 0x4d8   : > { %p5314_p11 = scmp.lt.u32.totalorder %s5312_s29, %s5308_s16  ;;  %p5316_p13 = scmp.lt.u32.totalorder %s5308_s16, %s7235_s9 }
 0x4d9   : > { %p5310_p8 = pnand %p5309_p7, %p5466_p5 }
 0x4da   : > { %p5315_p12 = por %p5314_p11, %p5313_p10 }
 0x4db   : > { %p5311_p9 = pneg %p5310_p8 }
 0x4dc   : > { %p5317_p0 = por %p5316_p13, %p5315_p12 }
 0x4de   : > { %p5318_p1 = pnand %p5317_p0, %p5311_p9 }
 0x4e0   : > { %5321 = shalt.err (!%p5318_p1)
}
 0x4e1   : > { %4792 = dma.vmem_to_hbm [thread:$0]  (%p5466_p5), %s7242_s10, 128, %s7235_s9, %s4295_s11   ;;  %v4143_v6 = vadd.f32 %v4142_v17, %v4141_v9  ;;  %v3499_v60 = vpop.permute.xlu1 %3498  ;;  %v3534_v56 = vpop.permute.xlu0 %3533  ;;  %vm7823_vm2 = vmmov %vm7794_vm0  ;;  %v3927_v2 = vmul.f32 %v3799_v40, %v3503_v3  ;;  %v3805_v61 = vunpack.c.l.bf16 %v5268_v41  ;;  %v5269_v32 = vld [vmem:[%s5486_s17 + $0x180] sm:$0xff]   ;;  %v5270_v47 = vld [vmem:[%s5486_s17 + $0x148] sm:$0xff]  }
 0x4e2   : > { %v4144_v23 = vsel %vm7823_vm2, %v3925_v4, 0.0  ;;  %v3926_v44 = vmul.f32 %v3798_v29, %v3499_v60  ;;  %vm7824_vm12 = vmmov %vm7794_vm0  ;;  %v3934_v5 = vmul.f32 %v3806_v22, %v3534_v56  ;;  %v3822_v14 = vunpack.c.h.bf16 %v5269_v32  ;;  %v5271_v54 = vld [vmem:[%s5486_s17 + $0x1c0] sm:$0xff]   ;;  %s7605_s12 = scalar_lea.hbm %s7656_s6, %s4585_s26  ;;  %s4300_s15 = scalar_lea.sflag [#allocation5], %s7001_s18 }
 0x4e3   : > { %v4145_v27 = vadd.f32 %v4144_v23, %v4143_v6  ;;  %v4148_v36 = vsel %vm7794_vm0, %v3927_v2, 0.0  ;;  %v3821_v50 = vunpack.c.l.bf16 %v5269_v32  ;;  %vm7825_vm13 = vmmov %vm7794_vm0  ;;  %v3807_v62 = vunpack.c.l.bf16 %v5270_v47  ;;  %s5392_s25 = smov [#allocation4]  }
 0x4e4   : > { %v4146_v20 = vsel %vm7824_vm12, %v3926_v44, 0.0  ;;  %v4167_v16 = vsel %vm7825_vm13, %v3934_v5, 0.0  ;;  %vm7826_vm14 = vmmov %vm7794_vm0  ;;  %v3837_v30 = vunpack.c.l.bf16 %v5271_v54  ;;  %v3838_v38 = vunpack.c.h.bf16 %v5271_v54  ;;  %v5272_v44 = vld [vmem:[%s5486_s17 + $0x188] sm:$0xff]   ;;  %v5274_v5 = vld [vmem:[%s5486_s17 + $0x150] sm:$0xff]  }
 0x4e5   : > { %v4147_v12 = vadd.f32 %v4146_v20, %v4145_v27  ;;  %v3530_v28 = vpop.permute.xlu1 %3529  ;;  %v3601_v52 = vpop.permute.xlu0 %3600  ;;  %vm7827_vm15 = vmmov %vm7794_vm0  ;;  %v3808_v2 = vunpack.c.h.bf16 %v5270_v47  ;;  %v5273_v27 = vld [vmem:[%s5486_s17 + $0x1c8] sm:$0xff]   ;;  %v3809_v32 = vunpack.c.l.bf16 %v5274_v5 }
 0x4e6   : > { %v3933_v19 = vmul.f32 %v3805_v61, %v3530_v28  ;;  %v3950_v8 = vmul.f32 %v3822_v14, %v3601_v52  ;;  %vm7828_vm7 = vmmov %vm7794_vm0  ;;  %v3823_v61 = vunpack.c.l.bf16 %v5272_v44  ;;  %v3839_v20 = vunpack.c.l.bf16 %v5273_v27 }
 0x4e7   : > { %v7272_v55 = vadd.f32 %v4148_v36, %v4147_v12  ;;  %vm7829_vm8 = vmmov %vm7794_vm0  ;;  %v3824_v52 = vunpack.c.h.bf16 %v5272_v44  ;;  %v7337_v36 = vld [vmem:[%s5486_s17 + $0x190] sm:$0xff]  }
 0x4e8   : > { %v4166_v7 = vsel %vm7826_vm14, %v3933_v19, 0.0  ;;  %v4204_v0 = vsel %vm7827_vm15, %v3950_v8, 0.0  ;;  %vm7830_vm1 = vmmov %vm7794_vm0  ;;  %v3825_v19 = vunpack.c.l.bf16 %v7337_v36  ;;  %v3810_v8 = vunpack.c.h.bf16 %v5274_v5  ;;  %v7393_v5 = vld [vmem:[%s5486_s17 + $0x1a8] sm:$0xff]   ;;  %v7399_v44 = vld [vmem:[%s5486_s17 + $0x130] sm:$0xff]  }
 0x4e9   : > { %v4168_v63 = vadd.f32 %v4167_v16, %v4166_v7  ;;  %v3597_v13 = vpop.permute.xlu1 %3596  ;;  %v3664_v26 = vpop.permute.xlu0 %3663  ;;  %vm7831_vm9 = vmmov %vm7794_vm0  ;;  %v7341_v16 = vld [vmem:[%s5486_s17 + $0x1d0] sm:$0xff]  }
 0x4ea   : > { %v3949_v43 = vmul.f32 %v3821_v50, %v3597_v13  ;;  %v3965_v59 = vmul.f32 %v3837_v30, %v3664_v26  ;;  %v3840_v50 = vunpack.c.h.bf16 %v5273_v27  ;;  %v3841_v7 = vunpack.c.l.bf16 %v7341_v16  ;;  %v7360_v30 = vld [vmem:[%s5486_s17 + $0x160] sm:$0xff]   ;;  %vm7832_vm10 = vmmov %vm7794_vm0  ;;  %v7381_v27 = vld [vmem:[%s5486_s17 + $0x168] sm:$0xff]  }
 0x4eb   : > { %v3826_v26 = vunpack.c.h.bf16 %v7337_v36  ;;  %vm7833_vm11 = vmmov %vm7794_vm0 }
 0x4ec   : > { %v4203_v37 = vsel %vm7828_vm7, %v3949_v43, 0.0  ;;  %v4240_v42 = vsel %vm7830_vm1, %v3965_v59, 0.0  ;;  %v7350_v43 = vld [vmem:[%s5486_s17 + $0x198] sm:$0xff]   ;;  %vm7834_vm2 = vmmov %vm7794_vm0 }
 0x4ed   : > { %v7280_v1 = vadd.f32 %v4204_v0, %v4203_v37  ;;  %v3538_v34 = vpop.permute.xlu1 %3537  ;;  %v7282_v51 = vpop.permute.xlu0 %3604  ;;  %v3827_v47 = vunpack.c.l.bf16 %v7350_v43  ;;  %v7355_v0 = vld [vmem:[%s5486_s17 + $0x1d8] sm:$0xff]   ;;  %vm7835_vm12 = vmmov %vm7794_vm0 }
 0x4ee   : > { %v3935_v18 = vmul.f32 %v3807_v62, %v3538_v34  ;;  %v3842_v62 = vunpack.c.h.bf16 %v7341_v16  ;;  %v3813_v34 = vunpack.c.l.bf16 %v7360_v30  ;;  %vm7836_vm13 = vmmov %vm7794_vm0 }
 0x4ef   : > { %vm7837_vm14 = vmmov %vm7794_vm0 }
 0x4f0   : > { %v4169_v11 = vsel %vm7829_vm8, %v3935_v18, 0.0  ;;  %v3828_v18 = vunpack.c.h.bf16 %v7350_v43  ;;  %vm7838_vm15 = vmmov %vm7794_vm0 }
 0x4f1   : > { %v7285_v53 = vadd.f32 %v4169_v11, %v4168_v63  ;;  %v3668_v31 = vpop.permute.xlu1 %3667  ;;  %v7287_v33 = vpop.permute.xlu0 %3671  ;;  %v7345_v63 = vld [vmem:[%s5486_s17 + $0x158] sm:$0xff]   ;;  %vm7839_vm7 = vmmov %vm7794_vm0 }
 0x4f2   : > { %v3966_v35 = vmul.f32 %v3838_v38, %v3668_v31  ;;  %v3811_v13 = vunpack.c.l.bf16 %v7345_v63  ;;  %v3812_v54 = vunpack.c.h.bf16 %v7345_v63  ;;  %v7365_v38 = vld [vmem:[%s5486_s17 + $0x1a0] sm:$0xff]   ;;  %v3967_v59 = vmul.f32 %v3839_v20, %v7287_v33  ;;  %v7407_v33 = vld [vmem:[%s5486_s17 + $0x1e8] sm:$0xff]   ;;  %v7411_v20 = vld [vmem:[%s5486_s17 + $0x170] sm:$0xff]  }
 0x4f3   : > { %vm7840_vm8 = vmmov %vm7794_vm0 }
 0x4f4   : > { %v4241_v39 = vsel %vm7831_vm9, %v3966_v35, 0.0  ;;  %vm7841_vm1 = vmmov %vm7794_vm0 }
 0x4f5   : > { %v7291_v25 = vadd.f32 %v4241_v39, %v4240_v42  ;;  %v3542_v15 = vpop.permute.xlu1 %3541  ;;  %v7293_v21 = vpop.permute.xlu0 %3545  ;;  %v3951_v42 = vmul.f32 %v3823_v61, %v7282_v51  ;;  %vm7842_vm9 = vmmov %vm7794_vm0 }
 0x4f6   : > { %v3936_v28 = vmul.f32 %v3808_v2, %v3542_v15  ;;  %v7376_v15 = vld [vmem:[%s5486_s17 + $0x1e0] sm:$0xff]   ;;  %v3937_v61 = vmul.f32 %v3809_v32, %v7293_v21 }
 0x4f8   : > { %v4171_v39 = vsel %vm7832_vm10, %v3936_v28, 0.0  ;;  %vm7843_vm10 = vmmov %vm7794_vm0 }
 0x4f9   : > { %v7295_v49 = vpop.permute.xlu1 %3608  ;;  %v7297_v57 = vpop.permute.xlu0 %3612  ;;  %v4172_v37 = vadd.f32 %v4171_v39, %v7285_v53  ;;  %v7422_v53 = vld [vmem:[%s5486_s17 + $0x1b0] sm:$0xff]  }
 0x4fa   : > { %v3952_v28 = vmul.f32 %v3824_v52, %v7295_v49  ;;  %v4206_v49 = vsel %vm7833_vm11, %v3951_v42, 0.0  ;;  %v4173_v42 = vsel %vm7834_vm2, %v3937_v61, 0.0  ;;  %v3953_v51 = vmul.f32 %v3825_v19, %v7297_v57  ;;  %vm7847_vm11 = vmmov %vm7794_vm0 }
 0x4fb   : > { %v4207_v52 = vadd.f32 %v4206_v49, %v7280_v1  ;;  %v4174_v39 = vadd.f32 %v4173_v42, %v4172_v37  ;;  %v7438_v37 = vld [vmem:[%s5486_s17 + $0x138] sm:$0xff]   ;;  %vm7848_vm2 = vmmov %vm7794_vm0 }
 0x4fc   : > { %v3803_v57 = vunpack.c.l.bf16 %v7438_v37 }
 0x4fd   : > { %v7299_v24 = vpop.permute.xlu1 %3675  ;;  %v7301_v46 = vpop.permute.xlu0 %3679 }
 0x4fe   : > { %v3969_v19 = vmul.f32 %v3841_v7, %v7301_v46  ;;  %v3804_v46 = vunpack.c.h.bf16 %v7438_v37 }
 0x501   : > { %v3550_v40 = vpop.permute.xlu1 %3549  ;;  %v7303_v3 = vpop.permute.xlu0 %3553 }
 0x502   : > { %v3938_v2 = vmul.f32 %v3810_v8, %v3550_v40  ;;  %v3968_v40 = vmul.f32 %v3840_v50, %v7299_v24  ;;  %v4208_v24 = vsel %vm7835_vm12, %v3952_v28, 0.0  ;;  %v4243_v8 = vsel %vm7836_vm13, %v3967_v59, 0.0  ;;  %vm7849_vm12 = vmmov %vm7794_vm0 }
 0x503   : > { %v3939_v28 = vmul.f32 %v3811_v13, %v7303_v3  ;;  %v4244_v1 = vadd.f32 %v4243_v8, %v7291_v25  ;;  %v4209_v59 = vadd.f32 %v4208_v24, %v4207_v52  ;;  %v7448_v13 = vld [vmem:[%s5486_s17 + $0x1f0] sm:$0xff]   ;;  %v3834_v52 = vunpack.c.h.bf16 %v7422_v53  ;;  %vm7854_vm13 = vmmov %vm7794_vm0 }
 0x504   : > { %v4175_v50 = vsel %vm7794_vm0, %v3938_v2, 0.0  ;;  %v4245_v2 = vsel %vm7837_vm14, %v3968_v40, 0.0  ;;  %v3850_v7 = vunpack.c.h.bf16 %v7448_v13  ;;  %vm7855_vm14 = vmmov %vm7794_vm0 }
 0x505   : > { %v7305_v58 = vpop.permute.xlu1 %3616  ;;  %v7307_v4 = vpop.permute.xlu0 %3620  ;;  %v4176_v49 = vadd.f32 %v4175_v50, %v4174_v39  ;;  %v4177_v16 = vsel %vm7839_vm7, %v3939_v28, 0.0  ;;  %vm7860_vm7 = vmmov %vm7794_vm0 }
 0x506   : > { %v3954_v21 = vmul.f32 %v3826_v26, %v7305_v58  ;;  %v3849_v58 = vunpack.c.l.bf16 %v7448_v13  ;;  %v4246_v26 = vadd.f32 %v4245_v2, %v4244_v1  ;;  %v3955_v24 = vmul.f32 %v3827_v47, %v7307_v4 }
 0x507   : > { %v4178_v42 = vadd.f32 %v4177_v16, %v4176_v49  ;;  %v4247_v2 = vsel %vm7842_vm9, %v3969_v19, 0.0  ;;  %v7495_v16 = vld [vmem:[%s5486_s17 + $0x1f8] sm:$0xff]   ;;  %vm7865_vm9 = vmmov %vm7794_vm0 }
 0x508   : > { %v4248_v1 = vadd.f32 %v4247_v2, %v4246_v26 }
 0x509   : > { %v7309_v10 = vpop.permute.xlu1 %3683  ;;  %v7311_v29 = vpop.permute.xlu0 %3687 }
 0x50a   : > { %v3970_v3 = vmul.f32 %v3842_v62, %v7309_v10  ;;  %v4210_v10 = vsel %vm7838_vm15, %v3953_v51, 0.0  ;;  %v4212_v62 = vsel %vm7840_vm8, %v3954_v21, 0.0  ;;  %vm7859_vm15 = vmmov %vm7794_vm0 }
 0x50b   : > { %v4211_v39 = vadd.f32 %v4210_v10, %v4209_v59  ;;  %vm7862_vm8 = vmmov %vm7794_vm0 }
 0x50c   : > { %v4249_v51 = vsel %vm7843_vm10, %v3970_v3, 0.0  ;;  %v4214_v3 = vsel %vm7847_vm11, %v3955_v24, 0.0  ;;  %vm7867_vm10 = vmmov %vm7794_vm0 }
 0x50d   : > { %v7313_v9 = vpop.permute.xlu1 %3557  ;;  %v7315_v17 = vpop.permute.xlu0 %3561  ;;  %v4213_v59 = vadd.f32 %v4212_v62, %v4211_v39  ;;  %v4250_v26 = vadd.f32 %v4249_v51, %v4248_v1  ;;  %v3851_v62 = vunpack.c.l.bf16 %v7495_v16  ;;  %v7851_v39 = vunpack.c.l.bf16 %v7399_v44  ;;  %vm7869_vm11 = vmmov %vm7794_vm0 }
 0x50e   : > { %v3940_v11 = vmul.f32 %v3812_v54, %v7313_v9  ;;  %v7452_v9 = vld [vmem:[%s5486_s17 + $0x178] sm:$0xff]   ;;  %v3941_v50 = vmul.f32 %v3813_v34, %v7315_v17  ;;  %v7845_v34 = vunpack.c.l.bf16 %v7355_v0 }
 0x50f   : > { %v3819_v25 = vunpack.c.l.bf16 %v7452_v9  ;;  %v3820_v17 = vunpack.c.h.bf16 %v7452_v9  ;;  %v4215_v24 = vadd.f32 %v4214_v3, %v4213_v59  ;;  %v7857_v59 = vunpack.c.h.bf16 %v7399_v44 }
 0x510   : > { %v4179_v8 = vsel %vm7841_vm1, %v3940_v11, 0.0  ;;  %v7844_v11 = vunpack.c.h.bf16 %v7360_v30  ;;  %v3971_v19 = vmul.f32 %v7845_v34, %v7311_v29  ;;  %v4181_v10 = vsel %vm7848_vm2, %v3941_v50, 0.0  ;;  %vm7864_vm1 = vmmov %vm7794_vm0 }
 0x511   : > { %v7317_v41 = vpop.permute.xlu1 %3624  ;;  %v7319_v22 = vpop.permute.xlu0 %3628  ;;  %v4180_v4 = vadd.f32 %v4179_v8, %v4178_v42  ;;  %v7852_v50 = vunpack.c.h.bf16 %v7355_v0  ;;  %v7863_v44 = vunpack.c.l.bf16 %v7376_v15  ;;  %vm7870_vm2 = vmmov %vm7794_vm0 }
 0x512   : > { %v3956_v21 = vmul.f32 %v3828_v18, %v7317_v41  ;;  %v7846_v41 = vunpack.c.h.bf16 %v7224_v48  ;;  %v7488_v18 = vld [vmem:[%s5486_s17 + $0x1b8] sm:$0xff]   ;;  %v7850_v48 = vunpack.c.l.bf16 %v7365_v38  ;;  %s284_s17 = scalar_lea.vmem [#allocation4], %s4445_s19  ;;  %s5326_s19 = sshll.u32 %s5392_s25, 4  ;;  %s5327_s19 = int_to_ptr.vmem [resolvable:$false] %s5326_s19 }
 0x513   : > { %v3836_v30 = vunpack.c.h.bf16 %v7488_v18  ;;  %v4182_v2 = vadd.f32 %v4181_v10, %v4180_v4  ;;  %v7858_v10 = vunpack.c.h.bf16 %v7365_v38  ;;  %s4326_s9 = sshll.u32 %s284_s17, 4  ;;  %s5328_s26 = scalar_lea.vmem %s5327_s19, 256  ;;  %s7607_s9 = int_to_ptr.vmem [resolvable:$true] %s4326_s9 }
 0x514   : > { %v4216_v29 = vsel %vm7849_vm12, %v3956_v21, 0.0  ;;  %vm7872_vm12 = vmmov %vm7794_vm0  ;;  %s5322_s16 = scalar_lea.vmem %s7607_s9, 128  ;;  %p5329_p7 = scmp.lt.s32.totalorder %s7607_s9, %s5327_s19 }
 0x515   : > { %v7321_v6 = vpop.permute.xlu1 %3691  ;;  %v7323_v60 = vpop.permute.xlu0 %3695  ;;  %v4217_v0 = vadd.f32 %v4216_v29, %v4215_v24  ;;  %p5323_p2 = scmp.ne.s32.totalorder %s7607_s9, %s5322_s16  ;;  %p5330_p8 = scmp.lt.s32.totalorder %s5328_s26, %s5322_s16 }
 0x516   : > { %v3972_v51 = vmul.f32 %v7852_v50, %v7321_v6 }
 0x517   : > { %p5324_p3 = pnand %p5323_p2, %p5466_p5  ;;  %p5331_p9 = por %p5330_p8, %p5329_p7 }
 0x519   : > { %v7325_v56 = vpop.permute.xlu1 %3565  ;;  %v7327_v23 = vpop.permute.xlu0 %3569  ;;  %p5325_p4 = pneg %p5324_p3 }
 0x51a   : > { %v3942_v28 = vmul.f32 %v7844_v11, %v7325_v56  ;;  %v3835_v56 = vunpack.c.l.bf16 %v7488_v18  ;;  %v7853_v11 = vunpack.c.l.bf16 %v7381_v27 }
 0x51b   : > { %p5332_p10 = pnand %p5331_p9, %p5325_p4 }
 0x51c   : > { %v4183_v8 = vsel %vm7794_vm0, %v3942_v28, 0.0  ;;  %v3943_v21 = vmul.f32 %v7853_v11, %v7327_v23  ;;  %v7871_v11 = vunpack.c.h.bf16 %v7393_v5 }
 0x51d   : > { %v7332_v14 = vpop.permute.xlu1 %3632  ;;  %v7334_v12 = vpop.permute.xlu0 %3506  ;;  %v4184_v6 = vadd.f32 %v4183_v8, %v4182_v2  ;;  %v7866_v8 = vunpack.c.l.bf16 %v7393_v5  ;;  %v7875_v5 = vunpack.c.l.bf16 %v7422_v53 }
 0x51e   : > { %v3928_v43 = vmul.f32 %v7846_v41, %v7334_v12  ;;  %v3957_v12 = vmul.f32 %v7850_v48, %v7319_v22  ;;  %v4251_v22 = vsel %vm7854_vm13, %v3971_v19, 0.0  ;;  %v7856_v41 = vunpack.c.h.bf16 %v7381_v27  ;;  %vm7874_vm13 = vmmov %vm7794_vm0 }
 0x51f   : > { %v4252_v3 = vadd.f32 %v4251_v22, %v4250_v26  ;;  %v3958_v23 = vmul.f32 %v7858_v10, %v7332_v14  ;;  %v4185_v26 = vsel %vm7864_vm1, %v3943_v21, 0.0  ;;  %vm7881_vm1 = vmmov %vm7794_vm0 }
 0x520   : > { %v4150_v28 = vsel %vm7855_vm14, %v3928_v43, 0.0  ;;  %v4218_v48 = vsel %vm7859_vm15, %v3957_v12, 0.0  ;;  %v7861_v43 = vunpack.c.l.bf16 %v7411_v20  ;;  %v4186_v50 = vadd.f32 %v4185_v26, %v4184_v6  ;;  %vm7877_vm14 = vmmov %vm7794_vm0 }
 0x521   : > { %v7369_v31 = vpop.permute.xlu1 %3699  ;;  %v7371_v35 = vpop.permute.xlu0 %3573  ;;  %v4151_v38 = vadd.f32 %v4150_v28, %v7272_v55  ;;  %v4219_v2 = vadd.f32 %v4218_v48, %v4217_v0  ;;  %vm7878_vm15 = vmmov %vm7794_vm0 }
 0x525   : > { %v7396_v63 = vpop.permute.xlu1 %3636  ;;  %v7402_v32 = vpop.permute.xlu0 %3510 }
 0x526   : > { %v3929_v42 = vmul.f32 %v7851_v39, %v7402_v32  ;;  %v3944_v32 = vmul.f32 %v7856_v41, %v7371_v35  ;;  %v4253_v35 = vsel %vm7862_vm8, %v3972_v51, 0.0  ;;  %vm7880_vm8 = vmmov %vm7794_vm0 }
 0x527   : > { %v4254_v22 = vadd.f32 %v4253_v35, %v4252_v3  ;;  %v7876_v3 = vunpack.c.l.bf16 %v7407_v33 }
 0x528   : > { %v4152_v19 = vsel %vm7860_vm7, %v3929_v42, 0.0  ;;  %v4187_v12 = vsel %vm7865_vm9, %v3944_v32, 0.0  ;;  %v3959_v42 = vmul.f32 %v7866_v8, %v7396_v63  ;;  %vm7879_vm7 = vmmov %vm7794_vm0 }
 0x529   : > { %v7428_v36 = vpop.permute.xlu1 %3703  ;;  %v7430_v61 = vpop.permute.xlu0 %3577  ;;  %v4153_v51 = vadd.f32 %v4152_v19, %v4151_v38  ;;  %v4188_v28 = vadd.f32 %v4187_v12, %v4186_v50  ;;  %vm7883_vm9 = vmmov %vm7794_vm0 }
 0x52a   : > { %v3945_v39 = vmul.f32 %v7861_v43, %v7430_v61 }
 0x52c   : > { %v4189_v55 = vsel %vm7870_vm2, %v3945_v39, 0.0  ;;  %vm7886_vm2 = vmmov %vm7794_vm0 }
 0x52d   : > { %v7455_v54 = vpop.permute.xlu1 %3640  ;;  %v3515_v40 = vpop.permute.xlu0 %3514 }
 0x52e   : > { %v3930_v4 = vmul.f32 %v7857_v59, %v3515_v40  ;;  %v3973_v40 = vmul.f32 %v7863_v44, %v7323_v60  ;;  %v4220_v60 = vsel %vm7869_vm11, %v3958_v23, 0.0  ;;  %v3960_v21 = vmul.f32 %v7871_v11, %v7455_v54  ;;  %vm7885_vm11 = vmmov %vm7794_vm0 }
 0x52f   : > { %v7882_v44 = vunpack.c.h.bf16 %v7407_v33 }
 0x530   : > { %v4154_v61 = vsel %vm7867_vm10, %v3930_v4, 0.0  ;;  %v4222_v4 = vsel %vm7794_vm0, %v3959_v42, 0.0  ;;  %v4224_v23 = vsel %vm7877_vm14, %v3960_v21, 0.0  ;;  %vm7884_vm10 = vmmov %vm7794_vm0 }
 0x531   : > { %v7478_v47 = vpop.permute.xlu1 %3707  ;;  %v3582_v49 = vpop.permute.xlu0 %3581  ;;  %v4155_v41 = vadd.f32 %v4154_v61, %v4153_v51  ;;  %vm7889_vm14 = vmmov %vm7794_vm0 }
 0x532   : > { %v3976_v26 = vmul.f32 %v7882_v44, %v7478_v47 }
 0x535   : > { %v3645_v1 = vpop.permute.xlu1 %3644  ;;  %v3519_v34 = vpop.permute.xlu0 %3518 }
 0x536   : > { %v3931_v27 = vmul.f32 %v3803_v57, %v3519_v34  ;;  %v7868_v57 = vunpack.c.h.bf16 %v7411_v20  ;;  %v7873_v20 = vunpack.c.h.bf16 %v7376_v15  ;;  %v3961_v54 = vmul.f32 %v7875_v5, %v3645_v1 }
 0x537   : > { %v3975_v15 = vmul.f32 %v7876_v3, %v7428_v36  ;;  %v4255_v1 = vsel %vm7880_vm8, %v3973_v40, 0.0  ;;  %vm7892_vm8 = vmmov %vm7794_vm0 }
 0x538   : > { %v3946_v24 = vmul.f32 %v7868_v57, %v3582_v49  ;;  %v4156_v34 = vsel %vm7872_vm12, %v3931_v27, 0.0  ;;  %v3974_v49 = vmul.f32 %v7873_v20, %v7369_v31  ;;  %v4190_v31 = vadd.f32 %v4189_v55, %v4188_v28  ;;  %vm7887_vm12 = vmmov %vm7794_vm0 }
 0x539   : > { %v3712_v14 = vpop.permute.xlu1 %3711  ;;  %v3586_v29 = vpop.permute.xlu0 %3585  ;;  %v4157_v10 = vadd.f32 %v4156_v34, %v4155_v41  ;;  %v4226_v38 = vsel %vm7883_vm9, %v3961_v54, 0.0  ;;  %v4259_v8 = vsel %vm7884_vm10, %v3975_v15, 0.0 }
 0x53a   : > { %v3947_v63 = vmul.f32 %v3819_v25, %v3586_v29  ;;  %v4191_v0 = vsel %vm7874_vm13, %v3946_v24, 0.0  ;;  %v4221_v25 = vadd.f32 %v4220_v60, %v4219_v2  ;;  %v4257_v36 = vsel %vm7881_vm1, %v3974_v49, 0.0  ;;  %vm7888_vm13 = vmmov %vm7794_vm0 }
 0x53b   : > { %v3977_v42 = vmul.f32 %v3849_v58, %v3712_v14 }
 0x53c   : > { %v4193_v48 = vsel %vm7878_vm15, %v3947_v63, 0.0  ;;  %v4223_v37 = vadd.f32 %v4222_v4, %v4221_v25  ;;  %vm7890_vm15 = vmmov %vm7794_vm0 }
 0x53d   : > { %v3649_v32 = vpop.permute.xlu1 %3648  ;;  %v3523_v59 = vpop.permute.xlu0 %3522  ;;  %v4263_v34 = vsel %vm7794_vm0, %v3977_v42, 0.0 }
 0x53e   : > { %v3932_v6 = vmul.f32 %v3804_v46, %v3523_v59  ;;  %v3962_v19 = vmul.f32 %v3834_v52, %v3649_v32  ;;  %v4192_v46 = vadd.f32 %v4191_v0, %v4190_v31  ;;  %v4256_v52 = vadd.f32 %v4255_v1, %v4254_v22 }
 0x53f   : > { %v4225_v29 = vadd.f32 %v4224_v23, %v4223_v37 }
 0x540   : > { %v4158_v43 = vsel %vm7879_vm7, %v3932_v6, 0.0  ;;  %v4194_v12 = vadd.f32 %v4193_v48, %v4192_v46  ;;  %v4228_v61 = vsel %vm7885_vm11, %v3962_v19, 0.0  ;;  %v4258_v33 = vadd.f32 %v4257_v36, %v4256_v52  ;;  %vm7891_vm7 = vmmov %vm7794_vm0 }
 0x541   : > { %v4159_v39 = vadd.f32 %v4158_v43, %v4157_v10  ;;  %v3716_v27 = vpop.permute.xlu1 %3715  ;;  %v3590_v35 = vpop.permute.xlu0 %3589  ;;  %v4227_v47 = vadd.f32 %v4226_v38, %v4225_v29 }
 0x542   : > { %v3948_v53 = vmul.f32 %v3820_v17, %v3590_v35  ;;  %v4261_v17 = vsel %vm7887_vm12, %v3976_v26, 0.0  ;;  %v3978_v60 = vmul.f32 %v3850_v7, %v3716_v27  ;;  %v4260_v14 = vadd.f32 %v4259_v8, %v4258_v33 }
 0x543   : > { %v4160_v40 = vrot.slane %v4159_v39, 4  ;;  %v4229_v55 = vadd.f32 %v4228_v61, %v4227_v47 }
 0x544   : > { %v4195_v57 = vsel %vm7886_vm2, %v3948_v53, 0.0  ;;  %v4262_v22 = vadd.f32 %v4261_v17, %v4260_v14  ;;  %v4265_v7 = vsel %vm7889_vm14, %v3978_v60, 0.0 }
 0x545   : > { %v4161_v24 = vadd.f32 %v4160_v40, %v4159_v39  ;;  %v4196_v2 = vadd.f32 %v4195_v57, %v4194_v12  ;;  %v3653_v50 = vpop.permute.xlu1 %3652  ;;  %v3657_v9 = vpop.permute.xlu0 %3656 }
 0x546   : > { %v3963_v51 = vmul.f32 %v3835_v56, %v3653_v50  ;;  %v3964_v58 = vmul.f32 %v3836_v30, %v3657_v9  ;;  %v3852_v30 = vunpack.c.h.bf16 %v7495_v16  ;;  %v4264_v41 = vadd.f32 %v4263_v34, %v4262_v22 }
 0x547   : > { %v4162_v11 = vrot.slane %v4161_v24, 2  ;;  %v4197_v21 = vrot.slane %v4196_v2, 4 }
 0x548   : > { %v4230_v63 = vsel %vm7888_vm13, %v3963_v51, 0.0  ;;  %v4232_v56 = vsel %vm7890_vm15, %v3964_v58, 0.0  ;;  %v4266_v54 = vadd.f32 %v4265_v7, %v4264_v41 }
 0x549   : > { %v4163_v20 = vadd.f32 %v4162_v11, %v4161_v24  ;;  %v4198_v49 = vadd.f32 %v4197_v21, %v4196_v2  ;;  %v4231_v28 = vadd.f32 %v4230_v63, %v4229_v55  ;;  %v3720_v13 = vpop.permute.xlu1 %3719 }
 0x54a   : > { %v3979_v18 = vmul.f32 %v3851_v62, %v3720_v13 }
 0x54b   : > { %v4164_v32 = vrot.slane %v4163_v20, 1  ;;  %v4199_v59 = vrot.slane %v4198_v49, 2  ;;  %v4233_v4 = vadd.f32 %v4232_v56, %v4231_v28 }
 0x54c   : > { %v4267_v0 = vsel %vm7891_vm7, %v3979_v18, 0.0 }
 0x54d   : > { %v4165_v5 = vadd.f32 %v4164_v32, %v4163_v20  ;;  %v4200_v6 = vadd.f32 %v4199_v59, %v4198_v49  ;;  %v4234_v25 = vrot.slane %v4233_v4, 4  ;;  %v3724_v3 = vpop.permute.xlu1 %3723  ;;  %v4268_v23 = vadd.f32 %v4267_v0, %v4266_v54 }
 0x54e   : > { %v3980_v15 = vmul.f32 %v3852_v30, %v3724_v3 }
 0x54f   : > { %v4201_v31 = vrot.slane %v4200_v6, 1  ;;  %v4235_v10 = vadd.f32 %v4234_v25, %v4233_v4  ;;  %v4288_v62 = vsel %vm3169_vm3, %v4165_v5, %v7240_v45  ;;  %vm7893_vm3 = vmmov %vm7794_vm0 }
 0x550   : > { %v4269_v16 = vsel %vm7892_vm8, %v3980_v15, 0.0 }
 0x551   : > { %v4202_v48 = vadd.f32 %v4201_v31, %v4200_v6  ;;  %v4236_v19 = vrot.slane %v4235_v10, 2  ;;  %v4270_v43 = vadd.f32 %v4269_v16, %v4268_v23 }
 0x553   : > { %v4237_v1 = vadd.f32 %v4236_v19, %v4235_v10  ;;  %v4271_v37 = vrot.slane %v4270_v43, 4  ;;  %v4289_v46 = vsel %vm3171_vm4, %v4202_v48, %v4288_v62 }
 0x555   : > { %v4238_v39 = vrot.slane %v4237_v1, 1  ;;  %v4272_v27 = vadd.f32 %v4271_v37, %v4270_v43 }
 0x557   : > { %v4239_v35 = vadd.f32 %v4238_v39, %v4237_v1  ;;  %v4273_v36 = vrot.slane %v4272_v27, 2 }
 0x559   : > { %v4274_v44 = vadd.f32 %v4273_v36, %v4272_v27  ;;  %v4290_v26 = vsel %vm3173_vm5, %v4239_v35, %v4289_v46 }
 0x55b   : > { %v4275_v45 = vrot.slane %v4274_v44, 1 }
 0x55d   : > { %v4276_v38 = vadd.f32 %v4275_v45, %v4274_v44 }
 0x55f   : > { %v4291_v53 = vsel %vm3175_vm6, %v4276_v38, %v4290_v26 }
 0x560   : > { %4293 = vst.msk [vmem:[%s284_s17] sm:$0xff] %vm7893_vm3, %v4291_v53 }
 0x561   : > { %5335 = shalt.err (!%p5332_p10)
}
 0x562   : > { %s5336_s18 = scalar_lea.hbm %s7605_s12, 128  ;;  %s5340_s29 = scalar_lea.hbm %s7656_s6, 256 }
 0x563   : > { %p5337_p11 = scmp.ne.s32.totalorder %s7605_s12, %s5336_s18  ;;  %p5341_p0 = scmp.lt.u32.totalorder %s7605_s12, %s7656_s6 }
 0x564   : > { %p5342_p1 = scmp.lt.u32.totalorder %s5340_s29, %s5336_s18  ;;  %p5344_p3 = scmp.lt.u32.totalorder %s5336_s18, %s7605_s12 }
 0x565   : > { %p5338_p12 = pnand %p5337_p11, %p5466_p5 }
 0x566   : > { %p5343_p2 = por %p5342_p1, %p5341_p0 }
 0x567   : > { %p5339_p13 = pneg %p5338_p12 }
 0x568   : > { %p5345_p4 = por %p5344_p3, %p5343_p2 }
 0x56a   : > { %p5346_p7 = pnand %p5345_p4, %p5339_p13 }
 0x56c   : > { %5349 = shalt.err (!%p5346_p7)
}
 0x56d   : > { %4793 = dma.vmem_to_hbm [thread:$0]  (%p5466_p5), %s7607_s9, 128, %s7605_s12, %s4300_s15  }
 0x56e PF: > { %p4803_p8 = scmp.ge.s32.totalorder %s5388_s24, 2  ;;  %s4338_s17 = sand.u32 1, %s5376_s21  }
 0x56f   : > { %s4339_s10 = scalar_lea.sflag [#allocation3], %s4338_s17 }
 0x570   : > { %p4797_p9 = pnand %p4803_p8, %p5470_p6 }
 0x572   : > { %5367 = dma.done.wait (!%p4797_p9), %s4339_s10, 128  }
 0x573   : > { %5369 = vsyncadd (!%p4797_p9), %s4339_s10, 4294967168  ;;  %s4348_s11 = scalar_lea.sflag [#allocation5], %s4338_s17 }
 0x574   : > { %5371 = dma.done.wait (!%p4797_p9), %s4348_s11, 128  }
 0x575   : > { %5373 = vsyncadd (!%p4797_p9), %s4348_s11, 4294967168  ;;  %p20_p5 = scmp.ge.s32.totalorder %s5453_s27, 4   ;;  %s7894_s21 = smov %s5380_s22 }
 0x576   : > { %s7895_s22 = smov %s5384_s23  ;;  %s7896_s23 = smov %s5464_s30 }
 0x577   : > { %s7897_s24 = smov %s5453_s27  ;;  %22 = sbr.rel (!%p20_p5) target bundleno = 5 (0x5), region = 98 }
 0x57e   :  { %4353 = vsyncpa [#allocation3], 1 }
 0x57f   :  { %4355 = vsyncpa [#allocation3 + $0x1], 1 }
 0x580   :  { %4356 = vsyncpa [#allocation5], 1 }
 0x581   :  { %4358 = vsyncpa [#allocation5 + $0x1], 1 }

</bundles_post_ra>
